<compile_context>
chip_gen: v5e
topology: v5e:2x2
jax: 0.10.0
libtpu: 0.0.40
codegen_flags: <defaults>
</compile_context>

<pallas_src>
import functools

import jax
import jax.numpy as jnp
from jax import lax
from jax.experimental import pallas as pl
from jax.experimental.pallas import tpu as pltpu


def _round_up(x, m):
    return ((x + m - 1) // m) * m


def _vmem_limit_bytes(block_bytes):
    # generous 2x margin (everything double-buffered), floor 16 MiB,
    # cap 64 MiB so it is valid on v5e / v6e / v7x alike.
    need = 2 * int(block_bytes)
    return int(min(max(need, 16 * 1024 * 1024), 64 * 1024 * 1024))


# ----------------------------------------------------------------------------
# Deterministic parameter init (mirrors orthogonal_init in the PyTorch module)
# ----------------------------------------------------------------------------
def _orthogonal(key, shape, gain=1.0):
    """Mimics torch.nn.init.orthogonal_ for a 2-D weight of `shape`."""
    rows, cols = shape
    a = jax.random.normal(key, (rows, cols), dtype=jnp.float32)
    if rows < cols:
        a = a.T
    q, r = jnp.linalg.qr(a)
    q = q * jnp.sign(jnp.diag(r))[None, :]
    if rows < cols:
        q = q.T
    return (gain * q).astype(jnp.float32)


def init_actor_params(key, actor_input_dim, rnn_hidden_dim, action_dim):
    k1, k2, k3, k4 = jax.random.split(key, 4)
    H = rnn_hidden_dim
    # PyTorch stores Linear weight as (out, in) and GRUCell weight_{ih,hh} as
    # (3H, in); orthogonal-init in that layout, then transpose for x @ W.
    w1 = _orthogonal(k1, (H, actor_input_dim), gain=1.0).T          # (in, H)
    b1 = jnp.zeros((1, H), jnp.float32)
    w_ih = _orthogonal(k2, (3 * H, H), gain=1.0).T                  # (H, 3H)
    b_ih = jnp.zeros((1, 3 * H), jnp.float32)
    w_hh = _orthogonal(k3, (3 * H, H), gain=1.0).T                  # (H, 3H)
    b_hh = jnp.zeros((1, 3 * H), jnp.float32)
    w2 = _orthogonal(k4, (action_dim, H), gain=0.01).T              # (H, A)
    b2 = jnp.zeros((1, action_dim), jnp.float32)
    return dict(w1=w1, b1=b1, w_ih=w_ih, b_ih=b_ih,
                w_hh=w_hh, b_hh=b_hh, w2=w2, b2=b2)


def _sigmoid(x):
    # tanh form -> EUP slot, no exp overflow.
    return 0.5 * (jnp.tanh(0.5 * x) + 1.0)


# ----------------------------------------------------------------------------
# Kernel 1 (hoisted, fully parallel over T*B rows):
#   x1 = relu(x @ w1 + b1);  gi = x1 @ w_ih + b_ih
# ----------------------------------------------------------------------------
def _fc1_gates_kernel(x_ref, w1_ref, b1_ref, wih_ref, bih_ref, gi_ref):
    x1 = jnp.dot(x_ref[...], w1_ref[...], preferred_element_type=jnp.float32)
    x1 = jnp.maximum(x1 + b1_ref[...], 0.0)
    gi_ref[...] = jnp.dot(x1.astype(wih_ref.dtype), wih_ref[...],
                          preferred_element_type=jnp.float32) + bih_ref[...]


# ----------------------------------------------------------------------------
# Kernel 2 (serial recurrence): per grid step (b_block, t_chunk) run Tc GRU
# steps + fc2 + softmax; hidden state resident in the output block.
# ----------------------------------------------------------------------------
def _gru_fc2_kernel(gi_ref, h0_ref, whh_ref, bhh_ref, w2_ref, b2_ref,
                    prob_ref, h_ref, *, seq_len):
    tchunk = pl.program_id(1)
    Hp = h_ref.shape[-1]
    Tc = gi_ref.shape[0]

    # Initialize the resident hidden-state accumulator once per batch block
    # (time-chunk axis is the inner, "arbitrary" grid axis).
    @pl.when(tchunk == 0)
    def _():
        h_ref[...] = h0_ref[...]

    h_start = h_ref[...]                                  # (bt, Hp) f32
    carry0 = (h_start, h_start.astype(whh_ref.dtype))     # (f32, bf16 shadow)

    def step(t, carry):
        h, h_bf = carry
        gi = gi_ref[t]                                    # (bt, 3Hp) f32
        gh = jnp.dot(h_bf, whh_ref[...],
                     preferred_element_type=jnp.float32) + bhh_ref[...]

        # PyTorch GRUCell gate order [r | z | n]; gate boundaries are lane
        # aligned because Hp is a multiple of 128.
        r = _sigmoid(gi[:, 0:Hp] + gh[:, 0:Hp])
        z = _sigmoid(gi[:, Hp:2 * Hp] + gh[:, Hp:2 * Hp])
        n = jnp.tanh(gi[:, 2 * Hp:] + r * gh[:, 2 * Hp:])
        h_new = (1.0 - z) * n + z * h

        # fc2 + exact softmax. Padded logit lanes carry a -1e30 bias -> exp==0.
        logits = jnp.dot(h_new.astype(w2_ref.dtype), w2_ref[...],
                         preferred_element_type=jnp.float32) + b2_ref[...]
        m = jnp.max(logits, axis=-1, keepdims=True)
        e = jnp.exp(logits - m)
        prob_ref[t] = e / jnp.sum(e, axis=-1, keepdims=True)

        if seq_len % Tc != 0:
            # Static-trace-time branch: only emitted when the time axis was
            # padded; padded steps must not advance the hidden state.
            h_new = jnp.where(tchunk * Tc + t < seq_len, h_new, h)

        # bf16 shadow of h for the next step's matmul (off the critical path:
        # can overlap with fc2/softmax/prob store of this step).
        return h_new, h_new.astype(whh_ref.dtype)

    h_last, _ = lax.fori_loop(0, Tc, step, carry0, unroll=True)
    h_ref[...] = h_last


# ----------------------------------------------------------------------------
# Wrapper: pad to lane/sublane-friendly shapes and launch the two kernels.
# ----------------------------------------------------------------------------
@functools.partial(jax.jit, static_argnames=("action_dim",))
def actor_rnn_forward_seq(params, x_seq, h0, action_dim):
    """x_seq: (T, B, actor_input_dim), h0: (B, H).
    Returns (probs (T, B, action_dim), h_T (B, H)).
    Pass zeros for h0 to match PyTorch's `self.rnn_hidden is None` case."""
    T, B, D = x_seq.shape
    H = h0.shape[-1]
    A = action_dim

    Dp = _round_up(D, 128)
    Hp = _round_up(H, 128)
    Ap = _round_up(A, 128)

    # Batch tile: multiple of 16 (bf16 packs (16,128) per vreg); split into
    # >=2 blocks when B allows so both TensorCores are used on v7x.
    Bp16 = _round_up(B, 16)
    if Bp16 <= 256:
        bt = Bp16 if Bp16 < 32 else _round_up((Bp16 + 1) // 2, 16)
    else:
        bt = 256   # note: 128 is enough on v5e (128x128 MXU, smaller scoped VMEM)
    Bp = _round_up(B, bt)

    # Time chunk per grid step (amortizes ~0.35us fixed overhead per step).
    Tc = T if T <= 32 else 16
    Tp = _round_up(T, Tc)

    f32, bf16 = jnp.float32, jnp.bfloat16

    # --- pad activations (built directly in bf16 / f32; no extra copies) ----
    xp = jnp.zeros((Tp, Bp, Dp), bf16).at[:T, :B, :D].set(x_seq.astype(bf16))
    h0p = jnp.zeros((Bp, Hp), f32).at[:B, :H].set(h0.astype(f32))

    # --- pad weights (zero padding keeps padded hidden lanes at exactly 0) --
    w1p = jnp.zeros((Dp, Hp), f32).at[:D, :H].set(params["w1"]).astype(bf16)
    b1p = jnp.zeros((1, Hp), f32).at[:, :H].set(params["b1"])

    w_ihp = jnp.zeros((Hp, 3 * Hp), f32)
    b_ihp = jnp.zeros((1, 3 * Hp), f32)
    w_hhp = jnp.zeros((Hp, 3 * Hp), f32)
    b_hhp = jnp.zeros((1, 3 * Hp), f32)
    for g in range(3):                       # keep PyTorch [r|z|n] gate order
        src = slice(g * H, (g + 1) * H)
        dst = slice(g * Hp, g * Hp + H)
        w_ihp = w_ihp.at[:H, dst].set(params["w_ih"][:, src])
        b_ihp = b_ihp.at[:, dst].set(params["b_ih"][:, src])
        w_hhp = w_hhp.at[:H, dst].set(params["w_hh"][:, src])
        b_hhp = b_hhp.at[:, dst].set(params["b_hh"][:, src])
    w_ihp = w_ihp.astype(bf16)
    w_hhp = w_hhp.astype(bf16)

    w2p = jnp.zeros((Hp, Ap), f32).at[:H, :A].set(params["w2"]).astype(bf16)
    # padded logit lanes get a huge negative bias so softmax ignores them
    b2p = jnp.full((1, Ap), -1e30, f32).at[:, :A].set(params["b2"])

    # ----------------- Stage 1: hoisted fc1 + input-gate matmul -------------
    R = Tp * Bp
    rt = min(512, R)                         # R is a multiple of 16
    Rp = _round_up(R, rt)
    x_flat = xp.reshape(R, Dp)
    if Rp != R:
        x_flat = jnp.zeros((Rp, Dp), bf16).at[:R].set(x_flat)

    const1 = lambda r: (0, 0)                # weights resident in VMEM
    vmem1 = _vmem_limit_bytes(
        rt * Dp * 2 + Dp * Hp * 2 + Hp * 4
        + Hp * 3 * Hp * 2 + 3 * Hp * 4 + rt * 3 * Hp * 4)

    gi_flat = pl.pallas_call(
        _fc1_gates_kernel,
        grid=(Rp // rt,),
        in_specs=[
            pl.BlockSpec((rt, Dp), lambda r: (r, 0)),            # x rows
            pl.BlockSpec((Dp, Hp), const1),                      # w1
            pl.BlockSpec((1, Hp), const1),                       # b1
            pl.BlockSpec((Hp, 3 * Hp), const1),                  # w_ih
            pl.BlockSpec((1, 3 * Hp), const1),                   # b_ih
        ],
        out_specs=pl.BlockSpec((rt, 3 * Hp), lambda r: (r, 0)),  # gi rows
        out_shape=jax.ShapeDtypeStruct((Rp, 3 * Hp), f32),
        compiler_params=pltpu.CompilerParams(
            dimension_semantics=("parallel",),
            vmem_limit_bytes=vmem1),
    )(x_flat, w1p, b1p, w_ihp, b_ihp)

    gi = gi_flat[:R].reshape(Tp, Bp, 3 * Hp)

    # ----------------- Stage 2: serial GRU recurrence + fc2 + softmax -------
    const2 = lambda b, t: (0, 0)
    vmem2 = _vmem_limit_bytes(
        Tc * bt * 3 * Hp * 4 + bt * Hp * 4
        + Hp * 3 * Hp * 2 + 3 * Hp * 4 + Hp * Ap * 2 + Ap * 4
        + Tc * bt * Ap * 4 + bt * Hp * 4)

    probs_p, h_out_p = pl.pallas_call(
        functools.partial(_gru_fc2_kernel, seq_len=T),
        grid=(Bp // bt, Tp // Tc),
        in_specs=[
            pl.BlockSpec((Tc, bt, 3 * Hp), lambda b, t: (t, b, 0)),  # gi chunk
            pl.BlockSpec((bt, Hp),         lambda b, t: (b, 0)),     # h0
            pl.BlockSpec((Hp, 3 * Hp),     const2),                  # w_hh
            pl.BlockSpec((1, 3 * Hp),      const2),                  # b_hh
            pl.BlockSpec((Hp, Ap),         const2),                  # w2
            pl.BlockSpec((1, Ap),          const2),                  # b2
        ],
        out_specs=(
            pl.BlockSpec((Tc, bt, Ap), lambda b, t: (t, b, 0)),      # probs
            pl.BlockSpec((bt, Hp),     lambda b, t: (b, 0)),         # h (resident)
        ),
        out_shape=(
            jax.ShapeDtypeStruct((Tp, Bp, Ap), f32),
            jax.ShapeDtypeStruct((Bp, Hp), f32),
        ),
        compiler_params=pltpu.CompilerParams(
            dimension_semantics=("parallel", "arbitrary"),
            vmem_limit_bytes=vmem2),
    )(gi, h0p, w_hhp, b_hhp, w2p, b2p)

    return probs_p[:T, :B, :A], h_out_p[:B, :H]


# ----------------------------------------------------------------------------
# Pure-JAX reference (same math, f32 activations; weights rounded to bf16
# like the kernel path).
# ----------------------------------------------------------------------------
def reference_forward(params, x_seq, h0):
    r32 = lambda w: w.astype(jnp.bfloat16).astype(jnp.float32)
    w1, w_ih, w_hh, w2 = (r32(params["w1"]), r32(params["w_ih"]),
                          r32(params["w_hh"]), r32(params["w2"]))
    b1, b_ih, b_hh, b2 = params["b1"], params["b_ih"], params["b_hh"], params["b2"]
    H = h0.shape[-1]

    def step(h, x):
        x1 = jnp.maximum(x @ w1 + b1, 0.0)
        gi = x1 @ w_ih + b_ih
        gh = h @ w_hh + b_hh
        r = jax.nn.sigmoid(gi[:, :H] + gh[:, :H])
        z = jax.nn.sigmoid(gi[:, H:2 * H] + gh[:, H:2 * H])
        n = jnp.tanh(gi[:, 2 * H:] + r * gh[:, 2 * H:])
        h_new = (1.0 - z) * n + z * h
        prob = jax.nn.softmax(h_new @ w2 + b2, axis=-1)
        return h_new, prob

    h_T, probs = jax.lax.scan(step, h0, x_seq)
    return probs, h_T


def _check(params, x_seq, h0, A):
    probs, h_T = actor_rnn_forward_seq(params, x_seq, h0, action_dim=A)
    jax.block_until_ready((probs, h_T))
    T, B, _ = x_seq.shape
    assert probs.shape == (T, B, A) and h_T.shape == (B, h0.shape[-1])
    assert bool(jnp.all(jnp.abs(jnp.sum(probs, axis=-1) - 1.0) < 1e-3))
    ref_probs, ref_h = reference_forward(params, x_seq, h0)
    assert bool(jnp.allclose(probs, ref_probs, atol=1e-2))
    assert bool(jnp.allclose(h_T, ref_h, atol=3e-2))


if __name__ == "__main__":
    # Shapes consistent with the module's forward (run over a rollout):
    #   seq=8, batch=8, actor_input_dim=12, rnn_hidden_dim=32, action_dim=5
    T, B, D_IN, H, A = 8, 8, 12, 32, 5

    key = jax.random.PRNGKey(0)
    k_params, k_x, k_x2 = jax.random.split(key, 3)

    params = init_actor_params(k_params, D_IN, H, A)

    # Test 1: the canonical small shape.
    x_seq = jax.random.normal(k_x, (T, B, D_IN), dtype=jnp.float32)
    h0 = jnp.zeros((B, H), jnp.float32)      # self.rnn_hidden is None -> zeros
    _check(params, x_seq, h0, A)

    # Test 2: odd T / B to exercise the time-padding mask and >1 batch block.
    T2, B2 = 37, 30
    x_seq2 = jax.random.normal(k_x2, (T2, B2, D_IN), dtype=jnp.float32)
    h0_2 = jnp.zeros((B2, H), jnp.float32)
    _check(params, x_seq2, h0_2, A)

    print("KERNEL_OK")
</pallas_src>

<mosaic_0001>
module attributes {stable_mosaic.version = 11 : i64} {
  func.func @_fc1_gates_kernel(%arg0: i32, %arg1: memref<128x128xbf16, #tpu.memory_space<vmem>>, %arg2: memref<128x128xbf16, #tpu.memory_space<vmem>>, %arg3: memref<1x128xf32, #tpu.memory_space<vmem>>, %arg4: memref<128x384xbf16, #tpu.memory_space<vmem>>, %arg5: memref<1x384xf32, #tpu.memory_space<vmem>>, %arg6: memref<128x384xf32, #tpu.memory_space<vmem>>) attributes {dimension_semantics = [#tpu.dimension_semantics<parallel>], iteration_bounds = array<i64: 1>, scalar_prefetch = 0 : i64, scratch_operands = 0 : i64, tpu.core_type = #tpu.core_type<tc>, window_params = [{transform_indices = @transform_0, window_bounds = array<i64: 128, 128>}, {pipeline_mode = #tpu.pipeline_mode<synchronous>, transform_indices = @transform_1, window_bounds = array<i64: 128, 128>}, {pipeline_mode = #tpu.pipeline_mode<synchronous>, transform_indices = @transform_2, window_bounds = array<i64: 1, 128>}, {pipeline_mode = #tpu.pipeline_mode<synchronous>, transform_indices = @transform_3, window_bounds = array<i64: 128, 384>}, {pipeline_mode = #tpu.pipeline_mode<synchronous>, transform_indices = @transform_4, window_bounds = array<i64: 1, 384>}, {transform_indices = @transform_5, window_bounds = array<i64: 128, 384>}]} {
    %c0 = arith.constant 0 : index
    %c0_0 = arith.constant 0 : index
    %0 = vector.load %arg1[%c0, %c0_0] : memref<128x128xbf16, #tpu.memory_space<vmem>>, vector<128x128xbf16>
    %c0_1 = arith.constant 0 : index
    %c0_2 = arith.constant 0 : index
    %1 = vector.load %arg2[%c0_1, %c0_2] : memref<128x128xbf16, #tpu.memory_space<vmem>>, vector<128x128xbf16>
    %cst = arith.constant dense<0.000000e+00> : vector<128x128xf32>
    %2 = tpu.matmul %0, %1, %cst {dimension_numbers = #tpu.dot_dimension_numbers<[1], [0], [0], [1], [0, 0, 1, 1], [], []>} : vector<128x128xbf16>, vector<128x128xbf16>, vector<128x128xf32> -> vector<128x128xf32>
    %c0_3 = arith.constant 0 : index
    %c0_4 = arith.constant 0 : index
    %3 = vector.load %arg3[%c0_3, %c0_4] : memref<1x128xf32, #tpu.memory_space<vmem>>, vector<1x128xf32>
    %4 = vector.broadcast %3 : vector<1x128xf32> to vector<128x128xf32>
    %5 = arith.addf %2, %4 : vector<128x128xf32>
    %cst_5 = arith.constant 0.000000e+00 : f32
    %6 = vector.broadcast %cst_5 : f32 to vector<128x128xf32>
    %7 = arith.maximumf %5, %6 : vector<128x128xf32>
    %8 = arith.truncf %7 : vector<128x128xf32> to vector<128x128xbf16>
    %c0_6 = arith.constant 0 : index
    %c0_7 = arith.constant 0 : index
    %9 = vector.load %arg4[%c0_6, %c0_7] : memref<128x384xbf16, #tpu.memory_space<vmem>>, vector<128x384xbf16>
    %cst_8 = arith.constant dense<0.000000e+00> : vector<128x384xf32>
    %10 = tpu.matmul %8, %9, %cst_8 {dimension_numbers = #tpu.dot_dimension_numbers<[1], [0], [0], [1], [0, 0, 1, 1], [], []>} : vector<128x128xbf16>, vector<128x384xbf16>, vector<128x384xf32> -> vector<128x384xf32>
    %c0_9 = arith.constant 0 : index
    %c0_10 = arith.constant 0 : index
    %11 = vector.load %arg5[%c0_9, %c0_10] : memref<1x384xf32, #tpu.memory_space<vmem>>, vector<1x384xf32>
    %12 = vector.broadcast %11 : vector<1x384xf32> to vector<128x384xf32>
    %13 = arith.addf %10, %12 : vector<128x384xf32>
    %c0_11 = arith.constant 0 : index
    %c0_12 = arith.constant 0 : index
    %14 = vector.load %arg6[%c0_11, %c0_12] : memref<128x384xf32, #tpu.memory_space<vmem>>, vector<128x384xf32>
    tpu.vector_store %arg6[%c0_11, %c0_12], %13 {strides = array<i32>} : memref<128x384xf32, #tpu.memory_space<vmem>>, vector<128x384xf32>,
    return
  }
  func.func @transform_0(%arg0: i32) -> (i32, i32) {
    %c0_i32 = arith.constant 0 : i32
    %c0_i32_0 = arith.constant 0 : i32
    return %arg0, %c0_i32 : i32, i32
  }
  func.func @transform_1(%arg0: i32) -> (i32, i32) {
    %c0_i32 = arith.constant 0 : i32
    %c0_i32_0 = arith.constant 0 : i32
    %c0_i32_1 = arith.constant 0 : i32
    return %c0_i32, %c0_i32_0 : i32, i32
  }
  func.func @transform_2(%arg0: i32) -> (i32, i32) {
    %c0_i32 = arith.constant 0 : i32
    %c0_i32_0 = arith.constant 0 : i32
    %c0_i32_1 = arith.constant 0 : i32
    return %c0_i32, %c0_i32_0 : i32, i32
  }
  func.func @transform_3(%arg0: i32) -> (i32, i32) {
    %c0_i32 = arith.constant 0 : i32
    %c0_i32_0 = arith.constant 0 : i32
    %c0_i32_1 = arith.constant 0 : i32
    return %c0_i32, %c0_i32_0 : i32, i32
  }
  func.func @transform_4(%arg0: i32) -> (i32, i32) {
    %c0_i32 = arith.constant 0 : i32
    %c0_i32_0 = arith.constant 0 : i32
    %c0_i32_1 = arith.constant 0 : i32
    return %c0_i32, %c0_i32_0 : i32, i32
  }
  func.func @transform_5(%arg0: i32) -> (i32, i32) {
    %c0_i32 = arith.constant 0 : i32
    %c0_i32_0 = arith.constant 0 : i32
    return %arg0, %c0_i32 : i32, i32
  }
}

module attributes {stable_mosaic.version = 11 : i64} {
  func.func @_gru_fc2_kernel(%arg0: i32, %arg1: i32, %arg2: memref<8x16x384xf32, #tpu.memory_space<vmem>>, %arg3: memref<16x128xf32, #tpu.memory_space<vmem>>, %arg4: memref<128x384xbf16, #tpu.memory_space<vmem>>, %arg5: memref<1x384xf32, #tpu.memory_space<vmem>>, %arg6: memref<128x128xbf16, #tpu.memory_space<vmem>>, %arg7: memref<1x128xf32, #tpu.memory_space<vmem>>, %arg8: memref<8x16x128xf32, #tpu.memory_space<vmem>>, %arg9: memref<16x128xf32, #tpu.memory_space<vmem>>) attributes {dimension_semantics = [#tpu.dimension_semantics<parallel>, #tpu.dimension_semantics<arbitrary>], iteration_bounds = array<i64: 1, 1>, scalar_prefetch = 0 : i64, scratch_operands = 0 : i64, tpu.core_type = #tpu.core_type<tc>, window_params = [{transform_indices = @transform_0, window_bounds = array<i64: 8, 16, 384>}, {transform_indices = @transform_1, window_bounds = array<i64: 16, 128>}, {pipeline_mode = #tpu.pipeline_mode<synchronous>, transform_indices = @transform_2, window_bounds = array<i64: 128, 384>}, {pipeline_mode = #tpu.pipeline_mode<synchronous>, transform_indices = @transform_3, window_bounds = array<i64: 1, 384>}, {pipeline_mode = #tpu.pipeline_mode<synchronous>, transform_indices = @transform_4, window_bounds = array<i64: 128, 128>}, {pipeline_mode = #tpu.pipeline_mode<synchronous>, transform_indices = @transform_5, window_bounds = array<i64: 1, 128>}, {transform_indices = @transform_6, window_bounds = array<i64: 8, 16, 128>}, {transform_indices = @transform_7, window_bounds = array<i64: 16, 128>}]} {
    %c0_i32 = arith.constant 0 : i32
    %0 = arith.cmpi eq, %arg1, %c0_i32 : i32
    %1 = arith.extui %0 : i1 to i32
    %c0_i32_0 = arith.constant 0 : i32
    %2 = arith.cmpi ne, %1, %c0_i32_0 : i32
    scf.if %2 {
      %c0_188 = arith.constant 0 : index
      %c0_189 = arith.constant 0 : index
      %470 = vector.load %arg3[%c0_188, %c0_189] : memref<16x128xf32, #tpu.memory_space<vmem>>, vector<16x128xf32>
      %c0_190 = arith.constant 0 : index
      %c0_191 = arith.constant 0 : index
      %471 = vector.load %arg9[%c0_190, %c0_191] : memref<16x128xf32, #tpu.memory_space<vmem>>, vector<16x128xf32>
      tpu.vector_store %arg9[%c0_190, %c0_191], %470 {strides = array<i32>} : memref<16x128xf32, #tpu.memory_space<vmem>>, vector<16x128xf32>,
    } else {
    }
    %c0 = arith.constant 0 : index
    %c0_1 = arith.constant 0 : index
    %3 = vector.load %arg9[%c0, %c0_1] : memref<16x128xf32, #tpu.memory_space<vmem>>, vector<16x128xf32>
    %4 = arith.truncf %3 : vector<16x128xf32> to vector<16x128xbf16>
    %c0_i32_2 = arith.constant 0 : i32
    %5 = arith.index_cast %c0_i32_2 : i32 to index
    %c0_3 = arith.constant 0 : index
    %c0_4 = arith.constant 0 : index
    %6 = vector.load %arg2[%5, %c0_3, %c0_4] : memref<8x16x384xf32, #tpu.memory_space<vmem>>, vector<1x16x384xf32>
    %7 = vector.shape_cast %6 : vector<1x16x384xf32> to vector<16x384xf32>
    %c0_5 = arith.constant 0 : index
    %c0_6 = arith.constant 0 : index
    %8 = vector.load %arg4[%c0_5, %c0_6] : memref<128x384xbf16, #tpu.memory_space<vmem>>, vector<128x384xbf16>
    %cst = arith.constant dense<0.000000e+00> : vector<16x384xf32>
    %9 = tpu.matmul %4, %8, %cst {dimension_numbers = #tpu.dot_dimension_numbers<[1], [0], [0], [1], [0, 0, 1, 1], [], []>} : vector<16x128xbf16>, vector<128x384xbf16>, vector<16x384xf32> -> vector<16x384xf32>
    %c0_7 = arith.constant 0 : index
    %c0_8 = arith.constant 0 : index
    %10 = vector.load %arg5[%c0_7, %c0_8] : memref<1x384xf32, #tpu.memory_space<vmem>>, vector<1x384xf32>
    %11 = vector.broadcast %10 : vector<1x384xf32> to vector<16x384xf32>
    %12 = arith.addf %9, %11 : vector<16x384xf32>
    %13 = vector.extract_strided_slice %7 {offsets = [0, 0], sizes = [16, 128], strides = [1, 1]} : vector<16x384xf32> to vector<16x128xf32>
    %14 = vector.extract_strided_slice %12 {offsets = [0, 0], sizes = [16, 128], strides = [1, 1]} : vector<16x384xf32> to vector<16x128xf32>
    %15 = arith.addf %13, %14 : vector<16x128xf32>
    %cst_9 = arith.constant 5.000000e-01 : f32
    %16 = vector.broadcast %cst_9 : f32 to vector<16x128xf32>
    %17 = arith.mulf %16, %15 : vector<16x128xf32>
    %18 = math.tanh %17 : vector<16x128xf32>
    %cst_10 = arith.constant 1.000000e+00 : f32
    %19 = vector.broadcast %cst_10 : f32 to vector<16x128xf32>
    %20 = arith.addf %18, %19 : vector<16x128xf32>
    %cst_11 = arith.constant 5.000000e-01 : f32
    %21 = vector.broadcast %cst_11 : f32 to vector<16x128xf32>
    %22 = arith.mulf %21, %20 : vector<16x128xf32>
    %23 = vector.extract_strided_slice %7 {offsets = [0, 128], sizes = [16, 128], strides = [1, 1]} : vector<16x384xf32> to vector<16x128xf32>
    %24 = vector.extract_strided_slice %12 {offsets = [0, 128], sizes = [16, 128], strides = [1, 1]} : vector<16x384xf32> to vector<16x128xf32>
    %25 = arith.addf %23, %24 : vector<16x128xf32>
    %cst_12 = arith.constant 5.000000e-01 : f32
    %26 = vector.broadcast %cst_12 : f32 to vector<16x128xf32>
    %27 = arith.mulf %26, %25 : vector<16x128xf32>
    %28 = math.tanh %27 : vector<16x128xf32>
    %cst_13 = arith.constant 1.000000e+00 : f32
    %29 = vector.broadcast %cst_13 : f32 to vector<16x128xf32>
    %30 = arith.addf %28, %29 : vector<16x128xf32>
    %cst_14 = arith.constant 5.000000e-01 : f32
    %31 = vector.broadcast %cst_14 : f32 to vector<16x128xf32>
    %32 = arith.mulf %31, %30 : vector<16x128xf32>
    %33 = vector.extract_strided_slice %7 {offsets = [0, 256], sizes = [16, 128], strides = [1, 1]} : vector<16x384xf32> to vector<16x128xf32>
    %34 = vector.extract_strided_slice %12 {offsets = [0, 256], sizes = [16, 128], strides = [1, 1]} : vector<16x384xf32> to vector<16x128xf32>
    %35 = arith.mulf %22, %34 : vector<16x128xf32>
    %36 = arith.addf %33, %35 : vector<16x128xf32>
    %37 = math.tanh %36 : vector<16x128xf32>
    %cst_15 = arith.constant 1.000000e+00 : f32
    %38 = vector.broadcast %cst_15 : f32 to vector<16x128xf32>
    %39 = arith.subf %38, %32 : vector<16x128xf32>
    %40 = arith.mulf %39, %37 : vector<16x128xf32>
    %41 = arith.mulf %32, %3 : vector<16x128xf32>
    %42 = arith.addf %40, %41 : vector<16x128xf32>
    %43 = arith.truncf %42 : vector<16x128xf32> to vector<16x128xbf16>
    %c0_16 = arith.constant 0 : index
    %c0_17 = arith.constant 0 : index
    %44 = vector.load %arg6[%c0_16, %c0_17] : memref<128x128xbf16, #tpu.memory_space<vmem>>, vector<128x128xbf16>
    %cst_18 = arith.constant dense<0.000000e+00> : vector<16x128xf32>
    %45 = tpu.matmul %43, %44, %cst_18 {dimension_numbers = #tpu.dot_dimension_numbers<[1], [0], [0], [1], [0, 0, 1, 1], [], []>} : vector<16x128xbf16>, vector<128x128xbf16>, vector<16x128xf32> -> vector<16x128xf32>
    %c0_19 = arith.constant 0 : index
    %c0_20 = arith.constant 0 : index
    %46 = vector.load %arg7[%c0_19, %c0_20] : memref<1x128xf32, #tpu.memory_space<vmem>>, vector<1x128xf32>
    %47 = vector.broadcast %46 : vector<1x128xf32> to vector<16x128xf32>
    %48 = arith.addf %45, %47 : vector<16x128xf32>
    %cst_21 = arith.constant dense<0xFF800000> : vector<16xf32>
    %49 = vector.multi_reduction <maximumf>, %48, %cst_21 [1] : vector<16x128xf32> to vector<16xf32>
    %50 = vector.shape_cast %49 : vector<16xf32> to vector<16x1xf32>
    %51 = vector.broadcast %50 : vector<16x1xf32> to vector<16x128xf32>
    %52 = arith.subf %48, %51 : vector<16x128xf32>
    %53 = math.exp %52 : vector<16x128xf32>
    %cst_22 = arith.constant dense<0.000000e+00> : vector<16xf32>
    %54 = vector.multi_reduction <add>, %53, %cst_22 [1] : vector<16x128xf32> to vector<16xf32>
    %55 = vector.shape_cast %54 : vector<16xf32> to vector<16x1xf32>
    %56 = vector.broadcast %55 : vector<16x1xf32> to vector<16x128xf32>
    %57 = arith.divf %53, %56 : vector<16x128xf32>
    %58 = arith.index_cast %c0_i32_2 : i32 to index
    %c0_23 = arith.constant 0 : index
    %c0_24 = arith.constant 0 : index
    %59 = vector.load %arg8[%58, %c0_23, %c0_24] : memref<8x16x128xf32, #tpu.memory_space<vmem>>, vector<1x16x128xf32>
    %60 = vector.shape_cast %59 : vector<1x16x128xf32> to vector<16x128xf32>
    %61 = vector.shape_cast %57 : vector<16x128xf32> to vector<1x16x128xf32>
    tpu.vector_store %arg8[%58, %c0_23, %c0_24], %61 {strides = array<i32>} : memref<8x16x128xf32, #tpu.memory_space<vmem>>, vector<1x16x128xf32>,
    %62 = arith.truncf %42 : vector<16x128xf32> to vector<16x128xbf16>
    %c1_i32 = arith.constant 1 : i32
    %63 = arith.index_cast %c1_i32 : i32 to index
    %c0_25 = arith.constant 0 : index
    %c0_26 = arith.constant 0 : index
    %64 = vector.load %arg2[%63, %c0_25, %c0_26] : memref<8x16x384xf32, #tpu.memory_space<vmem>>, vector<1x16x384xf32>
    %65 = vector.shape_cast %64 : vector<1x16x384xf32> to vector<16x384xf32>
    %c0_27 = arith.constant 0 : index
    %c0_28 = arith.constant 0 : index
    %66 = vector.load %arg4[%c0_27, %c0_28] : memref<128x384xbf16, #tpu.memory_space<vmem>>, vector<128x384xbf16>
    %cst_29 = arith.constant dense<0.000000e+00> : vector<16x384xf32>
    %67 = tpu.matmul %62, %66, %cst_29 {dimension_numbers = #tpu.dot_dimension_numbers<[1], [0], [0], [1], [0, 0, 1, 1], [], []>} : vector<16x128xbf16>, vector<128x384xbf16>, vector<16x384xf32> -> vector<16x384xf32>
    %c0_30 = arith.constant 0 : index
    %c0_31 = arith.constant 0 : index
    %68 = vector.load %arg5[%c0_30, %c0_31] : memref<1x384xf32, #tpu.memory_space<vmem>>, vector<1x384xf32>
    %69 = vector.broadcast %68 : vector<1x384xf32> to vector<16x384xf32>
    %70 = arith.addf %67, %69 : vector<16x384xf32>
    %71 = vector.extract_strided_slice %65 {offsets = [0, 0], sizes = [16, 128], strides = [1, 1]} : vector<16x384xf32> to vector<16x128xf32>
    %72 = vector.extract_strided_slice %70 {offsets = [0, 0], sizes = [16, 128], strides = [1, 1]} : vector<16x384xf32> to vector<16x128xf32>
    %73 = arith.addf %71, %72 : vector<16x128xf32>
    %cst_32 = arith.constant 5.000000e-01 : f32
    %74 = vector.broadcast %cst_32 : f32 to vector<16x128xf32>
    %75 = arith.mulf %74, %73 : vector<16x128xf32>
    %76 = math.tanh %75 : vector<16x128xf32>
    %cst_33 = arith.constant 1.000000e+00 : f32
    %77 = vector.broadcast %cst_33 : f32 to vector<16x128xf32>
    %78 = arith.addf %76, %77 : vector<16x128xf32>
    %cst_34 = arith.constant 5.000000e-01 : f32
    %79 = vector.broadcast %cst_34 : f32 to vector<16x128xf32>
    %80 = arith.mulf %79, %78 : vector<16x128xf32>
    %81 = vector.extract_strided_slice %65 {offsets = [0, 128], sizes = [16, 128], strides = [1, 1]} : vector<16x384xf32> to vector<16x128xf32>
    %82 = vector.extract_strided_slice %70 {offsets = [0, 128], sizes = [16, 128], strides = [1, 1]} : vector<16x384xf32> to vector<16x128xf32>
    %83 = arith.addf %81, %82 : vector<16x128xf32>
    %cst_35 = arith.constant 5.000000e-01 : f32
    %84 = vector.broadcast %cst_35 : f32 to vector<16x128xf32>
    %85 = arith.mulf %84, %83 : vector<16x128xf32>
    %86 = math.tanh %85 : vector<16x128xf32>
    %cst_36 = arith.constant 1.000000e+00 : f32
    %87 = vector.broadcast %cst_36 : f32 to vector<16x128xf32>
    %88 = arith.addf %86, %87 : vector<16x128xf32>
    %cst_37 = arith.constant 5.000000e-01 : f32
    %89 = vector.broadcast %cst_37 : f32 to vector<16x128xf32>
    %90 = arith.mulf %89, %88 : vector<16x128xf32>
    %91 = vector.extract_strided_slice %65 {offsets = [0, 256], sizes = [16, 128], strides = [1, 1]} : vector<16x384xf32> to vector<16x128xf32>
    %92 = vector.extract_strided_slice %70 {offsets = [0, 256], sizes = [16, 128], strides = [1, 1]} : vector<16x384xf32> to vector<16x128xf32>
    %93 = arith.mulf %80, %92 : vector<16x128xf32>
    %94 = arith.addf %91, %93 : vector<16x128xf32>
    %95 = math.tanh %94 : vector<16x128xf32>
    %cst_38 = arith.constant 1.000000e+00 : f32
    %96 = vector.broadcast %cst_38 : f32 to vector<16x128xf32>
    %97 = arith.subf %96, %90 : vector<16x128xf32>
    %98 = arith.mulf %97, %95 : vector<16x128xf32>
    %99 = arith.mulf %90, %42 : vector<16x128xf32>
    %100 = arith.addf %98, %99 : vector<16x128xf32>
    %101 = arith.truncf %100 : vector<16x128xf32> to vector<16x128xbf16>
    %c0_39 = arith.constant 0 : index
    %c0_40 = arith.constant 0 : index
    %102 = vector.load %arg6[%c0_39, %c0_40] : memref<128x128xbf16, #tpu.memory_space<vmem>>, vector<128x128xbf16>
    %cst_41 = arith.constant dense<0.000000e+00> : vector<16x128xf32>
    %103 = tpu.matmul %101, %102, %cst_41 {dimension_numbers = #tpu.dot_dimension_numbers<[1], [0], [0], [1], [0, 0, 1, 1], [], []>} : vector<16x128xbf16>, vector<128x128xbf16>, vector<16x128xf32> -> vector<16x128xf32>
    %c0_42 = arith.constant 0 : index
    %c0_43 = arith.constant 0 : index
    %104 = vector.load %arg7[%c0_42, %c0_43] : memref<1x128xf32, #tpu.memory_space<vmem>>, vector<1x128xf32>
    %105 = vector.broadcast %104 : vector<1x128xf32> to vector<16x128xf32>
    %106 = arith.addf %103, %105 : vector<16x128xf32>
    %cst_44 = arith.constant dense<0xFF800000> : vector<16xf32>
    %107 = vector.multi_reduction <maximumf>, %106, %cst_44 [1] : vector<16x128xf32> to vector<16xf32>
    %108 = vector.shape_cast %107 : vector<16xf32> to vector<16x1xf32>
    %109 = vector.broadcast %108 : vector<16x1xf32> to vector<16x128xf32>
    %110 = arith.subf %106, %109 : vector<16x128xf32>
    %111 = math.exp %110 : vector<16x128xf32>
    %cst_45 = arith.constant dense<0.000000e+00> : vector<16xf32>
    %112 = vector.multi_reduction <add>, %111, %cst_45 [1] : vector<16x128xf32> to vector<16xf32>
    %113 = vector.shape_cast %112 : vector<16xf32> to vector<16x1xf32>
    %114 = vector.broadcast %113 : vector<16x1xf32> to vector<16x128xf32>
    %115 = arith.divf %111, %114 : vector<16x128xf32>
    %116 = arith.index_cast %c1_i32 : i32 to index
    %c0_46 = arith.constant 0 : index
    %c0_47 = arith.constant 0 : index
    %117 = vector.load %arg8[%116, %c0_46, %c0_47] : memref<8x16x128xf32, #tpu.memory_space<vmem>>, vector<1x16x128xf32>
    %118 = vector.shape_cast %117 : vector<1x16x128xf32> to vector<16x128xf32>
    %119 = vector.shape_cast %115 : vector<16x128xf32> to vector<1x16x128xf32>
    tpu.vector_store %arg8[%116, %c0_46, %c0_47], %119 {strides = array<i32>} : memref<8x16x128xf32, #tpu.memory_space<vmem>>, vector<1x16x128xf32>,
    %120 = arith.truncf %100 : vector<16x128xf32> to vector<16x128xbf16>
    %c2_i32 = arith.constant 2 : i32
    %121 = arith.index_cast %c2_i32 : i32 to index
    %c0_48 = arith.constant 0 : index
    %c0_49 = arith.constant 0 : index
    %122 = vector.load %arg2[%121, %c0_48, %c0_49] : memref<8x16x384xf32, #tpu.memory_space<vmem>>, vector<1x16x384xf32>
    %123 = vector.shape_cast %122 : vector<1x16x384xf32> to vector<16x384xf32>
    %c0_50 = arith.constant 0 : index
    %c0_51 = arith.constant 0 : index
    %124 = vector.load %arg4[%c0_50, %c0_51] : memref<128x384xbf16, #tpu.memory_space<vmem>>, vector<128x384xbf16>
    %cst_52 = arith.constant dense<0.000000e+00> : vector<16x384xf32>
    %125 = tpu.matmul %120, %124, %cst_52 {dimension_numbers = #tpu.dot_dimension_numbers<[1], [0], [0], [1], [0, 0, 1, 1], [], []>} : vector<16x128xbf16>, vector<128x384xbf16>, vector<16x384xf32> -> vector<16x384xf32>
    %c0_53 = arith.constant 0 : index
    %c0_54 = arith.constant 0 : index
    %126 = vector.load %arg5[%c0_53, %c0_54] : memref<1x384xf32, #tpu.memory_space<vmem>>, vector<1x384xf32>
    %127 = vector.broadcast %126 : vector<1x384xf32> to vector<16x384xf32>
    %128 = arith.addf %125, %127 : vector<16x384xf32>
    %129 = vector.extract_strided_slice %123 {offsets = [0, 0], sizes = [16, 128], strides = [1, 1]} : vector<16x384xf32> to vector<16x128xf32>
    %130 = vector.extract_strided_slice %128 {offsets = [0, 0], sizes = [16, 128], strides = [1, 1]} : vector<16x384xf32> to vector<16x128xf32>
    %131 = arith.addf %129, %130 : vector<16x128xf32>
    %cst_55 = arith.constant 5.000000e-01 : f32
    %132 = vector.broadcast %cst_55 : f32 to vector<16x128xf32>
    %133 = arith.mulf %132, %131 : vector<16x128xf32>
    %134 = math.tanh %133 : vector<16x128xf32>
    %cst_56 = arith.constant 1.000000e+00 : f32
    %135 = vector.broadcast %cst_56 : f32 to vector<16x128xf32>
    %136 = arith.addf %134, %135 : vector<16x128xf32>
    %cst_57 = arith.constant 5.000000e-01 : f32
    %137 = vector.broadcast %cst_57 : f32 to vector<16x128xf32>
    %138 = arith.mulf %137, %136 : vector<16x128xf32>
    %139 = vector.extract_strided_slice %123 {offsets = [0, 128], sizes = [16, 128], strides = [1, 1]} : vector<16x384xf32> to vector<16x128xf32>
    %140 = vector.extract_strided_slice %128 {offsets = [0, 128], sizes = [16, 128], strides = [1, 1]} : vector<16x384xf32> to vector<16x128xf32>
    %141 = arith.addf %139, %140 : vector<16x128xf32>
    %cst_58 = arith.constant 5.000000e-01 : f32
    %142 = vector.broadcast %cst_58 : f32 to vector<16x128xf32>
    %143 = arith.mulf %142, %141 : vector<16x128xf32>
    %144 = math.tanh %143 : vector<16x128xf32>
    %cst_59 = arith.constant 1.000000e+00 : f32
    %145 = vector.broadcast %cst_59 : f32 to vector<16x128xf32>
    %146 = arith.addf %144, %145 : vector<16x128xf32>
    %cst_60 = arith.constant 5.000000e-01 : f32
    %147 = vector.broadcast %cst_60 : f32 to vector<16x128xf32>
    %148 = arith.mulf %147, %146 : vector<16x128xf32>
    %149 = vector.extract_strided_slice %123 {offsets = [0, 256], sizes = [16, 128], strides = [1, 1]} : vector<16x384xf32> to vector<16x128xf32>
    %150 = vector.extract_strided_slice %128 {offsets = [0, 256], sizes = [16, 128], strides = [1, 1]} : vector<16x384xf32> to vector<16x128xf32>
    %151 = arith.mulf %138, %150 : vector<16x128xf32>
    %152 = arith.addf %149, %151 : vector<16x128xf32>
    %153 = math.tanh %152 : vector<16x128xf32>
    %cst_61 = arith.constant 1.000000e+00 : f32
    %154 = vector.broadcast %cst_61 : f32 to vector<16x128xf32>
    %155 = arith.subf %154, %148 : vector<16x128xf32>
    %156 = arith.mulf %155, %153 : vector<16x128xf32>
    %157 = arith.mulf %148, %100 : vector<16x128xf32>
    %158 = arith.addf %156, %157 : vector<16x128xf32>
    %159 = arith.truncf %158 : vector<16x128xf32> to vector<16x128xbf16>
    %c0_62 = arith.constant 0 : index
    %c0_63 = arith.constant 0 : index
    %160 = vector.load %arg6[%c0_62, %c0_63] : memref<128x128xbf16, #tpu.memory_space<vmem>>, vector<128x128xbf16>
    %cst_64 = arith.constant dense<0.000000e+00> : vector<16x128xf32>
    %161 = tpu.matmul %159, %160, %cst_64 {dimension_numbers = #tpu.dot_dimension_numbers<[1], [0], [0], [1], [0, 0, 1, 1], [], []>} : vector<16x128xbf16>, vector<128x128xbf16>, vector<16x128xf32> -> vector<16x128xf32>
    %c0_65 = arith.constant 0 : index
    %c0_66 = arith.constant 0 : index
    %162 = vector.load %arg7[%c0_65, %c0_66] : memref<1x128xf32, #tpu.memory_space<vmem>>, vector<1x128xf32>
    %163 = vector.broadcast %162 : vector<1x128xf32> to vector<16x128xf32>
    %164 = arith.addf %161, %163 : vector<16x128xf32>
    %cst_67 = arith.constant dense<0xFF800000> : vector<16xf32>
    %165 = vector.multi_reduction <maximumf>, %164, %cst_67 [1] : vector<16x128xf32> to vector<16xf32>
    %166 = vector.shape_cast %165 : vector<16xf32> to vector<16x1xf32>
    %167 = vector.broadcast %166 : vector<16x1xf32> to vector<16x128xf32>
    %168 = arith.subf %164, %167 : vector<16x128xf32>
    %169 = math.exp %168 : vector<16x128xf32>
    %cst_68 = arith.constant dense<0.000000e+00> : vector<16xf32>
    %170 = vector.multi_reduction <add>, %169, %cst_68 [1] : vector<16x128xf32> to vector<16xf32>
    %171 = vector.shape_cast %170 : vector<16xf32> to vector<16x1xf32>
    %172 = vector.broadcast %171 : vector<16x1xf32> to vector<16x128xf32>
    %173 = arith.divf %169, %172 : vector<16x128xf32>
    %174 = arith.index_cast %c2_i32 : i32 to index
    %c0_69 = arith.constant 0 : index
    %c0_70 = arith.constant 0 : index
    %175 = vector.load %arg8[%174, %c0_69, %c0_70] : memref<8x16x128xf32, #tpu.memory_space<vmem>>, vector<1x16x128xf32>
    %176 = vector.shape_cast %175 : vector<1x16x128xf32> to vector<16x128xf32>
    %177 = vector.shape_cast %173 : vector<16x128xf32> to vector<1x16x128xf32>
    tpu.vector_store %arg8[%174, %c0_69, %c0_70], %177 {strides = array<i32>} : memref<8x16x128xf32, #tpu.memory_space<vmem>>, vector<1x16x128xf32>,
    %178 = arith.truncf %158 : vector<16x128xf32> to vector<16x128xbf16>
    %c3_i32 = arith.constant 3 : i32
    %179 = arith.index_cast %c3_i32 : i32 to index
    %c0_71 = arith.constant 0 : index
    %c0_72 = arith.constant 0 : index
    %180 = vector.load %arg2[%179, %c0_71, %c0_72] : memref<8x16x384xf32, #tpu.memory_space<vmem>>, vector<1x16x384xf32>
    %181 = vector.shape_cast %180 : vector<1x16x384xf32> to vector<16x384xf32>
    %c0_73 = arith.constant 0 : index
    %c0_74 = arith.constant 0 : index
    %182 = vector.load %arg4[%c0_73, %c0_74] : memref<128x384xbf16, #tpu.memory_space<vmem>>, vector<128x384xbf16>
    %cst_75 = arith.constant dense<0.000000e+00> : vector<16x384xf32>
    %183 = tpu.matmul %178, %182, %cst_75 {dimension_numbers = #tpu.dot_dimension_numbers<[1], [0], [0], [1], [0, 0, 1, 1], [], []>} : vector<16x128xbf16>, vector<128x384xbf16>, vector<16x384xf32> -> vector<16x384xf32>
    %c0_76 = arith.constant 0 : index
    %c0_77 = arith.constant 0 : index
    %184 = vector.load %arg5[%c0_76, %c0_77] : memref<1x384xf32, #tpu.memory_space<vmem>>, vector<1x384xf32>
    %185 = vector.broadcast %184 : vector<1x384xf32> to vector<16x384xf32>
    %186 = arith.addf %183, %185 : vector<16x384xf32>
    %187 = vector.extract_strided_slice %181 {offsets = [0, 0], sizes = [16, 128], strides = [1, 1]} : vector<16x384xf32> to vector<16x128xf32>
    %188 = vector.extract_strided_slice %186 {offsets = [0, 0], sizes = [16, 128], strides = [1, 1]} : vector<16x384xf32> to vector<16x128xf32>
    %189 = arith.addf %187, %188 : vector<16x128xf32>
    %cst_78 = arith.constant 5.000000e-01 : f32
    %190 = vector.broadcast %cst_78 : f32 to vector<16x128xf32>
    %191 = arith.mulf %190, %189 : vector<16x128xf32>
    %192 = math.tanh %191 : vector<16x128xf32>
    %cst_79 = arith.constant 1.000000e+00 : f32
    %193 = vector.broadcast %cst_79 : f32 to vector<16x128xf32>
    %194 = arith.addf %192, %193 : vector<16x128xf32>
    %cst_80 = arith.constant 5.000000e-01 : f32
    %195 = vector.broadcast %cst_80 : f32 to vector<16x128xf32>
    %196 = arith.mulf %195, %194 : vector<16x128xf32>
    %197 = vector.extract_strided_slice %181 {offsets = [0, 128], sizes = [16, 128], strides = [1, 1]} : vector<16x384xf32> to vector<16x128xf32>
    %198 = vector.extract_strided_slice %186 {offsets = [0, 128], sizes = [16, 128], strides = [1, 1]} : vector<16x384xf32> to vector<16x128xf32>
    %199 = arith.addf %197, %198 : vector<16x128xf32>
    %cst_81 = arith.constant 5.000000e-01 : f32
    %200 = vector.broadcast %cst_81 : f32 to vector<16x128xf32>
    %201 = arith.mulf %200, %199 : vector<16x128xf32>
    %202 = math.tanh %201 : vector<16x128xf32>
    %cst_82 = arith.constant 1.000000e+00 : f32
    %203 = vector.broadcast %cst_82 : f32 to vector<16x128xf32>
    %204 = arith.addf %202, %203 : vector<16x128xf32>
    %cst_83 = arith.constant 5.000000e-01 : f32
    %205 = vector.broadcast %cst_83 : f32 to vector<16x128xf32>
    %206 = arith.mulf %205, %204 : vector<16x128xf32>
    %207 = vector.extract_strided_slice %181 {offsets = [0, 256], sizes = [16, 128], strides = [1, 1]} : vector<16x384xf32> to vector<16x128xf32>
    %208 = vector.extract_strided_slice %186 {offsets = [0, 256], sizes = [16, 128], strides = [1, 1]} : vector<16x384xf32> to vector<16x128xf32>
    %209 = arith.mulf %196, %208 : vector<16x128xf32>
    %210 = arith.addf %207, %209 : vector<16x128xf32>
    %211 = math.tanh %210 : vector<16x128xf32>
    %cst_84 = arith.constant 1.000000e+00 : f32
    %212 = vector.broadcast %cst_84 : f32 to vector<16x128xf32>
    %213 = arith.subf %212, %206 : vector<16x128xf32>
    %214 = arith.mulf %213, %211 : vector<16x128xf32>
    %215 = arith.mulf %206, %158 : vector<16x128xf32>
    %216 = arith.addf %214, %215 : vector<16x128xf32>
    %217 = arith.truncf %216 : vector<16x128xf32> to vector<16x128xbf16>
    %c0_85 = arith.constant 0 : index
    %c0_86 = arith.constant 0 : index
    %218 = vector.load %arg6[%c0_85, %c0_86] : memref<128x128xbf16, #tpu.memory_space<vmem>>, vector<128x128xbf16>
    %cst_87 = arith.constant dense<0.000000e+00> : vector<16x128xf32>
    %219 = tpu.matmul %217, %218, %cst_87 {dimension_numbers = #tpu.dot_dimension_numbers<[1], [0], [0], [1], [0, 0, 1, 1], [], []>} : vector<16x128xbf16>, vector<128x128xbf16>, vector<16x128xf32> -> vector<16x128xf32>
    %c0_88 = arith.constant 0 : index
    %c0_89 = arith.constant 0 : index
    %220 = vector.load %arg7[%c0_88, %c0_89] : memref<1x128xf32, #tpu.memory_space<vmem>>, vector<1x128xf32>
    %221 = vector.broadcast %220 : vector<1x128xf32> to vector<16x128xf32>
    %222 = arith.addf %219, %221 : vector<16x128xf32>
    %cst_90 = arith.constant dense<0xFF800000> : vector<16xf32>
    %223 = vector.multi_reduction <maximumf>, %222, %cst_90 [1] : vector<16x128xf32> to vector<16xf32>
    %224 = vector.shape_cast %223 : vector<16xf32> to vector<16x1xf32>
    %225 = vector.broadcast %224 : vector<16x1xf32> to vector<16x128xf32>
    %226 = arith.subf %222, %225 : vector<16x128xf32>
    %227 = math.exp %226 : vector<16x128xf32>
    %cst_91 = arith.constant dense<0.000000e+00> : vector<16xf32>
    %228 = vector.multi_reduction <add>, %227, %cst_91 [1] : vector<16x128xf32> to vector<16xf32>
    %229 = vector.shape_cast %228 : vector<16xf32> to vector<16x1xf32>
    %230 = vector.broadcast %229 : vector<16x1xf32> to vector<16x128xf32>
    %231 = arith.divf %227, %230 : vector<16x128xf32>
    %232 = arith.index_cast %c3_i32 : i32 to index
    %c0_92 = arith.constant 0 : index
    %c0_93 = arith.constant 0 : index
    %233 = vector.load %arg8[%232, %c0_92, %c0_93] : memref<8x16x128xf32, #tpu.memory_space<vmem>>, vector<1x16x128xf32>
    %234 = vector.shape_cast %233 : vector<1x16x128xf32> to vector<16x128xf32>
    %235 = vector.shape_cast %231 : vector<16x128xf32> to vector<1x16x128xf32>
    tpu.vector_store %arg8[%232, %c0_92, %c0_93], %235 {strides = array<i32>} : memref<8x16x128xf32, #tpu.memory_space<vmem>>, vector<1x16x128xf32>,
    %236 = arith.truncf %216 : vector<16x128xf32> to vector<16x128xbf16>
    %c4_i32 = arith.constant 4 : i32
    %237 = arith.index_cast %c4_i32 : i32 to index
    %c0_94 = arith.constant 0 : index
    %c0_95 = arith.constant 0 : index
    %238 = vector.load %arg2[%237, %c0_94, %c0_95] : memref<8x16x384xf32, #tpu.memory_space<vmem>>, vector<1x16x384xf32>
    %239 = vector.shape_cast %238 : vector<1x16x384xf32> to vector<16x384xf32>
    %c0_96 = arith.constant 0 : index
    %c0_97 = arith.constant 0 : index
    %240 = vector.load %arg4[%c0_96, %c0_97] : memref<128x384xbf16, #tpu.memory_space<vmem>>, vector<128x384xbf16>
    %cst_98 = arith.constant dense<0.000000e+00> : vector<16x384xf32>
    %241 = tpu.matmul %236, %240, %cst_98 {dimension_numbers = #tpu.dot_dimension_numbers<[1], [0], [0], [1], [0, 0, 1, 1], [], []>} : vector<16x128xbf16>, vector<128x384xbf16>, vector<16x384xf32> -> vector<16x384xf32>
    %c0_99 = arith.constant 0 : index
    %c0_100 = arith.constant 0 : index
    %242 = vector.load %arg5[%c0_99, %c0_100] : memref<1x384xf32, #tpu.memory_space<vmem>>, vector<1x384xf32>
    %243 = vector.broadcast %242 : vector<1x384xf32> to vector<16x384xf32>
    %244 = arith.addf %241, %243 : vector<16x384xf32>
    %245 = vector.extract_strided_slice %239 {offsets = [0, 0], sizes = [16, 128], strides = [1, 1]} : vector<16x384xf32> to vector<16x128xf32>
    %246 = vector.extract_strided_slice %244 {offsets = [0, 0], sizes = [16, 128], strides = [1, 1]} : vector<16x384xf32> to vector<16x128xf32>
    %247 = arith.addf %245, %246 : vector<16x128xf32>
    %cst_101 = arith.constant 5.000000e-01 : f32
    %248 = vector.broadcast %cst_101 : f32 to vector<16x128xf32>
    %249 = arith.mulf %248, %247 : vector<16x128xf32>
    %250 = math.tanh %249 : vector<16x128xf32>
    %cst_102 = arith.constant 1.000000e+00 : f32
    %251 = vector.broadcast %cst_102 : f32 to vector<16x128xf32>
    %252 = arith.addf %250, %251 : vector<16x128xf32>
    %cst_103 = arith.constant 5.000000e-01 : f32
    %253 = vector.broadcast %cst_103 : f32 to vector<16x128xf32>
    %254 = arith.mulf %253, %252 : vector<16x128xf32>
    %255 = vector.extract_strided_slice %239 {offsets = [0, 128], sizes = [16, 128], strides = [1, 1]} : vector<16x384xf32> to vector<16x128xf32>
    %256 = vector.extract_strided_slice %244 {offsets = [0, 128], sizes = [16, 128], strides = [1, 1]} : vector<16x384xf32> to vector<16x128xf32>
    %257 = arith.addf %255, %256 : vector<16x128xf32>
    %cst_104 = arith.constant 5.000000e-01 : f32
    %258 = vector.broadcast %cst_104 : f32 to vector<16x128xf32>
    %259 = arith.mulf %258, %257 : vector<16x128xf32>
    %260 = math.tanh %259 : vector<16x128xf32>
    %cst_105 = arith.constant 1.000000e+00 : f32
    %261 = vector.broadcast %cst_105 : f32 to vector<16x128xf32>
    %262 = arith.addf %260, %261 : vector<16x128xf32>
    %cst_106 = arith.constant 5.000000e-01 : f32
    %263 = vector.broadcast %cst_106 : f32 to vector<16x128xf32>
    %264 = arith.mulf %263, %262 : vector<16x128xf32>
    %265 = vector.extract_strided_slice %239 {offsets = [0, 256], sizes = [16, 128], strides = [1, 1]} : vector<16x384xf32> to vector<16x128xf32>
    %266 = vector.extract_strided_slice %244 {offsets = [0, 256], sizes = [16, 128], strides = [1, 1]} : vector<16x384xf32> to vector<16x128xf32>
    %267 = arith.mulf %254, %266 : vector<16x128xf32>
    %268 = arith.addf %265, %267 : vector<16x128xf32>
    %269 = math.tanh %268 : vector<16x128xf32>
    %cst_107 = arith.constant 1.000000e+00 : f32
    %270 = vector.broadcast %cst_107 : f32 to vector<16x128xf32>
    %271 = arith.subf %270, %264 : vector<16x128xf32>
    %272 = arith.mulf %271, %269 : vector<16x128xf32>
    %273 = arith.mulf %264, %216 : vector<16x128xf32>
    %274 = arith.addf %272, %273 : vector<16x128xf32>
    %275 = arith.truncf %274 : vector<16x128xf32> to vector<16x128xbf16>
    %c0_108 = arith.constant 0 : index
    %c0_109 = arith.constant 0 : index
    %276 = vector.load %arg6[%c0_108, %c0_109] : memref<128x128xbf16, #tpu.memory_space<vmem>>, vector<128x128xbf16>
    %cst_110 = arith.constant dense<0.000000e+00> : vector<16x128xf32>
    %277 = tpu.matmul %275, %276, %cst_110 {dimension_numbers = #tpu.dot_dimension_numbers<[1], [0], [0], [1], [0, 0, 1, 1], [], []>} : vector<16x128xbf16>, vector<128x128xbf16>, vector<16x128xf32> -> vector<16x128xf32>
    %c0_111 = arith.constant 0 : index
    %c0_112 = arith.constant 0 : index
    %278 = vector.load %arg7[%c0_111, %c0_112] : memref<1x128xf32, #tpu.memory_space<vmem>>, vector<1x128xf32>
    %279 = vector.broadcast %278 : vector<1x128xf32> to vector<16x128xf32>
    %280 = arith.addf %277, %279 : vector<16x128xf32>
    %cst_113 = arith.constant dense<0xFF800000> : vector<16xf32>
    %281 = vector.multi_reduction <maximumf>, %280, %cst_113 [1] : vector<16x128xf32> to vector<16xf32>
    %282 = vector.shape_cast %281 : vector<16xf32> to vector<16x1xf32>
    %283 = vector.broadcast %282 : vector<16x1xf32> to vector<16x128xf32>
    %284 = arith.subf %280, %283 : vector<16x128xf32>
    %285 = math.exp %284 : vector<16x128xf32>
    %cst_114 = arith.constant dense<0.000000e+00> : vector<16xf32>
    %286 = vector.multi_reduction <add>, %285, %cst_114 [1] : vector<16x128xf32> to vector<16xf32>
    %287 = vector.shape_cast %286 : vector<16xf32> to vector<16x1xf32>
    %288 = vector.broadcast %287 : vector<16x1xf32> to vector<16x128xf32>
    %289 = arith.divf %285, %288 : vector<16x128xf32>
    %290 = arith.index_cast %c4_i32 : i32 to index
    %c0_115 = arith.constant 0 : index
    %c0_116 = arith.constant 0 : index
    %291 = vector.load %arg8[%290, %c0_115, %c0_116] : memref<8x16x128xf32, #tpu.memory_space<vmem>>, vector<1x16x128xf32>
    %292 = vector.shape_cast %291 : vector<1x16x128xf32> to vector<16x128xf32>
    %293 = vector.shape_cast %289 : vector<16x128xf32> to vector<1x16x128xf32>
    tpu.vector_store %arg8[%290, %c0_115, %c0_116], %293 {strides = array<i32>} : memref<8x16x128xf32, #tpu.memory_space<vmem>>, vector<1x16x128xf32>,
    %294 = arith.truncf %274 : vector<16x128xf32> to vector<16x128xbf16>
    %c5_i32 = arith.constant 5 : i32
    %295 = arith.index_cast %c5_i32 : i32 to index
    %c0_117 = arith.constant 0 : index
    %c0_118 = arith.constant 0 : index
    %296 = vector.load %arg2[%295, %c0_117, %c0_118] : memref<8x16x384xf32, #tpu.memory_space<vmem>>, vector<1x16x384xf32>
    %297 = vector.shape_cast %296 : vector<1x16x384xf32> to vector<16x384xf32>
    %c0_119 = arith.constant 0 : index
    %c0_120 = arith.constant 0 : index
    %298 = vector.load %arg4[%c0_119, %c0_120] : memref<128x384xbf16, #tpu.memory_space<vmem>>, vector<128x384xbf16>
    %cst_121 = arith.constant dense<0.000000e+00> : vector<16x384xf32>
    %299 = tpu.matmul %294, %298, %cst_121 {dimension_numbers = #tpu.dot_dimension_numbers<[1], [0], [0], [1], [0, 0, 1, 1], [], []>} : vector<16x128xbf16>, vector<128x384xbf16>, vector<16x384xf32> -> vector<16x384xf32>
    %c0_122 = arith.constant 0 : index
    %c0_123 = arith.constant 0 : index
    %300 = vector.load %arg5[%c0_122, %c0_123] : memref<1x384xf32, #tpu.memory_space<vmem>>, vector<1x384xf32>
    %301 = vector.broadcast %300 : vector<1x384xf32> to vector<16x384xf32>
    %302 = arith.addf %299, %301 : vector<16x384xf32>
    %303 = vector.extract_strided_slice %297 {offsets = [0, 0], sizes = [16, 128], strides = [1, 1]} : vector<16x384xf32> to vector<16x128xf32>
    %304 = vector.extract_strided_slice %302 {offsets = [0, 0], sizes = [16, 128], strides = [1, 1]} : vector<16x384xf32> to vector<16x128xf32>
    %305 = arith.addf %303, %304 : vector<16x128xf32>
    %cst_124 = arith.constant 5.000000e-01 : f32
    %306 = vector.broadcast %cst_124 : f32 to vector<16x128xf32>
    %307 = arith.mulf %306, %305 : vector<16x128xf32>
    %308 = math.tanh %307 : vector<16x128xf32>
    %cst_125 = arith.constant 1.000000e+00 : f32
    %309 = vector.broadcast %cst_125 : f32 to vector<16x128xf32>
    %310 = arith.addf %308, %309 : vector<16x128xf32>
    %cst_126 = arith.constant 5.000000e-01 : f32
    %311 = vector.broadcast %cst_126 : f32 to vector<16x128xf32>
    %312 = arith.mulf %311, %310 : vector<16x128xf32>
    %313 = vector.extract_strided_slice %297 {offsets = [0, 128], sizes = [16, 128], strides = [1, 1]} : vector<16x384xf32> to vector<16x128xf32>
    %314 = vector.extract_strided_slice %302 {offsets = [0, 128], sizes = [16, 128], strides = [1, 1]} : vector<16x384xf32> to vector<16x128xf32>
    %315 = arith.addf %313, %314 : vector<16x128xf32>
    %cst_127 = arith.constant 5.000000e-01 : f32
    %316 = vector.broadcast %cst_127 : f32 to vector<16x128xf32>
    %317 = arith.mulf %316, %315 : vector<16x128xf32>
    %318 = math.tanh %317 : vector<16x128xf32>
    %cst_128 = arith.constant 1.000000e+00 : f32
    %319 = vector.broadcast %cst_128 : f32 to vector<16x128xf32>
    %320 = arith.addf %318, %319 : vector<16x128xf32>
    %cst_129 = arith.constant 5.000000e-01 : f32
    %321 = vector.broadcast %cst_129 : f32 to vector<16x128xf32>
    %322 = arith.mulf %321, %320 : vector<16x128xf32>
    %323 = vector.extract_strided_slice %297 {offsets = [0, 256], sizes = [16, 128], strides = [1, 1]} : vector<16x384xf32> to vector<16x128xf32>
    %324 = vector.extract_strided_slice %302 {offsets = [0, 256], sizes = [16, 128], strides = [1, 1]} : vector<16x384xf32> to vector<16x128xf32>
    %325 = arith.mulf %312, %324 : vector<16x128xf32>
    %326 = arith.addf %323, %325 : vector<16x128xf32>
    %327 = math.tanh %326 : vector<16x128xf32>
    %cst_130 = arith.constant 1.000000e+00 : f32
    %328 = vector.broadcast %cst_130 : f32 to vector<16x128xf32>
    %329 = arith.subf %328, %322 : vector<16x128xf32>
    %330 = arith.mulf %329, %327 : vector<16x128xf32>
    %331 = arith.mulf %322, %274 : vector<16x128xf32>
    %332 = arith.addf %330, %331 : vector<16x128xf32>
    %333 = arith.truncf %332 : vector<16x128xf32> to vector<16x128xbf16>
    %c0_131 = arith.constant 0 : index
    %c0_132 = arith.constant 0 : index
    %334 = vector.load %arg6[%c0_131, %c0_132] : memref<128x128xbf16, #tpu.memory_space<vmem>>, vector<128x128xbf16>
    %cst_133 = arith.constant dense<0.000000e+00> : vector<16x128xf32>
    %335 = tpu.matmul %333, %334, %cst_133 {dimension_numbers = #tpu.dot_dimension_numbers<[1], [0], [0], [1], [0, 0, 1, 1], [], []>} : vector<16x128xbf16>, vector<128x128xbf16>, vector<16x128xf32> -> vector<16x128xf32>
    %c0_134 = arith.constant 0 : index
    %c0_135 = arith.constant 0 : index
    %336 = vector.load %arg7[%c0_134, %c0_135] : memref<1x128xf32, #tpu.memory_space<vmem>>, vector<1x128xf32>
    %337 = vector.broadcast %336 : vector<1x128xf32> to vector<16x128xf32>
    %338 = arith.addf %335, %337 : vector<16x128xf32>
    %cst_136 = arith.constant dense<0xFF800000> : vector<16xf32>
    %339 = vector.multi_reduction <maximumf>, %338, %cst_136 [1] : vector<16x128xf32> to vector<16xf32>
    %340 = vector.shape_cast %339 : vector<16xf32> to vector<16x1xf32>
    %341 = vector.broadcast %340 : vector<16x1xf32> to vector<16x128xf32>
    %342 = arith.subf %338, %341 : vector<16x128xf32>
    %343 = math.exp %342 : vector<16x128xf32>
    %cst_137 = arith.constant dense<0.000000e+00> : vector<16xf32>
    %344 = vector.multi_reduction <add>, %343, %cst_137 [1] : vector<16x128xf32> to vector<16xf32>
    %345 = vector.shape_cast %344 : vector<16xf32> to vector<16x1xf32>
    %346 = vector.broadcast %345 : vector<16x1xf32> to vector<16x128xf32>
    %347 = arith.divf %343, %346 : vector<16x128xf32>
    %348 = arith.index_cast %c5_i32 : i32 to index
    %c0_138 = arith.constant 0 : index
    %c0_139 = arith.constant 0 : index
    %349 = vector.load %arg8[%348, %c0_138, %c0_139] : memref<8x16x128xf32, #tpu.memory_space<vmem>>, vector<1x16x128xf32>
    %350 = vector.shape_cast %349 : vector<1x16x128xf32> to vector<16x128xf32>
    %351 = vector.shape_cast %347 : vector<16x128xf32> to vector<1x16x128xf32>
    tpu.vector_store %arg8[%348, %c0_138, %c0_139], %351 {strides = array<i32>} : memref<8x16x128xf32, #tpu.memory_space<vmem>>, vector<1x16x128xf32>,
    %352 = arith.truncf %332 : vector<16x128xf32> to vector<16x128xbf16>
    %c6_i32 = arith.constant 6 : i32
    %353 = arith.index_cast %c6_i32 : i32 to index
    %c0_140 = arith.constant 0 : index
    %c0_141 = arith.constant 0 : index
    %354 = vector.load %arg2[%353, %c0_140, %c0_141] : memref<8x16x384xf32, #tpu.memory_space<vmem>>, vector<1x16x384xf32>
    %355 = vector.shape_cast %354 : vector<1x16x384xf32> to vector<16x384xf32>
    %c0_142 = arith.constant 0 : index
    %c0_143 = arith.constant 0 : index
    %356 = vector.load %arg4[%c0_142, %c0_143] : memref<128x384xbf16, #tpu.memory_space<vmem>>, vector<128x384xbf16>
    %cst_144 = arith.constant dense<0.000000e+00> : vector<16x384xf32>
    %357 = tpu.matmul %352, %356, %cst_144 {dimension_numbers = #tpu.dot_dimension_numbers<[1], [0], [0], [1], [0, 0, 1, 1], [], []>} : vector<16x128xbf16>, vector<128x384xbf16>, vector<16x384xf32> -> vector<16x384xf32>
    %c0_145 = arith.constant 0 : index
    %c0_146 = arith.constant 0 : index
    %358 = vector.load %arg5[%c0_145, %c0_146] : memref<1x384xf32, #tpu.memory_space<vmem>>, vector<1x384xf32>
    %359 = vector.broadcast %358 : vector<1x384xf32> to vector<16x384xf32>
    %360 = arith.addf %357, %359 : vector<16x384xf32>
    %361 = vector.extract_strided_slice %355 {offsets = [0, 0], sizes = [16, 128], strides = [1, 1]} : vector<16x384xf32> to vector<16x128xf32>
    %362 = vector.extract_strided_slice %360 {offsets = [0, 0], sizes = [16, 128], strides = [1, 1]} : vector<16x384xf32> to vector<16x128xf32>
    %363 = arith.addf %361, %362 : vector<16x128xf32>
    %cst_147 = arith.constant 5.000000e-01 : f32
    %364 = vector.broadcast %cst_147 : f32 to vector<16x128xf32>
    %365 = arith.mulf %364, %363 : vector<16x128xf32>
    %366 = math.tanh %365 : vector<16x128xf32>
    %cst_148 = arith.constant 1.000000e+00 : f32
    %367 = vector.broadcast %cst_148 : f32 to vector<16x128xf32>
    %368 = arith.addf %366, %367 : vector<16x128xf32>
    %cst_149 = arith.constant 5.000000e-01 : f32
    %369 = vector.broadcast %cst_149 : f32 to vector<16x128xf32>
    %370 = arith.mulf %369, %368 : vector<16x128xf32>
    %371 = vector.extract_strided_slice %355 {offsets = [0, 128], sizes = [16, 128], strides = [1, 1]} : vector<16x384xf32> to vector<16x128xf32>
    %372 = vector.extract_strided_slice %360 {offsets = [0, 128], sizes = [16, 128], strides = [1, 1]} : vector<16x384xf32> to vector<16x128xf32>
    %373 = arith.addf %371, %372 : vector<16x128xf32>
    %cst_150 = arith.constant 5.000000e-01 : f32
    %374 = vector.broadcast %cst_150 : f32 to vector<16x128xf32>
    %375 = arith.mulf %374, %373 : vector<16x128xf32>
    %376 = math.tanh %375 : vector<16x128xf32>
    %cst_151 = arith.constant 1.000000e+00 : f32
    %377 = vector.broadcast %cst_151 : f32 to vector<16x128xf32>
    %378 = arith.addf %376, %377 : vector<16x128xf32>
    %cst_152 = arith.constant 5.000000e-01 : f32
    %379 = vector.broadcast %cst_152 : f32 to vector<16x128xf32>
    %380 = arith.mulf %379, %378 : vector<16x128xf32>
    %381 = vector.extract_strided_slice %355 {offsets = [0, 256], sizes = [16, 128], strides = [1, 1]} : vector<16x384xf32> to vector<16x128xf32>
    %382 = vector.extract_strided_slice %360 {offsets = [0, 256], sizes = [16, 128], strides = [1, 1]} : vector<16x384xf32> to vector<16x128xf32>
    %383 = arith.mulf %370, %382 : vector<16x128xf32>
    %384 = arith.addf %381, %383 : vector<16x128xf32>
    %385 = math.tanh %384 : vector<16x128xf32>
    %cst_153 = arith.constant 1.000000e+00 : f32
    %386 = vector.broadcast %cst_153 : f32 to vector<16x128xf32>
    %387 = arith.subf %386, %380 : vector<16x128xf32>
    %388 = arith.mulf %387, %385 : vector<16x128xf32>
    %389 = arith.mulf %380, %332 : vector<16x128xf32>
    %390 = arith.addf %388, %389 : vector<16x128xf32>
    %391 = arith.truncf %390 : vector<16x128xf32> to vector<16x128xbf16>
    %c0_154 = arith.constant 0 : index
    %c0_155 = arith.constant 0 : index
    %392 = vector.load %arg6[%c0_154, %c0_155] : memref<128x128xbf16, #tpu.memory_space<vmem>>, vector<128x128xbf16>
    %cst_156 = arith.constant dense<0.000000e+00> : vector<16x128xf32>
    %393 = tpu.matmul %391, %392, %cst_156 {dimension_numbers = #tpu.dot_dimension_numbers<[1], [0], [0], [1], [0, 0, 1, 1], [], []>} : vector<16x128xbf16>, vector<128x128xbf16>, vector<16x128xf32> -> vector<16x128xf32>
    %c0_157 = arith.constant 0 : index
    %c0_158 = arith.constant 0 : index
    %394 = vector.load %arg7[%c0_157, %c0_158] : memref<1x128xf32, #tpu.memory_space<vmem>>, vector<1x128xf32>
    %395 = vector.broadcast %394 : vector<1x128xf32> to vector<16x128xf32>
    %396 = arith.addf %393, %395 : vector<16x128xf32>
    %cst_159 = arith.constant dense<0xFF800000> : vector<16xf32>
    %397 = vector.multi_reduction <maximumf>, %396, %cst_159 [1] : vector<16x128xf32> to vector<16xf32>
    %398 = vector.shape_cast %397 : vector<16xf32> to vector<16x1xf32>
    %399 = vector.broadcast %398 : vector<16x1xf32> to vector<16x128xf32>
    %400 = arith.subf %396, %399 : vector<16x128xf32>
    %401 = math.exp %400 : vector<16x128xf32>
    %cst_160 = arith.constant dense<0.000000e+00> : vector<16xf32>
    %402 = vector.multi_reduction <add>, %401, %cst_160 [1] : vector<16x128xf32> to vector<16xf32>
    %403 = vector.shape_cast %402 : vector<16xf32> to vector<16x1xf32>
    %404 = vector.broadcast %403 : vector<16x1xf32> to vector<16x128xf32>
    %405 = arith.divf %401, %404 : vector<16x128xf32>
    %406 = arith.index_cast %c6_i32 : i32 to index
    %c0_161 = arith.constant 0 : index
    %c0_162 = arith.constant 0 : index
    %407 = vector.load %arg8[%406, %c0_161, %c0_162] : memref<8x16x128xf32, #tpu.memory_space<vmem>>, vector<1x16x128xf32>
    %408 = vector.shape_cast %407 : vector<1x16x128xf32> to vector<16x128xf32>
    %409 = vector.shape_cast %405 : vector<16x128xf32> to vector<1x16x128xf32>
    tpu.vector_store %arg8[%406, %c0_161, %c0_162], %409 {strides = array<i32>} : memref<8x16x128xf32, #tpu.memory_space<vmem>>, vector<1x16x128xf32>,
    %410 = arith.truncf %390 : vector<16x128xf32> to vector<16x128xbf16>
    %c7_i32 = arith.constant 7 : i32
    %411 = arith.index_cast %c7_i32 : i32 to index
    %c0_163 = arith.constant 0 : index
    %c0_164 = arith.constant 0 : index
    %412 = vector.load %arg2[%411, %c0_163, %c0_164] : memref<8x16x384xf32, #tpu.memory_space<vmem>>, vector<1x16x384xf32>
    %413 = vector.shape_cast %412 : vector<1x16x384xf32> to vector<16x384xf32>
    %c0_165 = arith.constant 0 : index
    %c0_166 = arith.constant 0 : index
    %414 = vector.load %arg4[%c0_165, %c0_166] : memref<128x384xbf16, #tpu.memory_space<vmem>>, vector<128x384xbf16>
    %cst_167 = arith.constant dense<0.000000e+00> : vector<16x384xf32>
    %415 = tpu.matmul %410, %414, %cst_167 {dimension_numbers = #tpu.dot_dimension_numbers<[1], [0], [0], [1], [0, 0, 1, 1], [], []>} : vector<16x128xbf16>, vector<128x384xbf16>, vector<16x384xf32> -> vector<16x384xf32>
    %c0_168 = arith.constant 0 : index
    %c0_169 = arith.constant 0 : index
    %416 = vector.load %arg5[%c0_168, %c0_169] : memref<1x384xf32, #tpu.memory_space<vmem>>, vector<1x384xf32>
    %417 = vector.broadcast %416 : vector<1x384xf32> to vector<16x384xf32>
    %418 = arith.addf %415, %417 : vector<16x384xf32>
    %419 = vector.extract_strided_slice %413 {offsets = [0, 0], sizes = [16, 128], strides = [1, 1]} : vector<16x384xf32> to vector<16x128xf32>
    %420 = vector.extract_strided_slice %418 {offsets = [0, 0], sizes = [16, 128], strides = [1, 1]} : vector<16x384xf32> to vector<16x128xf32>
    %421 = arith.addf %419, %420 : vector<16x128xf32>
    %cst_170 = arith.constant 5.000000e-01 : f32
    %422 = vector.broadcast %cst_170 : f32 to vector<16x128xf32>
    %423 = arith.mulf %422, %421 : vector<16x128xf32>
    %424 = math.tanh %423 : vector<16x128xf32>
    %cst_171 = arith.constant 1.000000e+00 : f32
    %425 = vector.broadcast %cst_171 : f32 to vector<16x128xf32>
    %426 = arith.addf %424, %425 : vector<16x128xf32>
    %cst_172 = arith.constant 5.000000e-01 : f32
    %427 = vector.broadcast %cst_172 : f32 to vector<16x128xf32>
    %428 = arith.mulf %427, %426 : vector<16x128xf32>
    %429 = vector.extract_strided_slice %413 {offsets = [0, 128], sizes = [16, 128], strides = [1, 1]} : vector<16x384xf32> to vector<16x128xf32>
    %430 = vector.extract_strided_slice %418 {offsets = [0, 128], sizes = [16, 128], strides = [1, 1]} : vector<16x384xf32> to vector<16x128xf32>
    %431 = arith.addf %429, %430 : vector<16x128xf32>
    %cst_173 = arith.constant 5.000000e-01 : f32
    %432 = vector.broadcast %cst_173 : f32 to vector<16x128xf32>
    %433 = arith.mulf %432, %431 : vector<16x128xf32>
    %434 = math.tanh %433 : vector<16x128xf32>
    %cst_174 = arith.constant 1.000000e+00 : f32
    %435 = vector.broadcast %cst_174 : f32 to vector<16x128xf32>
    %436 = arith.addf %434, %435 : vector<16x128xf32>
    %cst_175 = arith.constant 5.000000e-01 : f32
    %437 = vector.broadcast %cst_175 : f32 to vector<16x128xf32>
    %438 = arith.mulf %437, %436 : vector<16x128xf32>
    %439 = vector.extract_strided_slice %413 {offsets = [0, 256], sizes = [16, 128], strides = [1, 1]} : vector<16x384xf32> to vector<16x128xf32>
    %440 = vector.extract_strided_slice %418 {offsets = [0, 256], sizes = [16, 128], strides = [1, 1]} : vector<16x384xf32> to vector<16x128xf32>
    %441 = arith.mulf %428, %440 : vector<16x128xf32>
    %442 = arith.addf %439, %441 : vector<16x128xf32>
    %443 = math.tanh %442 : vector<16x128xf32>
    %cst_176 = arith.constant 1.000000e+00 : f32
    %444 = vector.broadcast %cst_176 : f32 to vector<16x128xf32>
    %445 = arith.subf %444, %438 : vector<16x128xf32>
    %446 = arith.mulf %445, %443 : vector<16x128xf32>
    %447 = arith.mulf %438, %390 : vector<16x128xf32>
    %448 = arith.addf %446, %447 : vector<16x128xf32>
    %449 = arith.truncf %448 : vector<16x128xf32> to vector<16x128xbf16>
    %c0_177 = arith.constant 0 : index
    %c0_178 = arith.constant 0 : index
    %450 = vector.load %arg6[%c0_177, %c0_178] : memref<128x128xbf16, #tpu.memory_space<vmem>>, vector<128x128xbf16>
    %cst_179 = arith.constant dense<0.000000e+00> : vector<16x128xf32>
    %451 = tpu.matmul %449, %450, %cst_179 {dimension_numbers = #tpu.dot_dimension_numbers<[1], [0], [0], [1], [0, 0, 1, 1], [], []>} : vector<16x128xbf16>, vector<128x128xbf16>, vector<16x128xf32> -> vector<16x128xf32>
    %c0_180 = arith.constant 0 : index
    %c0_181 = arith.constant 0 : index
    %452 = vector.load %arg7[%c0_180, %c0_181] : memref<1x128xf32, #tpu.memory_space<vmem>>, vector<1x128xf32>
    %453 = vector.broadcast %452 : vector<1x128xf32> to vector<16x128xf32>
    %454 = arith.addf %451, %453 : vector<16x128xf32>
    %cst_182 = arith.constant dense<0xFF800000> : vector<16xf32>
    %455 = vector.multi_reduction <maximumf>, %454, %cst_182 [1] : vector<16x128xf32> to vector<16xf32>
    %456 = vector.shape_cast %455 : vector<16xf32> to vector<16x1xf32>
    %457 = vector.broadcast %456 : vector<16x1xf32> to vector<16x128xf32>
    %458 = arith.subf %454, %457 : vector<16x128xf32>
    %459 = math.exp %458 : vector<16x128xf32>
    %cst_183 = arith.constant dense<0.000000e+00> : vector<16xf32>
    %460 = vector.multi_reduction <add>, %459, %cst_183 [1] : vector<16x128xf32> to vector<16xf32>
    %461 = vector.shape_cast %460 : vector<16xf32> to vector<16x1xf32>
    %462 = vector.broadcast %461 : vector<16x1xf32> to vector<16x128xf32>
    %463 = arith.divf %459, %462 : vector<16x128xf32>
    %464 = arith.index_cast %c7_i32 : i32 to index
    %c0_184 = arith.constant 0 : index
    %c0_185 = arith.constant 0 : index
    %465 = vector.load %arg8[%464, %c0_184, %c0_185] : memref<8x16x128xf32, #tpu.memory_space<vmem>>, vector<1x16x128xf32>
    %466 = vector.shape_cast %465 : vector<1x16x128xf32> to vector<16x128xf32>
    %467 = vector.shape_cast %463 : vector<16x128xf32> to vector<1x16x128xf32>
    tpu.vector_store %arg8[%464, %c0_184, %c0_185], %467 {strides = array<i32>} : memref<8x16x128xf32, #tpu.memory_space<vmem>>, vector<1x16x128xf32>,
    %468 = arith.truncf %448 : vector<16x128xf32> to vector<16x128xbf16>
    %c8_i32 = arith.constant 8 : i32
    %c0_186 = arith.constant 0 : index
    %c0_187 = arith.constant 0 : index
    %469 = vector.load %arg9[%c0_186, %c0_187] : memref<16x128xf32, #tpu.memory_space<vmem>>, vector<16x128xf32>
    tpu.vector_store %arg9[%c0_186, %c0_187], %448 {strides = array<i32>} : memref<16x128xf32, #tpu.memory_space<vmem>>, vector<16x128xf32>,
    return
  }
  func.func @transform_0(%arg0: i32, %arg1: i32) -> (i32, i32, i32) {
    %c0_i32 = arith.constant 0 : i32
    %c0_i32_0 = arith.constant 0 : i32
    return %arg1, %arg0, %c0_i32 : i32, i32, i32
  }
  func.func @transform_1(%arg0: i32, %arg1: i32) -> (i32, i32) {
    %c0_i32 = arith.constant 0 : i32
    %c0_i32_0 = arith.constant 0 : i32
    return %arg0, %c0_i32 : i32, i32
  }
  func.func @transform_2(%arg0: i32, %arg1: i32) -> (i32, i32) {
    %c0_i32 = arith.constant 0 : i32
    %c0_i32_0 = arith.constant 0 : i32
    %c0_i32_1 = arith.constant 0 : i32
    return %c0_i32, %c0_i32_0 : i32, i32
  }
  func.func @transform_3(%arg0: i32, %arg1: i32) -> (i32, i32) {
    %c0_i32 = arith.constant 0 : i32
    %c0_i32_0 = arith.constant 0 : i32
    %c0_i32_1 = arith.constant 0 : i32
    return %c0_i32, %c0_i32_0 : i32, i32
  }
  func.func @transform_4(%arg0: i32, %arg1: i32) -> (i32, i32) {
    %c0_i32 = arith.constant 0 : i32
    %c0_i32_0 = arith.constant 0 : i32
    %c0_i32_1 = arith.constant 0 : i32
    return %c0_i32, %c0_i32_0 : i32, i32
  }
  func.func @transform_5(%arg0: i32, %arg1: i32) -> (i32, i32) {
    %c0_i32 = arith.constant 0 : i32
    %c0_i32_0 = arith.constant 0 : i32
    %c0_i32_1 = arith.constant 0 : i32
    return %c0_i32, %c0_i32_0 : i32, i32
  }
  func.func @transform_6(%arg0: i32, %arg1: i32) -> (i32, i32, i32) {
    %c0_i32 = arith.constant 0 : i32
    %c0_i32_0 = arith.constant 0 : i32
    return %arg1, %arg0, %c0_i32 : i32, i32, i32
  }
  func.func @transform_7(%arg0: i32, %arg1: i32) -> (i32, i32) {
    %c0_i32 = arith.constant 0 : i32
    %c0_i32_0 = arith.constant 0 : i32
    return %arg0, %c0_i32 : i32, i32
  }
}

</mosaic_0001>

<bundles_post_ra>
// kernel: actor_rnn_forward_seq.2
= control target key start
LH: loop header
LB: loop body
LE: loop exit
PB: predicated region body
PF: predicated region fallthrough
CT: control target
= control target key end

     0   :  { %s1237_s1 = inlined_call_operand.vmem [shape: bf16[128,128], index: 1, kind: input, shape index: {}]   ;;  %s1238_s2 = inlined_call_operand.vmem [shape: f32[1,128], index: 2, kind: input, shape index: {}]   ;;  %s1239_s0 = inlined_call_operand.vmem [shape: bf16[128,128], index: 0, kind: input, shape index: {}]   ;;  %s1240_s3 = inlined_call_operand.vmem [shape: bf16[128,384], index: 3, kind: input, shape index: {}]   ;;  %s1241_s4 = inlined_call_operand.vmem [shape: f32[1,384], index: 4, kind: input, shape index: {}]   ;;  %s1242_s5 = inlined_call_operand.vmem [shape: f32[128,384], index: 5, kind: output, shape index: {}]  }
   0x1   :  { %v767_v0 = vld [vmem:[%s1237_s1 + $0x38] sm:$0xff]  ;;  %v766_v1 = vld [vmem:[%s1237_s1 + $0x30] sm:$0xff]  ;;  %v765_v2 = vld [vmem:[%s1237_s1 + $0x28] sm:$0xff] }
   0x2   :  { %152 = vmatpush.bf16.msra.mxu0 %v767_v0  ;;  %v764_v3 = vld [vmem:[%s1237_s1 + $0x20] sm:$0xff]  ;;  %v763_v4 = vld [vmem:[%s1237_s1 + $0x18] sm:$0xff]  ;;  %v762_v5 = vld [vmem:[%s1237_s1 + $0x10] sm:$0xff] }
   0x3   :  { %v761_v6 = vld [vmem:[%s1237_s1 + $0x8] sm:$0xff]  ;;  %v760_v7 = vld [vmem:[%s1237_s1] sm:$0xff]  ;;  %v754_v10 = vld [vmem:[%s1239_s0 + $0x10] sm:$0xff] }
   0x4   :  { %v752_v8 = vld [vmem:[%s1239_s0] sm:$0xff]  ;;  %v753_v9 = vld [vmem:[%s1239_s0 + $0x8] sm:$0xff]  ;;  %v755_v11 = vld [vmem:[%s1239_s0 + $0x18] sm:$0xff] }
   0x5   :  { %v756_v12 = vld [vmem:[%s1239_s0 + $0x20] sm:$0xff]  ;;  %v742_v13 = vld [vmem:[%s1240_s3 + $0xa8] sm:$0xf]  ;;  %v790_v14 = vld [vmem:[%s1240_s3 + $0xb0] sm:$0xf0] }
   0x6   :  { %153 = vmatpush.bf16.msra.mxu0 %v766_v1  ;;  %v789_v15 = vld [vmem:[%s1240_s3 + $0xac] sm:$0xf]  ;;  %v743_v16 = vor.u32 %v790_v14, %v742_v13  ;;  %v744_v17 = vld [vmem:[%s1240_s3 + $0xb4] sm:$0xf0]  ;;  %v750_v18 = vld [vmem:[%s1240_s3 + $0xb0] sm:$0xf] }
   0x7   :  { %v791_v19 = vld [vmem:[%s1240_s3 + $0xb8] sm:$0xf0]  ;;  %v747_v20 = vor.u32 %v789_v15, %v744_v17  ;;  %v757_v22 = vld [vmem:[%s1239_s0 + $0x28] sm:$0xff]  ;;  %v730_v23 = vld [vmem:[%s1240_s3 + $0x90] sm:$0xf] }
   0x8   :  { %v751_v21 = vor.u32 %v791_v19, %v750_v18  ;;  %393 = vmatpush.bf16.msra.mxu1 %v743_v16  ;;  %v787_v24 = vld [vmem:[%s1240_s3 + $0x98] sm:$0xf0]  ;;  %v786_v25 = vld [vmem:[%s1240_s3 + $0x94] sm:$0xf]  ;;  %v732_v27 = vld [vmem:[%s1240_s3 + $0x9c] sm:$0xf0] }
   0x9   :  { %442 = vmatpush.bf16.msra.mxu2 %v747_v20  ;;  %v731_v26 = vor.u32 %v787_v24, %v730_v23  ;;  %v738_v28 = vld [vmem:[%s1240_s3 + $0x98] sm:$0xf]  ;;  %v788_v29 = vld [vmem:[%s1240_s3 + $0xa0] sm:$0xf0]  ;;  %v735_v30 = vor.u32 %v786_v25, %v732_v27  ;;  %v783_v34 = vld [vmem:[%s1240_s3 + $0x7c] sm:$0xf] }
   0xa   :  { %154 = vmatpush.bf16.msra.mxu0 %v765_v2  ;;  %491 = vmatpush.bf16.msra.mxu3 %v751_v21  ;;  %v739_v31 = vor.u32 %v788_v29, %v738_v28  ;;  %v718_v32 = vld [vmem:[%s1240_s3 + $0x78] sm:$0xf]  ;;  %v784_v33 = vld [vmem:[%s1240_s3 + $0x80] sm:$0xf0]  ;;  %v720_v36 = vld [vmem:[%s1240_s3 + $0x84] sm:$0xf0] }
   0xb   :  { %v719_v35 = vor.u32 %v784_v33, %v718_v32  ;;  %v726_v37 = vld [vmem:[%s1240_s3 + $0x80] sm:$0xf]  ;;  %v785_v38 = vld [vmem:[%s1240_s3 + $0x88] sm:$0xf0]  ;;  %v723_v39 = vor.u32 %v783_v34, %v720_v36  ;;  %v780_v43 = vld [vmem:[%s1240_s3 + $0x64] sm:$0xf] }
   0xc   :  { %394 = vmatpush.bf16.msra.mxu1 %v731_v26  ;;  %v727_v40 = vor.u32 %v785_v38, %v726_v37  ;;  %v706_v41 = vld [vmem:[%s1240_s3 + $0x60] sm:$0xf]  ;;  %v781_v42 = vld [vmem:[%s1240_s3 + $0x68] sm:$0xf0]  ;;  %v708_v44 = vld [vmem:[%s1240_s3 + $0x6c] sm:$0xf0] }
   0xd   :  { %443 = vmatpush.bf16.msra.mxu2 %v735_v30  ;;  %v714_v45 = vld [vmem:[%s1240_s3 + $0x68] sm:$0xf]  ;;  %v782_v46 = vld [vmem:[%s1240_s3 + $0x70] sm:$0xf0]  ;;  %v707_v47 = vor.u32 %v781_v42, %v706_v41  ;;  %v711_v48 = vor.u32 %v780_v43, %v708_v44  ;;  %v777_v52 = vld [vmem:[%s1240_s3 + $0x4c] sm:$0xf] }
   0xe   :  { %155 = vmatpush.bf16.msra.mxu0 %v764_v3  ;;  %492 = vmatpush.bf16.msra.mxu3 %v739_v31  ;;  %v715_v49 = vor.u32 %v782_v46, %v714_v45  ;;  %v694_v50 = vld [vmem:[%s1240_s3 + $0x48] sm:$0xf]  ;;  %v778_v51 = vld [vmem:[%s1240_s3 + $0x50] sm:$0xf0]  ;;  %v696_v54 = vld [vmem:[%s1240_s3 + $0x54] sm:$0xf0] }
   0xf   :  { %v695_v53 = vor.u32 %v778_v51, %v694_v50  ;;  %v702_v55 = vld [vmem:[%s1240_s3 + $0x50] sm:$0xf]  ;;  %v779_v56 = vld [vmem:[%s1240_s3 + $0x58] sm:$0xf0]  ;;  %v699_v58 = vor.u32 %v777_v52, %v696_v54  ;;  %v774_v62 = vld [vmem:[%s1240_s3 + $0x34] sm:$0xf] }
  0x10   :  { %395 = vmatpush.bf16.msra.mxu1 %v719_v35  ;;  %v758_v57 = vld [vmem:[%s1239_s0 + $0x30] sm:$0xff]  ;;  %v703_v59 = vor.u32 %v779_v56, %v702_v55  ;;  %v775_v61 = vld [vmem:[%s1240_s3 + $0x38] sm:$0xf0]  ;;  %v684_v0 = vld [vmem:[%s1240_s3 + $0x3c] sm:$0xf0] }
  0x11   :  { %444 = vmatpush.bf16.msra.mxu2 %v723_v39  ;;  %v682_v60 = vld [vmem:[%s1240_s3 + $0x30] sm:$0xf]  ;;  %v690_v1 = vld [vmem:[%s1240_s3 + $0x38] sm:$0xf]  ;;  %v776_v2 = vld [vmem:[%s1240_s3 + $0x40] sm:$0xf0]  ;;  %v687_v3 = vor.u32 %v774_v62, %v684_v0 }
  0x12   :  { %156 = vmatpush.bf16.msra.mxu0 %v763_v4  ;;  %493 = vmatpush.bf16.msra.mxu3 %v727_v40  ;;  %v683_v63 = vor.u32 %v775_v61, %v682_v60  ;;  %v691_v4 = vor.u32 %v776_v2, %v690_v1  ;;  %v658_v14 = vld [vmem:[%s1240_s3] sm:$0xf]  ;;  %v769_v15 = vld [vmem:[%s1240_s3 + $0x8] sm:$0xf0]  ;;  %v768_v16 = vld [vmem:[%s1240_s3 + $0x4] sm:$0xf] }
  0x13   :  { %v659_v17 = vor.u32 %v769_v15, %v658_v14  ;;  %v660_v18 = vld [vmem:[%s1240_s3 + $0xc] sm:$0xf0]  ;;  %v666_v19 = vld [vmem:[%s1240_s3 + $0x8] sm:$0xf]  ;;  %v770_v20 = vld [vmem:[%s1240_s3 + $0x10] sm:$0xf0] }
  0x14   :  { %396 = vmatpush.bf16.msra.mxu1 %v707_v47  ;;  %v663_v21 = vor.u32 %v768_v16, %v660_v18  ;;  %v759_v23 = vld [vmem:[%s1239_s0 + $0x38] sm:$0xff]  ;;  %v1018_v25 = vld [vmem:[%s1238_s2] ss:$0 sm:$0xff] }
  0x15   :  { %445 = vmatpush.bf16.msra.mxu2 %v711_v48 }
  0x16   :  { %157 = vmatpush.bf16.msra.mxu0 %v762_v5  ;;  %494 = vmatpush.bf16.msra.mxu3 %v715_v49  ;;  %v670_v5 = vld [vmem:[%s1240_s3 + $0x18] sm:$0xf] }
  0x18   :  { %397 = vmatpush.bf16.msra.mxu1 %v695_v53 }
  0x19   :  { %446 = vmatpush.bf16.msra.mxu2 %v699_v58 }
  0x1a   :  { %158 = vmatpush.bf16.msra.mxu0 %v761_v6  ;;  %495 = vmatpush.bf16.msra.mxu3 %v703_v59  ;;  %v772_v6 = vld [vmem:[%s1240_s3 + $0x20] sm:$0xf0] }
  0x1c   :  { %398 = vmatpush.bf16.msra.mxu1 %v683_v63 }
  0x1d   :  { %447 = vmatpush.bf16.msra.mxu2 %v687_v3 }
  0x1e   :  { %159 = vmatpush.bf16.msra.mxu0 %v760_v7  ;;  %496 = vmatpush.bf16.msra.mxu3 %v691_v4  ;;  %v771_v7 = vld [vmem:[%s1240_s3 + $0x1c] sm:$0xf] }
  0x21   :  { %160 = vmatmul.bf16.vlgmr.msra.gmra.mxu0 %v752_v8  ;;  %v671_v8 = vor.u32 %v772_v6, %v670_v5 }
  0x23   :  { %399 = vmatpush.bf16.msra.mxu1 %v671_v8 }
  0x27   :  { %400 = vmatpush.bf16.msra.mxu1 %v659_v17  ;;  %v257_v17 = vld [vmem:[%s1241_s4] sm:$0x7] }
  0x28   :  { %v1039_v18 = vperm.slane %v257_v17, 0 }
  0x31   :  { %165 = vmatmul.bf16.gmra.mxu0 %v753_v9  ;;  %v672_v9 = vld [vmem:[%s1240_s3 + $0x24] sm:$0xf0] }
  0x41   :  { %170 = vmatmul.bf16.gmra.mxu0 %v754_v10  ;;  %v678_v10 = vld [vmem:[%s1240_s3 + $0x20] sm:$0xf] }
  0x51   :  { %175 = vmatmul.bf16.gmra.mxu0 %v755_v11  ;;  %v773_v11 = vld [vmem:[%s1240_s3 + $0x28] sm:$0xf0] }
  0x52   :  { %v679_v13 = vor.u32 %v773_v11, %v678_v10 }
  0x54   :  { %497 = vmatpush.bf16.msra.mxu3 %v679_v13 }
  0x61   :  { %180 = vmatmul.bf16.gmra.mxu0 %v756_v12  ;;  %v675_v12 = vor.u32 %v771_v7, %v672_v9 }
  0x63   :  { %448 = vmatpush.bf16.msra.mxu2 %v675_v12 }
  0x67   :  { %449 = vmatpush.bf16.msra.mxu2 %v663_v21  ;;  %v1045_v21 = vperm.slane %v257_v17, 1 }
  0x71   :  { %185 = vmatmul.bf16.gmra.mxu0 %v757_v22  ;;  %v667_v22 = vor.u32 %v770_v20, %v666_v19 }
  0x73   :  { %498 = vmatpush.bf16.msra.mxu3 %v667_v22  ;;  %v1047_v22 = vperm.slane %v257_v17, 2 }
  0x81   :  { %190 = vmatmul.bf16.gmra.mxu0 %v758_v57 }
  0x91   :  { %195 = vmatmul.bf16.gmra.mxu0 %v759_v23 }
  0x9e   :  { %v161_v24 = vpop.f32.mrf.mxu0 }
  0x9f   :  { %v162_v26 = vadd.f32 %v1018_v25, %v161_v24 }
  0xa1   :  { %v201_v29 = vmax.f32 %v162_v26, 0.0 }
  0xa6   :  { %v163_v27 = vpop.f32.mrf.mxu0 }
  0xa7   :  { %v164_v28 = vadd.f32 %v1018_v25, %v163_v27 }
  0xa9   :  { %v202_v30 = vmax.f32 %v164_v28, 0.0 }
  0xab   :  { %v217_v31 = vpack.c.bf16 %v202_v30, %v201_v29 }
  0xad   :  { %401 = vmatmul.bf16.vlgmr.msra.gmra.mxu1 %v217_v31  ;;  %450 = vmatmul.bf16.vlgmr.msra.gmra.mxu2 %v217_v31 }
  0xae   :  { %499 = vmatmul.bf16.vlgmr.msra.gmra.mxu3 %v217_v31  ;;  %v166_v32 = vpop.f32.mrf.mxu0 }
  0xaf   :  { %v167_v33 = vadd.f32 %v1018_v25, %v166_v32 }
  0xb1   :  { %v203_v36 = vmax.f32 %v167_v33, 0.0 }
  0xb6   :  { %v168_v34 = vpop.f32.mrf.mxu0 }
  0xb7   :  { %v169_v35 = vadd.f32 %v1018_v25, %v168_v34 }
  0xb9   :  { %v204_v37 = vmax.f32 %v169_v35, 0.0 }
  0xbb   :  { %v218_v38 = vpack.c.bf16 %v204_v37, %v203_v36 }
  0xbd   :  { %406 = vmatmul.bf16.gmra.mxu1 %v218_v38  ;;  %455 = vmatmul.bf16.gmra.mxu2 %v218_v38 }
  0xbe   :  { %504 = vmatmul.bf16.gmra.mxu3 %v218_v38  ;;  %v171_v39 = vpop.f32.mrf.mxu0 }
  0xbf   :  { %v172_v40 = vadd.f32 %v1018_v25, %v171_v39 }
  0xc1   :  { %v205_v43 = vmax.f32 %v172_v40, 0.0 }
  0xc6   :  { %v173_v41 = vpop.f32.mrf.mxu0 }
  0xc7   :  { %v174_v42 = vadd.f32 %v1018_v25, %v173_v41 }
  0xc9   :  { %v206_v44 = vmax.f32 %v174_v42, 0.0 }
  0xcb   :  { %v219_v45 = vpack.c.bf16 %v206_v44, %v205_v43 }
  0xcd   :  { %411 = vmatmul.bf16.gmra.mxu1 %v219_v45  ;;  %460 = vmatmul.bf16.gmra.mxu2 %v219_v45 }
  0xce   :  { %509 = vmatmul.bf16.gmra.mxu3 %v219_v45  ;;  %v176_v46 = vpop.f32.mrf.mxu0 }
  0xcf   :  { %v177_v47 = vadd.f32 %v1018_v25, %v176_v46 }
  0xd1   :  { %v207_v50 = vmax.f32 %v177_v47, 0.0 }
  0xd6   :  { %v178_v48 = vpop.f32.mrf.mxu0 }
  0xd7   :  { %v179_v49 = vadd.f32 %v1018_v25, %v178_v48 }
  0xd9   :  { %v208_v51 = vmax.f32 %v179_v49, 0.0 }
  0xdb   :  { %v220_v52 = vpack.c.bf16 %v208_v51, %v207_v50 }
  0xdd   :  { %416 = vmatmul.bf16.gmra.mxu1 %v220_v52  ;;  %465 = vmatmul.bf16.gmra.mxu2 %v220_v52 }
  0xde   :  { %514 = vmatmul.bf16.gmra.mxu3 %v220_v52  ;;  %v181_v53 = vpop.f32.mrf.mxu0 }
  0xdf   :  { %v182_v54 = vadd.f32 %v1018_v25, %v181_v53 }
  0xe1   :  { %v209_v57 = vmax.f32 %v182_v54, 0.0 }
  0xe6   :  { %v183_v55 = vpop.f32.mrf.mxu0 }
  0xe7   :  { %v184_v56 = vadd.f32 %v1018_v25, %v183_v55 }
  0xe9   :  { %v210_v58 = vmax.f32 %v184_v56, 0.0 }
  0xeb   :  { %v221_v59 = vpack.c.bf16 %v210_v58, %v209_v57 }
  0xed   :  { %421 = vmatmul.bf16.gmra.mxu1 %v221_v59  ;;  %470 = vmatmul.bf16.gmra.mxu2 %v221_v59 }
  0xee   :  { %519 = vmatmul.bf16.gmra.mxu3 %v221_v59  ;;  %v186_v60 = vpop.f32.mrf.mxu0 }
  0xef   :  { %v187_v61 = vadd.f32 %v1018_v25, %v186_v60 }
  0xf1   :  { %v211_v0 = vmax.f32 %v187_v61, 0.0 }
  0xf6   :  { %v188_v62 = vpop.f32.mrf.mxu0 }
  0xf7   :  { %v189_v63 = vadd.f32 %v1018_v25, %v188_v62 }
  0xf9   :  { %v212_v1 = vmax.f32 %v189_v63, 0.0 }
  0xfb   :  { %v222_v2 = vpack.c.bf16 %v212_v1, %v211_v0 }
  0xfd   :  { %426 = vmatmul.bf16.gmra.mxu1 %v222_v2  ;;  %475 = vmatmul.bf16.gmra.mxu2 %v222_v2 }
  0xfe   :  { %524 = vmatmul.bf16.gmra.mxu3 %v222_v2  ;;  %v191_v3 = vpop.f32.mrf.mxu0 }
  0xff   :  { %v192_v4 = vadd.f32 %v1018_v25, %v191_v3 }
 0x101   :  { %v213_v7 = vmax.f32 %v192_v4, 0.0 }
 0x106   :  { %v193_v5 = vpop.f32.mrf.mxu0 }
 0x107   :  { %v194_v6 = vadd.f32 %v1018_v25, %v193_v5 }
 0x109   :  { %v214_v8 = vmax.f32 %v194_v6, 0.0 }
 0x10b   :  { %v223_v9 = vpack.c.bf16 %v214_v8, %v213_v7 }
 0x10d   :  { %431 = vmatmul.bf16.gmra.mxu1 %v223_v9  ;;  %480 = vmatmul.bf16.gmra.mxu2 %v223_v9 }
 0x10e   :  { %529 = vmatmul.bf16.gmra.mxu3 %v223_v9  ;;  %v196_v10 = vpop.f32.mrf.mxu0 }
 0x10f   :  { %v197_v11 = vadd.f32 %v1018_v25, %v196_v10 }
 0x111   :  { %v215_v14 = vmax.f32 %v197_v11, 0.0 }
 0x116   :  { %v198_v12 = vpop.f32.mrf.mxu0 }
 0x117   :  { %v199_v13 = vadd.f32 %v1018_v25, %v198_v12 }
 0x119   :  { %v216_v15 = vmax.f32 %v199_v13, 0.0 }
 0x11b   :  { %v224_v16 = vpack.c.bf16 %v216_v15, %v215_v14 }
 0x11d   :  { %436 = vmatmul.bf16.gmra.mxu1 %v224_v16  ;;  %485 = vmatmul.bf16.gmra.mxu2 %v224_v16 }
 0x11e   :  { %534 = vmatmul.bf16.gmra.mxu3 %v224_v16 }
 0x12a   :  { %v402_v19 = vpop.f32.mrf.mxu1 }
 0x12b   :  { %v403_v20 = vadd.f32 %v402_v19, %v1039_v18 }
 0x12d   :  { %540 = vst [vmem:[%s1242_s5] sm:$0xff] %v403_v20 }
 0x130   :  { %v451_v23 = vpop.f32.mrf.mxu2 }
 0x131   :  { %v452_v24 = vadd.f32 %v451_v23, %v1045_v21  ;;  %v500_v25 = vpop.f32.mrf.mxu3 }
 0x132   :  { %v501_v26 = vadd.f32 %v500_v25, %v1047_v22  ;;  %v404_v27 = vpop.f32.mrf.mxu1 }
 0x133   :  { %541 = vst [vmem:[%s1242_s5 + $0x8] sm:$0xff] %v452_v24  ;;  %v405_v28 = vadd.f32 %v404_v27, %v1039_v18 }
 0x134   :  { %542 = vst [vmem:[%s1242_s5 + $0x10] sm:$0xff] %v501_v26 }
 0x135   :  { %543 = vst [vmem:[%s1242_s5 + $0x18] sm:$0xff] %v405_v28 }
 0x138   :  { %v453_v29 = vpop.f32.mrf.mxu2 }
 0x139   :  { %v454_v30 = vadd.f32 %v453_v29, %v1045_v21  ;;  %v502_v31 = vpop.f32.mrf.mxu3 }
 0x13a   :  { %v503_v32 = vadd.f32 %v502_v31, %v1047_v22  ;;  %v407_v33 = vpop.f32.mrf.mxu1 }
 0x13b   :  { %544 = vst [vmem:[%s1242_s5 + $0x20] sm:$0xff] %v454_v30  ;;  %v408_v34 = vadd.f32 %v407_v33, %v1039_v18 }
 0x13c   :  { %545 = vst [vmem:[%s1242_s5 + $0x28] sm:$0xff] %v503_v32 }
 0x13d   :  { %546 = vst [vmem:[%s1242_s5 + $0x30] sm:$0xff] %v408_v34 }
 0x140   :  { %v456_v35 = vpop.f32.mrf.mxu2 }
 0x141   :  { %v457_v36 = vadd.f32 %v456_v35, %v1045_v21  ;;  %v505_v37 = vpop.f32.mrf.mxu3 }
 0x142   :  { %v506_v38 = vadd.f32 %v505_v37, %v1047_v22  ;;  %v409_v39 = vpop.f32.mrf.mxu1 }
 0x143   :  { %547 = vst [vmem:[%s1242_s5 + $0x38] sm:$0xff] %v457_v36  ;;  %v410_v40 = vadd.f32 %v409_v39, %v1039_v18 }
 0x144   :  { %548 = vst [vmem:[%s1242_s5 + $0x40] sm:$0xff] %v506_v38 }
 0x145   :  { %549 = vst [vmem:[%s1242_s5 + $0x48] sm:$0xff] %v410_v40 }
 0x148   :  { %v458_v41 = vpop.f32.mrf.mxu2 }
 0x149   :  { %v459_v42 = vadd.f32 %v458_v41, %v1045_v21  ;;  %v507_v43 = vpop.f32.mrf.mxu3 }
 0x14a   :  { %v508_v44 = vadd.f32 %v507_v43, %v1047_v22  ;;  %v412_v45 = vpop.f32.mrf.mxu1 }
 0x14b   :  { %550 = vst [vmem:[%s1242_s5 + $0x50] sm:$0xff] %v459_v42  ;;  %v413_v46 = vadd.f32 %v412_v45, %v1039_v18 }
 0x14c   :  { %551 = vst [vmem:[%s1242_s5 + $0x58] sm:$0xff] %v508_v44 }
 0x14d   :  { %552 = vst [vmem:[%s1242_s5 + $0x60] sm:$0xff] %v413_v46 }
 0x150   :  { %v461_v47 = vpop.f32.mrf.mxu2 }
 0x151   :  { %v462_v48 = vadd.f32 %v461_v47, %v1045_v21  ;;  %v510_v49 = vpop.f32.mrf.mxu3 }
 0x152   :  { %v511_v50 = vadd.f32 %v510_v49, %v1047_v22  ;;  %v414_v51 = vpop.f32.mrf.mxu1 }
 0x153   :  { %553 = vst [vmem:[%s1242_s5 + $0x68] sm:$0xff] %v462_v48  ;;  %v415_v52 = vadd.f32 %v414_v51, %v1039_v18 }
 0x154   :  { %554 = vst [vmem:[%s1242_s5 + $0x70] sm:$0xff] %v511_v50 }
 0x155   :  { %555 = vst [vmem:[%s1242_s5 + $0x78] sm:$0xff] %v415_v52 }
 0x158   :  { %v463_v53 = vpop.f32.mrf.mxu2 }
 0x159   :  { %v464_v54 = vadd.f32 %v463_v53, %v1045_v21  ;;  %v512_v55 = vpop.f32.mrf.mxu3 }
 0x15a   :  { %v513_v56 = vadd.f32 %v512_v55, %v1047_v22  ;;  %v417_v57 = vpop.f32.mrf.mxu1 }
 0x15b   :  { %556 = vst [vmem:[%s1242_s5 + $0x80] sm:$0xff] %v464_v54  ;;  %v418_v58 = vadd.f32 %v417_v57, %v1039_v18 }
 0x15c   :  { %557 = vst [vmem:[%s1242_s5 + $0x88] sm:$0xff] %v513_v56 }
 0x15d   :  { %558 = vst [vmem:[%s1242_s5 + $0x90] sm:$0xff] %v418_v58 }
 0x160   :  { %v466_v59 = vpop.f32.mrf.mxu2 }
 0x161   :  { %v467_v60 = vadd.f32 %v466_v59, %v1045_v21  ;;  %v515_v61 = vpop.f32.mrf.mxu3 }
 0x162   :  { %v516_v62 = vadd.f32 %v515_v61, %v1047_v22  ;;  %v419_v63 = vpop.f32.mrf.mxu1 }
 0x163   :  { %559 = vst [vmem:[%s1242_s5 + $0x98] sm:$0xff] %v467_v60  ;;  %v420_v0 = vadd.f32 %v419_v63, %v1039_v18 }
 0x164   :  { %560 = vst [vmem:[%s1242_s5 + $0xa0] sm:$0xff] %v516_v62 }
 0x165   :  { %561 = vst [vmem:[%s1242_s5 + $0xa8] sm:$0xff] %v420_v0 }
 0x168   :  { %v468_v1 = vpop.f32.mrf.mxu2 }
 0x169   :  { %v469_v2 = vadd.f32 %v468_v1, %v1045_v21  ;;  %v517_v3 = vpop.f32.mrf.mxu3 }
 0x16a   :  { %v518_v4 = vadd.f32 %v517_v3, %v1047_v22  ;;  %v422_v5 = vpop.f32.mrf.mxu1 }
 0x16b   :  { %562 = vst [vmem:[%s1242_s5 + $0xb0] sm:$0xff] %v469_v2  ;;  %v423_v6 = vadd.f32 %v422_v5, %v1039_v18 }
 0x16c   :  { %563 = vst [vmem:[%s1242_s5 + $0xb8] sm:$0xff] %v518_v4 }
 0x16d   :  { %564 = vst [vmem:[%s1242_s5 + $0xc0] sm:$0xff] %v423_v6 }
 0x170   :  { %v471_v7 = vpop.f32.mrf.mxu2 }
 0x171   :  { %v472_v8 = vadd.f32 %v471_v7, %v1045_v21  ;;  %v520_v9 = vpop.f32.mrf.mxu3 }
 0x172   :  { %v521_v10 = vadd.f32 %v520_v9, %v1047_v22  ;;  %v424_v11 = vpop.f32.mrf.mxu1 }
 0x173   :  { %565 = vst [vmem:[%s1242_s5 + $0xc8] sm:$0xff] %v472_v8  ;;  %v425_v12 = vadd.f32 %v424_v11, %v1039_v18 }
 0x174   :  { %566 = vst [vmem:[%s1242_s5 + $0xd0] sm:$0xff] %v521_v10 }
 0x175   :  { %567 = vst [vmem:[%s1242_s5 + $0xd8] sm:$0xff] %v425_v12 }
 0x178   :  { %v473_v13 = vpop.f32.mrf.mxu2 }
 0x179   :  { %v474_v14 = vadd.f32 %v473_v13, %v1045_v21  ;;  %v522_v15 = vpop.f32.mrf.mxu3 }
 0x17a   :  { %v523_v16 = vadd.f32 %v522_v15, %v1047_v22  ;;  %v427_v17 = vpop.f32.mrf.mxu1 }
 0x17b   :  { %568 = vst [vmem:[%s1242_s5 + $0xe0] sm:$0xff] %v474_v14  ;;  %v428_v19 = vadd.f32 %v427_v17, %v1039_v18 }
 0x17c   :  { %569 = vst [vmem:[%s1242_s5 + $0xe8] sm:$0xff] %v523_v16 }
 0x17d   :  { %570 = vst [vmem:[%s1242_s5 + $0xf0] sm:$0xff] %v428_v19 }
 0x180   :  { %v476_v20 = vpop.f32.mrf.mxu2 }
 0x181   :  { %v477_v23 = vadd.f32 %v476_v20, %v1045_v21  ;;  %v525_v24 = vpop.f32.mrf.mxu3 }
 0x182   :  { %v526_v25 = vadd.f32 %v525_v24, %v1047_v22  ;;  %v429_v26 = vpop.f32.mrf.mxu1 }
 0x183   :  { %571 = vst [vmem:[%s1242_s5 + $0xf8] sm:$0xff] %v477_v23  ;;  %v430_v27 = vadd.f32 %v429_v26, %v1039_v18 }
 0x184   :  { %572 = vst [vmem:[%s1242_s5 + $0x100] sm:$0xff] %v526_v25 }
 0x185   :  { %573 = vst [vmem:[%s1242_s5 + $0x108] sm:$0xff] %v430_v27 }
 0x188   :  { %v478_v28 = vpop.f32.mrf.mxu2 }
 0x189   :  { %v479_v29 = vadd.f32 %v478_v28, %v1045_v21  ;;  %v527_v30 = vpop.f32.mrf.mxu3 }
 0x18a   :  { %v528_v31 = vadd.f32 %v527_v30, %v1047_v22  ;;  %v432_v32 = vpop.f32.mrf.mxu1 }
 0x18b   :  { %574 = vst [vmem:[%s1242_s5 + $0x110] sm:$0xff] %v479_v29  ;;  %v433_v33 = vadd.f32 %v432_v32, %v1039_v18 }
 0x18c   :  { %575 = vst [vmem:[%s1242_s5 + $0x118] sm:$0xff] %v528_v31 }
 0x18d   :  { %576 = vst [vmem:[%s1242_s5 + $0x120] sm:$0xff] %v433_v33 }
 0x190   :  { %v481_v34 = vpop.f32.mrf.mxu2 }
 0x191   :  { %v482_v35 = vadd.f32 %v481_v34, %v1045_v21  ;;  %v530_v36 = vpop.f32.mrf.mxu3 }
 0x192   :  { %v531_v37 = vadd.f32 %v530_v36, %v1047_v22  ;;  %v434_v38 = vpop.f32.mrf.mxu1 }
 0x193   :  { %577 = vst [vmem:[%s1242_s5 + $0x128] sm:$0xff] %v482_v35  ;;  %v435_v39 = vadd.f32 %v434_v38, %v1039_v18 }
 0x194   :  { %578 = vst [vmem:[%s1242_s5 + $0x130] sm:$0xff] %v531_v37 }
 0x195   :  { %579 = vst [vmem:[%s1242_s5 + $0x138] sm:$0xff] %v435_v39 }
 0x198   :  { %v483_v40 = vpop.f32.mrf.mxu2 }
 0x199   :  { %v484_v41 = vadd.f32 %v483_v40, %v1045_v21  ;;  %v532_v42 = vpop.f32.mrf.mxu3 }
 0x19a   :  { %v533_v43 = vadd.f32 %v532_v42, %v1047_v22  ;;  %v437_v44 = vpop.f32.mrf.mxu1 }
 0x19b   :  { %580 = vst [vmem:[%s1242_s5 + $0x140] sm:$0xff] %v484_v41  ;;  %v438_v45 = vadd.f32 %v437_v44, %v1039_v18 }
 0x19c   :  { %581 = vst [vmem:[%s1242_s5 + $0x148] sm:$0xff] %v533_v43 }
 0x19d   :  { %582 = vst [vmem:[%s1242_s5 + $0x150] sm:$0xff] %v438_v45 }
 0x1a0   :  { %v486_v46 = vpop.f32.mrf.mxu2 }
 0x1a1   :  { %v487_v47 = vadd.f32 %v486_v46, %v1045_v21  ;;  %v535_v48 = vpop.f32.mrf.mxu3 }
 0x1a2   :  { %v536_v49 = vadd.f32 %v535_v48, %v1047_v22  ;;  %v439_v50 = vpop.f32.mrf.mxu1 }
 0x1a3   :  { %583 = vst [vmem:[%s1242_s5 + $0x158] sm:$0xff] %v487_v47  ;;  %v440_v51 = vadd.f32 %v439_v50, %v1039_v18 }
 0x1a4   :  { %584 = vst [vmem:[%s1242_s5 + $0x160] sm:$0xff] %v536_v49 }
 0x1a5   :  { %585 = vst [vmem:[%s1242_s5 + $0x168] sm:$0xff] %v440_v51 }
 0x1a8   :  { %v488_v52 = vpop.f32.mrf.mxu2 }
 0x1a9   :  { %v489_v53 = vadd.f32 %v488_v52, %v1045_v21  ;;  %v537_v54 = vpop.f32.mrf.mxu3 }
 0x1aa   :  { %v538_v55 = vadd.f32 %v537_v54, %v1047_v22 }
 0x1ab   :  { %586 = vst [vmem:[%s1242_s5 + $0x170] sm:$0xff] %v489_v53 }
 0x1ac   :  { %587 = vst [vmem:[%s1242_s5 + $0x178] sm:$0xff] %v538_v55 }

// kernel: actor_rnn_forward_seq.3
= control target key start
LH: loop header
LB: loop body
LE: loop exit
PB: predicated region body
PF: predicated region fallthrough
CT: control target
= control target key end

     0   :  { %s6514_s2 = inlined_call_operand.vmem [shape: bf16[128,384], index: 2, kind: input, shape index: {}]   ;;  %s6515_s1 = inlined_call_operand.vmem [shape: f32[16,128], index: 1, kind: input, shape index: {}]   ;;  %s6516_s4 = inlined_call_operand.vmem [shape: bf16[128,128], index: 4, kind: input, shape index: {}]   ;;  %s6517_s3 = inlined_call_operand.vmem [shape: f32[1,384], index: 3, kind: input, shape index: {}]   ;;  %s6518_s0 = inlined_call_operand.vmem [shape: f32[8,16,384], index: 0, kind: input, shape index: {}]   ;;  %s6519_s5 = inlined_call_operand.vmem [shape: f32[1,128], index: 5, kind: input, shape index: {}]   ;;  %s6520_s7 = inlined_call_operand.vmem [shape: f32[16,128], index: 7, kind: output, shape index: {1}]   ;;  %s6521_s6 = inlined_call_operand.vmem [shape: f32[8,16,128], index: 6, kind: output, shape index: {0}]  }
   0x1   :  { %v3178_v0 = vld [vmem:[%s6514_s2 + $0xa8] sm:$0xf]  ;;  %v4194_v1 = vld [vmem:[%s6514_s2 + $0xb0] sm:$0xf0]  ;;  %v4193_v2 = vld [vmem:[%s6514_s2 + $0xac] sm:$0xf] }
   0x2   :  { %v3179_v3 = vor.u32 %v4194_v1, %v3178_v0  ;;  %v3180_v4 = vld [vmem:[%s6514_s2 + $0xb4] sm:$0xf0]  ;;  %v3186_v5 = vld [vmem:[%s6514_s2 + $0xb0] sm:$0xf]  ;;  %v4195_v6 = vld [vmem:[%s6514_s2 + $0xb8] sm:$0xf0] }
   0x3   :  { %v3183_v7 = vor.u32 %v4193_v2, %v3180_v4  ;;  %v3187_v8 = vor.u32 %v4195_v6, %v3186_v5  ;;  %v3166_v9 = vld [vmem:[%s6514_s2 + $0x90] sm:$0xf]  ;;  %v4191_v10 = vld [vmem:[%s6514_s2 + $0x98] sm:$0xf0]  ;;  %v4190_v11 = vld [vmem:[%s6514_s2 + $0x94] sm:$0xf] }
   0x4   :  { %210 = vmatpush.bf16.msra.mxu0 %v3179_v3  ;;  %v3167_v12 = vor.u32 %v4191_v10, %v3166_v9  ;;  %v3168_v13 = vld [vmem:[%s6514_s2 + $0x9c] sm:$0xf0]  ;;  %v3174_v14 = vld [vmem:[%s6514_s2 + $0x98] sm:$0xf]  ;;  %v4192_v15 = vld [vmem:[%s6514_s2 + $0xa0] sm:$0xf0] }
   0x5   :  { %224 = vmatpush.bf16.msra.mxu1 %v3183_v7  ;;  %238 = vmatpush.bf16.msra.mxu2 %v3187_v8  ;;  %v3171_v16 = vor.u32 %v4190_v11, %v3168_v13  ;;  %v3175_v17 = vor.u32 %v4192_v15, %v3174_v14  ;;  %v3154_v18 = vld [vmem:[%s6514_s2 + $0x78] sm:$0xf]  ;;  %v4188_v19 = vld [vmem:[%s6514_s2 + $0x80] sm:$0xf0]  ;;  %v4187_v20 = vld [vmem:[%s6514_s2 + $0x7c] sm:$0xf] }
   0x6   :  { %v3156_v21 = vld [vmem:[%s6514_s2 + $0x84] sm:$0xf0]  ;;  %v3162_v22 = vld [vmem:[%s6514_s2 + $0x80] sm:$0xf]  ;;  %v4189_v23 = vld [vmem:[%s6514_s2 + $0x88] sm:$0xf0]  ;;  %v3155_v24 = vor.u32 %v4188_v19, %v3154_v18 }
   0x7   :  { %v3159_v25 = vor.u32 %v4187_v20, %v3156_v21  ;;  %v3163_v26 = vor.u32 %v4189_v23, %v3162_v22  ;;  %v3142_v27 = vld [vmem:[%s6514_s2 + $0x60] sm:$0xf]  ;;  %v4185_v28 = vld [vmem:[%s6514_s2 + $0x68] sm:$0xf0]  ;;  %v4184_v29 = vld [vmem:[%s6514_s2 + $0x64] sm:$0xf] }
   0x8   :  { %211 = vmatpush.bf16.msra.mxu0 %v3167_v12  ;;  %v3144_v30 = vld [vmem:[%s6514_s2 + $0x6c] sm:$0xf0]  ;;  %v3150_v31 = vld [vmem:[%s6514_s2 + $0x68] sm:$0xf]  ;;  %v4186_v32 = vld [vmem:[%s6514_s2 + $0x70] sm:$0xf0]  ;;  %v3143_v33 = vor.u32 %v4185_v28, %v3142_v27 }
   0x9   :  { %225 = vmatpush.bf16.msra.mxu1 %v3171_v16  ;;  %239 = vmatpush.bf16.msra.mxu2 %v3175_v17  ;;  %v3147_v34 = vor.u32 %v4184_v29, %v3144_v30  ;;  %v3151_v35 = vor.u32 %v4186_v32, %v3150_v31  ;;  %v3130_v36 = vld [vmem:[%s6514_s2 + $0x48] sm:$0xf]  ;;  %v4182_v37 = vld [vmem:[%s6514_s2 + $0x50] sm:$0xf0]  ;;  %v4181_v38 = vld [vmem:[%s6514_s2 + $0x4c] sm:$0xf] }
   0xa   :  { %v3132_v39 = vld [vmem:[%s6514_s2 + $0x54] sm:$0xf0]  ;;  %v3138_v40 = vld [vmem:[%s6514_s2 + $0x50] sm:$0xf]  ;;  %v4183_v41 = vld [vmem:[%s6514_s2 + $0x58] sm:$0xf0]  ;;  %v3131_v42 = vor.u32 %v4182_v37, %v3130_v36 }
   0xb   :  { %v3135_v43 = vor.u32 %v4181_v38, %v3132_v39  ;;  %v3139_v44 = vor.u32 %v4183_v41, %v3138_v40  ;;  %v3118_v45 = vld [vmem:[%s6514_s2 + $0x30] sm:$0xf]  ;;  %v4179_v46 = vld [vmem:[%s6514_s2 + $0x38] sm:$0xf0]  ;;  %v4178_v47 = vld [vmem:[%s6514_s2 + $0x34] sm:$0xf] }
   0xc   :  { %212 = vmatpush.bf16.msra.mxu0 %v3155_v24  ;;  %v3120_v48 = vld [vmem:[%s6514_s2 + $0x3c] sm:$0xf0]  ;;  %v3126_v49 = vld [vmem:[%s6514_s2 + $0x38] sm:$0xf]  ;;  %v4180_v50 = vld [vmem:[%s6514_s2 + $0x40] sm:$0xf0]  ;;  %v3119_v51 = vor.u32 %v4179_v46, %v3118_v45 }
   0xd   :  { %226 = vmatpush.bf16.msra.mxu1 %v3159_v25  ;;  %240 = vmatpush.bf16.msra.mxu2 %v3163_v26  ;;  %v3123_v52 = vor.u32 %v4178_v47, %v3120_v48  ;;  %v3127_v53 = vor.u32 %v4180_v50, %v3126_v49  ;;  %v3106_v54 = vld [vmem:[%s6514_s2 + $0x18] sm:$0xf]  ;;  %v4176_v55 = vld [vmem:[%s6514_s2 + $0x20] sm:$0xf0]  ;;  %v4175_v56 = vld [vmem:[%s6514_s2 + $0x1c] sm:$0xf] }
   0xe   :  { %v3108_v57 = vld [vmem:[%s6514_s2 + $0x24] sm:$0xf0]  ;;  %v3114_v58 = vld [vmem:[%s6514_s2 + $0x20] sm:$0xf]  ;;  %v4177_v59 = vld [vmem:[%s6514_s2 + $0x28] sm:$0xf0]  ;;  %v3107_v60 = vor.u32 %v4176_v55, %v3106_v54 }
   0xf   :  { %v3111_v61 = vor.u32 %v4175_v56, %v3108_v57  ;;  %v3115_v62 = vor.u32 %v4177_v59, %v3114_v58  ;;  %v3094_v63 = vld [vmem:[%s6514_s2] sm:$0xf]  ;;  %v4173_v0 = vld [vmem:[%s6514_s2 + $0x8] sm:$0xf0]  ;;  %v4172_v1 = vld [vmem:[%s6514_s2 + $0x4] sm:$0xf] }
  0x10   :  { %213 = vmatpush.bf16.msra.mxu0 %v3143_v33  ;;  %v3096_v2 = vld [vmem:[%s6514_s2 + $0xc] sm:$0xf0]  ;;  %v3102_v3 = vld [vmem:[%s6514_s2 + $0x8] sm:$0xf]  ;;  %v4174_v4 = vld [vmem:[%s6514_s2 + $0x10] sm:$0xf0]  ;;  %v3095_v5 = vor.u32 %v4173_v0, %v3094_v63 }
  0x11   :  { %227 = vmatpush.bf16.msra.mxu1 %v3147_v34  ;;  %241 = vmatpush.bf16.msra.mxu2 %v3151_v35  ;;  %v4783_v6 = vld [vmem:[%s6515_s1] sm:$0xff]  ;;  %v4788_v7 = vld [vmem:[%s6515_s1 + $0x8] sm:$0xff]  ;;  %v3099_v8 = vor.u32 %v4172_v1, %v3096_v2  ;;  %v3103_v9 = vor.u32 %v4174_v4, %v3102_v3  ;;  %v4226_v12 = vld [vmem:[%s6514_s2 + $0xb0] sm:$0xf0] }
  0x12   :  { %v35_v10 = vpack.c.bf16 %v4788_v7, %v4783_v6  ;;  %v3312_v11 = vld [vmem:[%s6514_s2 + $0xa8] sm:$0xf]  ;;  %v4225_v13 = vld [vmem:[%s6514_s2 + $0xac] sm:$0xf]  ;;  %v4203_v14 = vld [vmem:[%s6516_s4 + $0x38] sm:$0xff] }
  0x13   :  { %v3313_v15 = vor.u32 %v4226_v12, %v3312_v11  ;;  %v3314_v16 = vld [vmem:[%s6514_s2 + $0xb4] sm:$0xf0]  ;;  %v3320_v18 = vld [vmem:[%s6514_s2 + $0xb0] sm:$0xf]  ;;  %v4227_v19 = vld [vmem:[%s6514_s2 + $0xb8] sm:$0xf0]  ;;  %355 = vmatpush.bf16.msra.mxu3 %v4203_v14 }
  0x14   :  { %214 = vmatpush.bf16.msra.mxu0 %v3131_v42  ;;  %v3317_v17 = vor.u32 %v4225_v13, %v3314_v16  ;;  %v3321_v20 = vor.u32 %v4227_v19, %v3320_v18  ;;  %v3300_v21 = vld [vmem:[%s6514_s2 + $0x90] sm:$0xf]  ;;  %v4223_v22 = vld [vmem:[%s6514_s2 + $0x98] sm:$0xf0]  ;;  %v4222_v23 = vld [vmem:[%s6514_s2 + $0x94] sm:$0xf] }
  0x15   :  { %228 = vmatpush.bf16.msra.mxu1 %v3135_v43  ;;  %242 = vmatpush.bf16.msra.mxu2 %v3139_v44  ;;  %v4202_v24 = vld [vmem:[%s6516_s4 + $0x30] sm:$0xff]  ;;  %v3301_v25 = vor.u32 %v4223_v22, %v3300_v21  ;;  %v3302_v26 = vld [vmem:[%s6514_s2 + $0x9c] sm:$0xf0]  ;;  %v3308_v27 = vld [vmem:[%s6514_s2 + $0x98] sm:$0xf] }
  0x16   :  { %v3305_v28 = vor.u32 %v4222_v23, %v3302_v26  ;;  %v4224_v29 = vld [vmem:[%s6514_s2 + $0xa0] sm:$0xf0]  ;;  %v3288_v31 = vld [vmem:[%s6514_s2 + $0x78] sm:$0xf]  ;;  %v4219_v33 = vld [vmem:[%s6514_s2 + $0x7c] sm:$0xf] }
  0x17   :  { %356 = vmatpush.bf16.msra.mxu3 %v4202_v24  ;;  %v3309_v30 = vor.u32 %v4224_v29, %v3308_v27  ;;  %v4220_v32 = vld [vmem:[%s6514_s2 + $0x80] sm:$0xf0]  ;;  %v4201_v34 = vld [vmem:[%s6516_s4 + $0x28] sm:$0xff]  ;;  %v3296_v37 = vld [vmem:[%s6514_s2 + $0x80] sm:$0xf] }
  0x18   :  { %215 = vmatpush.bf16.msra.mxu0 %v3119_v51  ;;  %v3289_v35 = vor.u32 %v4220_v32, %v3288_v31  ;;  %v3290_v36 = vld [vmem:[%s6514_s2 + $0x84] sm:$0xf0]  ;;  %v4221_v39 = vld [vmem:[%s6514_s2 + $0x88] sm:$0xf0]  ;;  %v3276_v41 = vld [vmem:[%s6514_s2 + $0x60] sm:$0xf] }
  0x19   :  { %229 = vmatpush.bf16.msra.mxu1 %v3123_v52  ;;  %243 = vmatpush.bf16.msra.mxu2 %v3127_v53  ;;  %v3293_v38 = vor.u32 %v4219_v33, %v3290_v36  ;;  %v3297_v40 = vor.u32 %v4221_v39, %v3296_v37  ;;  %v4217_v42 = vld [vmem:[%s6514_s2 + $0x68] sm:$0xf0]  ;;  %v4216_v43 = vld [vmem:[%s6514_s2 + $0x64] sm:$0xf]  ;;  %v3278_v46 = vld [vmem:[%s6514_s2 + $0x6c] sm:$0xf0] }
  0x1a   :  { %v4200_v44 = vld [vmem:[%s6516_s4 + $0x20] sm:$0xff]  ;;  %v3277_v45 = vor.u32 %v4217_v42, %v3276_v41  ;;  %v3284_v47 = vld [vmem:[%s6514_s2 + $0x68] sm:$0xf]  ;;  %v3281_v48 = vor.u32 %v4216_v43, %v3278_v46  ;;  %v4218_v49 = vld [vmem:[%s6514_s2 + $0x70] sm:$0xf0] }
  0x1b   :  { %357 = vmatpush.bf16.msra.mxu3 %v4201_v34  ;;  %v4879_v50 = vld [vmem:[%s6517_s3] sm:$0x7]  ;;  %v3285_v51 = vor.u32 %v4218_v49, %v3284_v47  ;;  %v3264_v52 = vld [vmem:[%s6514_s2 + $0x48] sm:$0xf]  ;;  %v4214_v53 = vld [vmem:[%s6514_s2 + $0x50] sm:$0xf0] }
  0x1c   :  { %216 = vmatpush.bf16.msra.mxu0 %v3107_v60  ;;  %v4213_v54 = vld [vmem:[%s6514_s2 + $0x4c] sm:$0xf]  ;;  %v4199_v55 = vld [vmem:[%s6516_s4 + $0x18] sm:$0xff]  ;;  %v3265_v56 = vor.u32 %v4214_v53, %v3264_v52  ;;  %v3272_v58 = vld [vmem:[%s6514_s2 + $0x50] sm:$0xf]  ;;  %v77_v3 = vperm.slane %v4879_v50, 1 }
  0x1d   :  { %230 = vmatpush.bf16.msra.mxu1 %v3111_v61  ;;  %244 = vmatpush.bf16.msra.mxu2 %v3115_v62  ;;  %v3266_v57 = vld [vmem:[%s6514_s2 + $0x54] sm:$0xf0]  ;;  %v4215_v60 = vld [vmem:[%s6514_s2 + $0x58] sm:$0xf0]  ;;  %v76_v61 = vperm.slane %v4879_v50, 0  ;;  %v36_v2 = vld [vmem:[%s6518_s0] sm:$0xff] }
  0x1e   :  { %v3269_v59 = vor.u32 %v4213_v54, %v3266_v57  ;;  %v3273_v62 = vor.u32 %v4215_v60, %v3272_v58  ;;  %v3252_v63 = vld [vmem:[%s6514_s2 + $0x30] sm:$0xf]  ;;  %v4211_v0 = vld [vmem:[%s6514_s2 + $0x38] sm:$0xf0]  ;;  %v4210_v1 = vld [vmem:[%s6514_s2 + $0x34] sm:$0xf] }
  0x1f   :  { %358 = vmatpush.bf16.msra.mxu3 %v4200_v44  ;;  %v4198_v4 = vld [vmem:[%s6516_s4 + $0x10] sm:$0xff]  ;;  %v4212_v11 = vld [vmem:[%s6514_s2 + $0x40] sm:$0xf0]  ;;  %v4197_v12 = vld [vmem:[%s6516_s4 + $0x8] sm:$0xff]  ;;  %v78_v47 = vperm.slane %v4879_v50, 2 }
  0x20   :  { %217 = vmatpush.bf16.msra.mxu0 %v3095_v5  ;;  %v3253_v5 = vor.u32 %v4211_v0, %v3252_v63  ;;  %v3240_v13 = vld [vmem:[%s6514_s2 + $0x18] sm:$0xf]  ;;  %v4208_v16 = vld [vmem:[%s6514_s2 + $0x20] sm:$0xf0]  ;;  %v3242_v18 = vld [vmem:[%s6514_s2 + $0x24] sm:$0xf0] }
  0x21   :  { %231 = vmatpush.bf16.msra.mxu1 %v3099_v8  ;;  %245 = vmatpush.bf16.msra.mxu2 %v3103_v9  ;;  %v3254_v8 = vld [vmem:[%s6514_s2 + $0x3c] sm:$0xf0]  ;;  %v3260_v9 = vld [vmem:[%s6514_s2 + $0x38] sm:$0xf]  ;;  %v3241_v22 = vor.u32 %v4208_v16, %v3240_v13  ;;  %v4205_v29 = vld [vmem:[%s6514_s2 + $0x8] sm:$0xf0] }
  0x22   :  { %v3248_v24 = vld [vmem:[%s6514_s2 + $0x20] sm:$0xf]  ;;  %v3230_v32 = vld [vmem:[%s6514_s2 + $0xc] sm:$0xf0]  ;;  %v3236_v33 = vld [vmem:[%s6514_s2 + $0x8] sm:$0xf] }
  0x23   :  { %218 = vmatmul.bf16.vlgmr.msra.gmra.mxu0 %v35_v10  ;;  %359 = vmatpush.bf16.msra.mxu3 %v4199_v55  ;;  %v4206_v34 = vld [vmem:[%s6514_s2 + $0x10] sm:$0xf0]  ;;  %v39_v41 = vld [vmem:[%s6518_s0 + $0x18] sm:$0xff]  ;;  %v40_v44 = vld [vmem:[%s6518_s0 + $0x20] sm:$0xff] }
  0x24   :  { %232 = vmatmul.bf16.vlgmr.msra.gmra.mxu1 %v35_v10  ;;  %246 = vmatmul.bf16.vlgmr.msra.gmra.mxu2 %v35_v10  ;;  %v3257_v10 = vor.u32 %v4210_v1, %v3254_v8  ;;  %v38_v60 = vld [vmem:[%s6518_s0 + $0x10] sm:$0xff] }
  0x25   :  { %590 = vmatpush.bf16.msrb.mxu0 %v3313_v15  ;;  %604 = vmatpush.bf16.msrb.mxu1 %v3317_v17  ;;  %v3261_v15 = vor.u32 %v4212_v11, %v3260_v9  ;;  %v4207_v17 = vld [vmem:[%s6514_s2 + $0x1c] sm:$0xf] }
  0x26   :  { %618 = vmatpush.bf16.msrb.mxu2 %v3321_v20  ;;  %v37_v20 = vld [vmem:[%s6518_s0 + $0x8] sm:$0xff]  ;;  %v3245_v23 = vor.u32 %v4207_v17, %v3242_v18 }
  0x27   :  { %360 = vmatpush.bf16.msra.mxu3 %v4198_v4 }
  0x29   :  { %591 = vmatpush.bf16.msrb.mxu0 %v3301_v25  ;;  %605 = vmatpush.bf16.msrb.mxu1 %v3305_v28  ;;  %v4209_v25 = vld [vmem:[%s6514_s2 + $0x28] sm:$0xf0]  ;;  %v3228_v28 = vld [vmem:[%s6514_s2] sm:$0xf] }
  0x2a   :  { %619 = vmatpush.bf16.msrb.mxu2 %v3309_v30  ;;  %v3249_v27 = vor.u32 %v4209_v25, %v3248_v24  ;;  %v4204_v30 = vld [vmem:[%s6514_s2 + $0x4] sm:$0xf]  ;;  %v3229_v36 = vor.u32 %v4205_v29, %v3228_v28  ;;  %v3448_v24 = vld [vmem:[%s6514_s2 + $0xa8] sm:$0xf]  ;;  %v4235_v25 = vld [vmem:[%s6516_s4 + $0x38] sm:$0xff] }
  0x2b   :  { %361 = vmatpush.bf16.msra.mxu3 %v4197_v12  ;;  %v3456_v28 = vld [vmem:[%s6514_s2 + $0xb0] sm:$0xf]  ;;  %v4259_v29 = vld [vmem:[%s6514_s2 + $0xb8] sm:$0xf0] }
  0x2d   :  { %592 = vmatpush.bf16.msrb.mxu0 %v3289_v35  ;;  %606 = vmatpush.bf16.msrb.mxu1 %v3293_v38  ;;  %v4196_v35 = vld [vmem:[%s6516_s4] sm:$0xff]  ;;  %v3233_v38 = vor.u32 %v4204_v30, %v3230_v32  ;;  %v3436_v32 = vld [vmem:[%s6514_s2 + $0x90] sm:$0xf] }
  0x2e   :  { %620 = vmatpush.bf16.msrb.mxu2 %v3297_v40  ;;  %v3237_v40 = vor.u32 %v4206_v34, %v3236_v33  ;;  %v4255_v33 = vld [vmem:[%s6514_s2 + $0x98] sm:$0xf0]  ;;  %v4254_v34 = vld [vmem:[%s6514_s2 + $0x94] sm:$0xf] }
  0x2f   :  { %362 = vmatpush.bf16.msra.mxu3 %v4196_v35  ;;  %v4234_v35 = vld [vmem:[%s6516_s4 + $0x30] sm:$0xff] }
  0x31   :  { %593 = vmatpush.bf16.msrb.mxu0 %v3277_v45  ;;  %607 = vmatpush.bf16.msrb.mxu1 %v3281_v48 }
  0x32   :  { %621 = vmatpush.bf16.msrb.mxu2 %v3285_v51 }
  0x33   :  { %735 = vmatpush.bf16.msrb.mxu3 %v4235_v25  ;;  %v3376_v25 = vld [vmem:[%s6514_s2 + $0x18] sm:$0xf] }
  0x35   :  { %594 = vmatpush.bf16.msrb.mxu0 %v3265_v56  ;;  %608 = vmatpush.bf16.msrb.mxu1 %v3269_v59 }
  0x36   :  { %622 = vmatpush.bf16.msrb.mxu2 %v3273_v62 }
  0x37   :  { %736 = vmatpush.bf16.msrb.mxu3 %v4234_v35  ;;  %v4241_v35 = vld [vmem:[%s6514_s2 + $0x28] sm:$0xf0] }
  0x39   :  { %595 = vmatpush.bf16.msrb.mxu0 %v3253_v5  ;;  %609 = vmatpush.bf16.msrb.mxu1 %v3257_v10  ;;  %v41_v5 = vld [vmem:[%s6518_s0 + $0x28] sm:$0xff] }
  0x3a   :  { %623 = vmatpush.bf16.msrb.mxu2 %v3261_v15 }
  0x3d   :  { %596 = vmatpush.bf16.msrb.mxu0 %v3241_v22  ;;  %610 = vmatpush.bf16.msrb.mxu1 %v3245_v23 }
  0x3e   :  { %624 = vmatpush.bf16.msrb.mxu2 %v3249_v27  ;;  %v3450_v27 = vld [vmem:[%s6514_s2 + $0xb4] sm:$0xf0] }
  0x41   :  { %597 = vmatpush.bf16.msrb.mxu0 %v3229_v36  ;;  %611 = vmatpush.bf16.msrb.mxu1 %v3233_v38  ;;  %v3437_v36 = vor.u32 %v4255_v33, %v3436_v32  ;;  %v3444_v38 = vld [vmem:[%s6514_s2 + $0x98] sm:$0xf]  ;;  %v4428_v32 = vld [vmem:[%s6519_s5] ss:$0 sm:$0xff] }
  0x42   :  { %625 = vmatpush.bf16.msrb.mxu2 %v3237_v40  ;;  %v4256_v40 = vld [vmem:[%s6514_s2 + $0xa0] sm:$0xf0] }
  0xa0   :  { %v219_v14 = vpop.f32.mrf.mxu0 }
  0xa1   :  { %v220_v19 = vadd.f32 %v219_v14, %v76_v61  ;;  %v233_v21 = vpop.f32.mrf.mxu1 }
  0xa2   :  { %v234_v26 = vadd.f32 %v233_v21, %v77_v3 }
  0xa3   :  { %v252_v31 = vadd.f32 %v220_v19, %v36_v2 }
  0xa4   :  { %v262_v39 = vadd.f32 %v234_v26, %v37_v20 }
  0xa5   :  { %v254_v37 = vmul.f32 0.5, %v252_v31  ;;  %v3457_v31 = vor.u32 %v4259_v29, %v3456_v28  ;;  %v4240_v29 = vld [vmem:[%s6514_s2 + $0x20] sm:$0xf0] }
  0xa6   :  { %v264_v46 = vmul.f32 0.5, %v262_v39  ;;  %v3377_v33 = vor.u32 %v4240_v29, %v3376_v25 }
  0xa7   :  { %4436 = vtanh.f32 %v254_v37  ;;  %v247_v49 = vpop.f32.mrf.mxu2  ;;  %999 = vmatpush.bf16.msra.mxu2 %v3457_v31  ;;  %v3438_v37 = vld [vmem:[%s6514_s2 + $0x9c] sm:$0xf0]  ;;  %v3378_v31 = vld [vmem:[%s6514_s2 + $0x24] sm:$0xf0] }
  0xa8   :  { %v221_v42 = vpop.f32.mrf.mxu0  ;;  %4438 = vtanh.f32 %v264_v46  ;;  %v248_v55 = vadd.f32 %v247_v49, %v78_v47  ;;  %v3441_v39 = vor.u32 %v4254_v34, %v3438_v37  ;;  %v3432_v49 = vld [vmem:[%s6514_s2 + $0x80] sm:$0xf] }
  0xa9   :  { %v222_v43 = vadd.f32 %v221_v42, %v76_v61  ;;  %v235_v45 = vpop.f32.mrf.mxu1  ;;  %v3424_v42 = vld [vmem:[%s6514_s2 + $0x78] sm:$0xf]  ;;  %v3384_v34 = vld [vmem:[%s6514_s2 + $0x20] sm:$0xf] }
  0xaa   :  { %v236_v48 = vadd.f32 %v235_v45, %v77_v3  ;;  %v4233_v45 = vld [vmem:[%s6516_s4 + $0x28] sm:$0xff] }
  0xab   :  { %v253_v51 = vadd.f32 %v222_v43, %v39_v41  ;;  %v3445_v41 = vor.u32 %v4256_v40, %v3444_v38  ;;  %v4252_v43 = vld [vmem:[%s6514_s2 + $0x80] sm:$0xf0]  ;;  %737 = vmatpush.bf16.msrb.mxu3 %v4233_v45  ;;  %v3385_v38 = vor.u32 %v4241_v35, %v3384_v34  ;;  %v4237_v40 = vld [vmem:[%s6514_s2 + $0x8] sm:$0xf0]  ;;  %v4238_v45 = vld [vmem:[%s6514_s2 + $0x10] sm:$0xf0] }
  0xac   :  { %v263_v52 = vadd.f32 %v236_v48, %v40_v44  ;;  %v4251_v44 = vld [vmem:[%s6514_s2 + $0x7c] sm:$0xf]  ;;  %v3425_v46 = vor.u32 %v4252_v43, %v3424_v42  ;;  %v3366_v43 = vld [vmem:[%s6514_s2 + $0xc] sm:$0xf0] }
  0xad   :  { %v4437_v53 = vpop.eup %4436  ;;  %v255_v54 = vmul.f32 0.5, %v253_v51  ;;  %1000 = vmatpush.bf16.msra.mxu2 %v3445_v41  ;;  %v4253_v51 = vld [vmem:[%s6514_s2 + $0x88] sm:$0xf0]  ;;  %v4236_v41 = vld [vmem:[%s6514_s2 + $0x4] sm:$0xf] }
  0xae   :  { %v258_v56 = vadd.f32 1.0, %v4437_v53  ;;  %v265_v57 = vmul.f32 0.5, %v263_v52  ;;  %v4439_v50 = vpop.eup %4438  ;;  %v3433_v52 = vor.u32 %v4253_v51, %v3432_v49  ;;  %v3412_v53 = vld [vmem:[%s6514_s2 + $0x60] sm:$0xf] }
  0xaf   :  { %4440 = vtanh.f32 %v255_v54  ;;  %v249_v62 = vpop.f32.mrf.mxu2  ;;  %v268_v1 = vadd.f32 1.0, %v4439_v50  ;;  %v4249_v54 = vld [vmem:[%s6514_s2 + $0x68] sm:$0xf0]  ;;  %v4250_v50 = vld [vmem:[%s6514_s2 + $0x70] sm:$0xf0] }
  0xb0   :  { %v260_v58 = vmul.f32 0.5, %v258_v56  ;;  %4442 = vtanh.f32 %v265_v57  ;;  %v250_v3 = vadd.f32 %v249_v62, %v78_v47  ;;  %v3426_v47 = vld [vmem:[%s6514_s2 + $0x84] sm:$0xf0]  ;;  %v4232_v56 = vld [vmem:[%s6516_s4 + $0x20] sm:$0xff]  ;;  %v3413_v57 = vor.u32 %v4249_v54, %v3412_v53 }
  0xb1   :  { %v270_v9 = vmul.f32 0.5, %v268_v1  ;;  %v3429_v48 = vor.u32 %v4251_v44, %v3426_v47  ;;  %1001 = vmatpush.bf16.msra.mxu2 %v3433_v52  ;;  %738 = vmatpush.bf16.msrb.mxu3 %v4232_v56  ;;  %v4245_v1 = vld [vmem:[%s6514_s2 + $0x4c] sm:$0xf]  ;;  %v3372_v44 = vld [vmem:[%s6514_s2 + $0x8] sm:$0xf]  ;;  %v3221_v47 = vld [vmem:[%s6518_s0 + $0x38] sm:$0xff]  ;;  %v3369_v53 = vor.u32 %v4236_v41, %v3366_v43 }
  0xb2   :  { %v272_v59 = vmul.f32 %v260_v58, %v248_v55  ;;  %v4248_v55 = vld [vmem:[%s6514_s2 + $0x64] sm:$0xf]  ;;  %v3414_v58 = vld [vmem:[%s6514_s2 + $0x6c] sm:$0xf0]  ;;  %v3373_v54 = vor.u32 %v4238_v45, %v3372_v44  ;;  %v3223_v56 = vld [vmem:[%s6518_s0 + $0x48] sm:$0xff] }
  0xb3   :  { %v278_v12 = vsub.f32 1.0, %v270_v9  ;;  %v282_v18 = vmul.f32 %v270_v9, %v4783_v6  ;;  %v4258_v6 = vld [vmem:[%s6514_s2 + $0xb0] sm:$0xf0]  ;;  %v4247_v9 = vld [vmem:[%s6514_s2 + $0x58] sm:$0xf0] }
  0xb4   :  { %v274_v63 = vadd.f32 %v272_v59, %v38_v60  ;;  %v3449_v26 = vor.u32 %v4258_v6, %v3448_v24  ;;  %v3420_v59 = vld [vmem:[%s6514_s2 + $0x68] sm:$0xf]  ;;  %v3417_v60 = vor.u32 %v4248_v55, %v3414_v58  ;;  %v4244_v6 = vld [vmem:[%s6514_s2 + $0x40] sm:$0xf0]  ;;  %v4267_v41 = vld [vmem:[%s6516_s4 + $0x38] sm:$0xff] }
  0xb5   :  { %v4441_v61 = vpop.eup %4440  ;;  %v3421_v62 = vor.u32 %v4250_v50, %v3420_v59  ;;  %v3224_v59 = vld [vmem:[%s6518_s0 + $0x50] sm:$0xff]  ;;  %v3586_v43 = vld [vmem:[%s6514_s2 + $0xb4] sm:$0xf0]  ;;  %v4291_v45 = vld [vmem:[%s6514_s2 + $0xb8] sm:$0xf0] }
  0xb6   :  { %v259_v0 = vadd.f32 1.0, %v4441_v61  ;;  %v4443_v2 = vpop.eup %4442  ;;  %4444 = vtanh.f32 %v274_v63  ;;  %971 = vmatpush.bf16.msra.mxu0 %v3449_v26  ;;  %v5081_v61 = vld [vmem:[%s6517_s3] sm:$0x7]  ;;  %v3400_v63 = vld [vmem:[%s6514_s2 + $0x48] sm:$0xf] }
  0xb7   :  { %v269_v10 = vadd.f32 1.0, %v4443_v2  ;;  %1002 = vmatpush.bf16.msra.mxu2 %v3421_v62  ;;  %v4231_v2 = vld [vmem:[%s6516_s4 + $0x18] sm:$0xff]  ;;  %v3592_v44 = vld [vmem:[%s6514_s2 + $0xb0] sm:$0xf] }
  0xb8   :  { %v261_v4 = vmul.f32 0.5, %v259_v0  ;;  %v4246_v0 = vld [vmem:[%s6514_s2 + $0x50] sm:$0xf0]  ;;  %739 = vmatpush.bf16.msrb.mxu3 %v4231_v2 }
  0xb9   :  { %v271_v13 = vmul.f32 0.5, %v269_v10  ;;  %v456_v10 = vperm.slane %v5081_v61, 0 }
  0xba   :  { %v273_v8 = vmul.f32 %v261_v4, %v250_v3  ;;  %972 = vmatpush.bf16.msra.mxu0 %v3437_v36  ;;  %v3401_v3 = vor.u32 %v4246_v0, %v3400_v63  ;;  %v3402_v4 = vld [vmem:[%s6514_s2 + $0x54] sm:$0xf0] }
  0xbb   :  { %v279_v15 = vsub.f32 1.0, %v271_v13  ;;  %v283_v19 = vmul.f32 %v271_v13, %v4788_v7  ;;  %v4257_v7 = vld [vmem:[%s6514_s2 + $0xac] sm:$0xf]  ;;  %v4230_v13 = vld [vmem:[%s6516_s4 + $0x10] sm:$0xff] }
  0xbc   :  { %v275_v11 = vadd.f32 %v273_v8, %v41_v5  ;;  %v4445_v14 = vpop.eup %4444  ;;  %v3453_v30 = vor.u32 %v4257_v7, %v3450_v27  ;;  %v3405_v5 = vor.u32 %v4245_v1, %v3402_v4  ;;  %v3408_v8 = vld [vmem:[%s6514_s2 + $0x50] sm:$0xf]  ;;  %v4229_v7 = vld [vmem:[%s6516_s4 + $0x8] sm:$0xff]  ;;  %740 = vmatpush.bf16.msrb.mxu3 %v4230_v13  ;;  %v458_v1 = vperm.slane %v5081_v61, 2 }
  0xbd   :  { %v280_v16 = vmul.f32 %v4445_v14, %v278_v12  ;;  %v3220_v12 = vld [vmem:[%s6518_s0 + $0x30] sm:$0xff] }
  0xbe   :  { %4446 = vtanh.f32 %v275_v11  ;;  %985 = vmatpush.bf16.msra.mxu1 %v3453_v30  ;;  %973 = vmatpush.bf16.msra.mxu0 %v3425_v46  ;;  %v3409_v11 = vor.u32 %v4247_v9, %v3408_v8  ;;  %v3388_v14 = vld [vmem:[%s6514_s2 + $0x30] sm:$0xf]  ;;  %v4239_v30 = vld [vmem:[%s6514_s2 + $0x1c] sm:$0xf] }
  0xbf   :  { %v4988_v21 = vadd.f32 %v282_v18, %v280_v16  ;;  %v3390_v18 = vld [vmem:[%s6514_s2 + $0x3c] sm:$0xf0]  ;;  %v3381_v37 = vor.u32 %v4239_v30, %v3378_v31 }
  0xc0   :  { %1003 = vmatpush.bf16.msra.mxu2 %v3409_v11  ;;  %741 = vmatpush.bf16.msrb.mxu3 %v4229_v7 }
  0xc2   :  { %986 = vmatpush.bf16.msra.mxu1 %v3441_v39  ;;  %974 = vmatpush.bf16.msra.mxu0 %v3413_v57  ;;  %v3364_v39 = vld [vmem:[%s6514_s2] sm:$0xf] }
  0xc3   :  { %v3365_v51 = vor.u32 %v4237_v40, %v3364_v39  ;;  %v3584_v40 = vld [vmem:[%s6514_s2 + $0xa8] sm:$0xf] }
  0xc4   :  { %v4447_v17 = vpop.eup %4446 }
  0xc5   :  { %v281_v20 = vmul.f32 %v4447_v17, %v279_v15  ;;  %v4243_v15 = vld [vmem:[%s6514_s2 + $0x38] sm:$0xf0]  ;;  %v4242_v17 = vld [vmem:[%s6514_s2 + $0x34] sm:$0xf] }
  0xc6   :  { %987 = vmatpush.bf16.msra.mxu1 %v3429_v48  ;;  %975 = vmatpush.bf16.msra.mxu0 %v3401_v3  ;;  %v3389_v16 = vor.u32 %v4243_v15, %v3388_v14  ;;  %v3393_v24 = vor.u32 %v4242_v17, %v3390_v18  ;;  %v4228_v48 = vld [vmem:[%s6516_s4] sm:$0xff] }
  0xc7   :  { %v4990_v22 = vadd.f32 %v283_v19, %v281_v20  ;;  %v3396_v19 = vld [vmem:[%s6514_s2 + $0x38] sm:$0xf]  ;;  %742 = vmatpush.bf16.msrb.mxu3 %v4228_v48  ;;  %v3572_v48 = vld [vmem:[%s6514_s2 + $0x90] sm:$0xf] }
  0xc8   :  { %v3397_v28 = vor.u32 %v4244_v6, %v3396_v19  ;;  %v3225_v6 = vld [vmem:[%s6518_s0 + $0x58] sm:$0xff] }
  0xc9   :  { %v286_v23 = vpack.c.bf16 %v4990_v22, %v4988_v21 }
  0xca   :  { %988 = vmatpush.bf16.msra.mxu1 %v3417_v60  ;;  %976 = vmatpush.bf16.msra.mxu0 %v3389_v16 }
  0xcb   :  { %363 = vmatmul.bf16.vlgmr.msra.gmra.mxu3 %v286_v23  ;;  %598 = vmatmul.bf16.vlgmr.msrb.gmra.mxu0 %v286_v23 }
  0xcc   :  { %612 = vmatmul.bf16.vlgmr.msrb.gmra.mxu1 %v286_v23  ;;  %626 = vmatmul.bf16.vlgmr.msrb.gmra.mxu2 %v286_v23  ;;  %v457_v23 = vperm.slane %v5081_v61, 1  ;;  %v3222_v61 = vld [vmem:[%s6518_s0 + $0x40] sm:$0xff] }
  0xcd   :  { %1004 = vmatpush.bf16.msra.mxu2 %v3397_v28  ;;  %1116 = vmatpush.bf16.msra.mxu3 %v4267_v41  ;;  %v4276_v41 = vld [vmem:[%s6514_s2 + $0x40] sm:$0xf0] }
  0xce   :  { %989 = vmatpush.bf16.msra.mxu1 %v3405_v5  ;;  %977 = vmatpush.bf16.msra.mxu0 %v3377_v33 }
  0xd1   :  { %1005 = vmatpush.bf16.msra.mxu2 %v3385_v38 }
  0xd2   :  { %990 = vmatpush.bf16.msra.mxu1 %v3393_v24  ;;  %978 = vmatpush.bf16.msra.mxu0 %v3365_v51  ;;  %v4286_v51 = vld [vmem:[%s6514_s2 + $0x94] sm:$0xf] }
  0xd5   :  { %1006 = vmatpush.bf16.msra.mxu2 %v3373_v54 }
  0xd6   :  { %991 = vmatpush.bf16.msra.mxu1 %v3381_v37 }
  0xda   :  { %992 = vmatpush.bf16.msra.mxu1 %v3369_v53  ;;  %v4266_v53 = vld [vmem:[%s6516_s4 + $0x30] sm:$0xff] }
  0xdb   :  { %1117 = vmatpush.bf16.msra.mxu3 %v4266_v53 }
 0x148   :  { %v599_v20 = vpop.f32.mrf.mxu0 }
 0x149   :  { %v600_v26 = vadd.f32 %v599_v20, %v456_v10  ;;  %v613_v27 = vpop.f32.mrf.mxu1 }
 0x14a   :  { %v614_v42 = vadd.f32 %v613_v27, %v457_v23 }
 0x14b   :  { %v632_v36 = vadd.f32 %v3220_v12, %v600_v26 }
 0x14c   :  { %v642_v55 = vadd.f32 %v3221_v47, %v614_v42  ;;  %v3593_v47 = vor.u32 %v4291_v45, %v3592_v44 }
 0x14d   :  { %v634_v46 = vmul.f32 0.5, %v632_v36 }
 0x14e   :  { %v364_v49 = vpop.f32.mrf.mxu3  ;;  %v644_v0 = vmul.f32 0.5, %v642_v55  ;;  %1380 = vmatpush.bf16.msrb.mxu2 %v3593_v47  ;;  %v3574_v55 = vld [vmem:[%s6514_s2 + $0x9c] sm:$0xf0]  ;;  %v4272_v47 = vld [vmem:[%s6514_s2 + $0x20] sm:$0xf0] }
 0x14f   :  { %4448 = vtanh.f32 %v634_v46  ;;  %v5178_v52 = vadd.f32 %v4428_v32, %v364_v49  ;;  %v627_v62 = vpop.f32.mrf.mxu2  ;;  %v4287_v49 = vld [vmem:[%s6514_s2 + $0x98] sm:$0xf0] }
 0x150   :  { %v601_v57 = vpop.f32.mrf.mxu0  ;;  %v628_v11 = vadd.f32 %v627_v62, %v458_v1  ;;  %v3573_v54 = vor.u32 %v4287_v49, %v3572_v48  ;;  %v4283_v62 = vld [vmem:[%s6514_s2 + $0x7c] sm:$0xf]  ;;  %v3514_v49 = vld [vmem:[%s6514_s2 + $0x24] sm:$0xf0] }
 0x151   :  { %v602_v58 = vadd.f32 %v601_v57, %v456_v10  ;;  %v615_v60 = vpop.f32.mrf.mxu1  ;;  %369 = vmax.xlane.f32.xlu0 %v5178_v52  ;;  %v3577_v57 = vor.u32 %v4286_v51, %v3574_v55  ;;  %v4271_v48 = vld [vmem:[%s6514_s2 + $0x1c] sm:$0xf]  ;;  %v4429_v51 = vld [vmem:[%s6519_s5] ss:$0 sm:$0xff]  ;;  %v4273_v55 = vld [vmem:[%s6514_s2 + $0x28] sm:$0xf0] }
 0x152   :  { %v616_v50 = vadd.f32 %v615_v60, %v457_v23  ;;  %v3560_v60 = vld [vmem:[%s6514_s2 + $0x78] sm:$0xf] }
 0x153   :  { %v633_v63 = vadd.f32 %v3223_v56, %v602_v58  ;;  %v3580_v56 = vld [vmem:[%s6514_s2 + $0x98] sm:$0xf]  ;;  %v4288_v58 = vld [vmem:[%s6514_s2 + $0xa0] sm:$0xf0] }
 0x154   :  { %v643_v2 = vadd.f32 %v3224_v59, %v616_v50  ;;  %v3581_v59 = vor.u32 %v4288_v58, %v3580_v56  ;;  %v4284_v50 = vld [vmem:[%s6514_s2 + $0x80] sm:$0xf0] }
 0x155   :  { %v4449_v3 = vpop.eup %4448  ;;  %v635_v4 = vmul.f32 0.5, %v633_v63  ;;  %v4265_v63 = vld [vmem:[%s6516_s4 + $0x28] sm:$0xff] }
 0x156   :  { %v638_v5 = vadd.f32 1.0, %v4449_v3  ;;  %v645_v8 = vmul.f32 0.5, %v643_v2  ;;  %v366_v9 = vpop.f32.mrf.mxu3  ;;  %1381 = vmatpush.bf16.msrb.mxu2 %v3581_v59  ;;  %v3568_v3 = vld [vmem:[%s6514_s2 + $0x80] sm:$0xf]  ;;  %1118 = vmatpush.bf16.msra.mxu3 %v4265_v63  ;;  %v3502_v63 = vld [vmem:[%s6514_s2 + $0xc] sm:$0xf0] }
 0x157   :  { %4450 = vtanh.f32 %v635_v4  ;;  %v5188_v10 = vadd.f32 %v4428_v32, %v366_v9  ;;  %v629_v15 = vpop.f32.mrf.mxu2  ;;  %v4285_v4 = vld [vmem:[%s6514_s2 + $0x88] sm:$0xf0]  ;;  %v3500_v59 = vld [vmem:[%s6514_s2] sm:$0xf] }
 0x158   :  { %4452 = vtanh.f32 %v644_v0  ;;  %v640_v12 = vmul.f32 0.5, %v638_v5  ;;  %v630_v20 = vadd.f32 %v629_v15, %v458_v1  ;;  %v3561_v0 = vor.u32 %v4284_v50, %v3560_v60  ;;  %v3562_v1 = vld [vmem:[%s6514_s2 + $0x84] sm:$0xf0]  ;;  %v4281_v9 = vld [vmem:[%s6514_s2 + $0x68] sm:$0xf0] }
 0x159   :  { %371 = vmax.xlane.f32.xlu0 %v5188_v10  ;;  %4454 = vtanh.f32 %v645_v8  ;;  %v3565_v2 = vor.u32 %v4283_v62, %v3562_v1  ;;  %v3569_v5 = vor.u32 %v4285_v4, %v3568_v3  ;;  %v3548_v8 = vld [vmem:[%s6514_s2 + $0x60] sm:$0xf]  ;;  %v4269_v60 = vld [vmem:[%s6514_s2 + $0x8] sm:$0xf0]  ;;  %v4268_v50 = vld [vmem:[%s6514_s2 + $0x4] sm:$0xf] }
 0x15a   :  { %v652_v13 = vmul.f32 %v640_v12, %v628_v11  ;;  %v4280_v11 = vld [vmem:[%s6514_s2 + $0x64] sm:$0xf]  ;;  %v4270_v1 = vld [vmem:[%s6514_s2 + $0x10] sm:$0xf0]  ;;  %v3357_v3 = vld [vmem:[%s6518_s0 + $0x68] sm:$0xff] }
 0x15b   :  { %1382 = vmatpush.bf16.msrb.mxu2 %v3569_v5  ;;  %v4264_v12 = vld [vmem:[%s6516_s4 + $0x20] sm:$0xff] }
 0x15c   :  { %v654_v17 = vadd.f32 %v3222_v61, %v652_v13  ;;  %v3549_v13 = vor.u32 %v4281_v9, %v3548_v8  ;;  %v3550_v61 = vld [vmem:[%s6514_s2 + $0x6c] sm:$0xf0]  ;;  %1119 = vmatpush.bf16.msra.mxu3 %v4264_v12  ;;  %v4260_v4 = vld [vmem:[%s6516_s4] sm:$0xff]  ;;  %v3501_v8 = vor.u32 %v4269_v60, %v3500_v59 }
 0x15d   :  { %v4451_v14 = vpop.eup %4450  ;;  %v3553_v15 = vor.u32 %v4280_v11, %v3550_v61  ;;  %v3505_v11 = vor.u32 %v4268_v50, %v3502_v63  ;;  %v3359_v61 = vld [vmem:[%s6518_s0 + $0x78] sm:$0xff] }
 0x15e   :  { %v4453_v16 = vpop.eup %4452  ;;  %v639_v18 = vadd.f32 1.0, %v4451_v14  ;;  %4456 = vtanh.f32 %v654_v17  ;;  %v3556_v14 = vld [vmem:[%s6514_s2 + $0x68] sm:$0xf]  ;;  %v5292_v17 = vld [vmem:[%s6517_s3] sm:$0x7]  ;;  %v4299_v63 = vld [vmem:[%s6516_s4 + $0x38] sm:$0xff] }
 0x15f   :  { %v4455_v19 = vpop.eup %4454  ;;  %v648_v24 = vadd.f32 1.0, %v4453_v16  ;;  %v4282_v16 = vld [vmem:[%s6514_s2 + $0x70] sm:$0xf0] }
 0x160   :  { %v641_v23 = vmul.f32 0.5, %v639_v18  ;;  %v649_v25 = vadd.f32 1.0, %v4455_v19  ;;  %v3557_v18 = vor.u32 %v4282_v16, %v3556_v14  ;;  %v3536_v19 = vld [vmem:[%s6514_s2 + $0x48] sm:$0xf]  ;;  %v3360_v16 = vld [vmem:[%s6518_s0 + $0x80] sm:$0xff] }
 0x161   :  { %v650_v27 = vmul.f32 0.5, %v648_v24  ;;  %v4263_v24 = vld [vmem:[%s6516_s4 + $0x18] sm:$0xff] }
 0x162   :  { %v653_v7 = vmul.f32 %v641_v23, %v630_v20  ;;  %v651_v28 = vmul.f32 0.5, %v649_v25  ;;  %v4278_v20 = vld [vmem:[%s6514_s2 + $0x50] sm:$0xf0]  ;;  %v4277_v23 = vld [vmem:[%s6514_s2 + $0x4c] sm:$0xf]  ;;  %1383 = vmatpush.bf16.msrb.mxu2 %v3557_v18  ;;  %1120 = vmatpush.bf16.msra.mxu3 %v4263_v24 }
 0x163   :  { %v658_v30 = vsub.f32 1.0, %v650_v27  ;;  %v662_v34 = vmul.f32 %v650_v27, %v4988_v21  ;;  %v4290_v21 = vld [vmem:[%s6514_s2 + $0xb0] sm:$0xf0]  ;;  %v4279_v27 = vld [vmem:[%s6514_s2 + $0x58] sm:$0xf0] }
 0x164   :  { %v655_v26 = vadd.f32 %v3225_v6, %v653_v7  ;;  %v4457_v29 = vpop.eup %4456  ;;  %v659_v31 = vsub.f32 1.0, %v651_v28  ;;  %v663_v35 = vmul.f32 %v651_v28, %v4990_v22  ;;  %v4289_v22 = vld [vmem:[%s6514_s2 + $0xac] sm:$0xf]  ;;  %v3585_v42 = vor.u32 %v4290_v21, %v3584_v40  ;;  %v3538_v7 = vld [vmem:[%s6514_s2 + $0x54] sm:$0xf0] }
 0x165   :  { %v660_v32 = vmul.f32 %v4457_v29, %v658_v30  ;;  %v3589_v46 = vor.u32 %v4289_v22, %v3586_v43  ;;  %v3537_v6 = vor.u32 %v4278_v20, %v3536_v19  ;;  %v3541_v25 = vor.u32 %v4277_v23, %v3538_v7  ;;  %v3356_v30 = vld [vmem:[%s6518_s0 + $0x60] sm:$0xff]  ;;  %v3512_v43 = vld [vmem:[%s6514_s2 + $0x18] sm:$0xf] }
 0x166   :  { %4458 = vtanh.f32 %v655_v26  ;;  %1352 = vmatpush.bf16.msrb.mxu0 %v3585_v42  ;;  %v3544_v26 = vld [vmem:[%s6514_s2 + $0x50] sm:$0xf]  ;;  %v837_v28 = vperm.slane %v5292_v17, 0  ;;  %v838_v21 = vperm.slane %v5292_v17, 1  ;;  %v4261_v42 = vld [vmem:[%s6516_s4 + $0x8] sm:$0xff]  ;;  %v3513_v53 = vor.u32 %v4272_v47, %v3512_v43 }
 0x167   :  { %v5199_v37 = vadd.f32 %v662_v34, %v660_v32  ;;  %1366 = vmatpush.bf16.msrb.mxu1 %v3589_v46  ;;  %v3545_v29 = vor.u32 %v4279_v27, %v3544_v26  ;;  %v3524_v32 = vld [vmem:[%s6514_s2 + $0x30] sm:$0xf]  ;;  %v3361_v43 = vld [vmem:[%s6518_s0 + $0x88] sm:$0xff] }
 0x169   :  { %1384 = vmatpush.bf16.msrb.mxu2 %v3545_v29 }
 0x16a   :  { %1353 = vmatpush.bf16.msrb.mxu0 %v3573_v54  ;;  %v3520_v54 = vld [vmem:[%s6514_s2 + $0x20] sm:$0xf] }
 0x16b   :  { %1367 = vmatpush.bf16.msrb.mxu1 %v3577_v57  ;;  %v3517_v57 = vor.u32 %v4271_v48, %v3514_v49  ;;  %v3521_v58 = vor.u32 %v4273_v55, %v3520_v54 }
 0x16c   :  { %v4459_v33 = vpop.eup %4458 }
 0x16d   :  { %v661_v36 = vmul.f32 %v4459_v33, %v659_v31  ;;  %v4262_v31 = vld [vmem:[%s6516_s4 + $0x10] sm:$0xff]  ;;  %v4275_v33 = vld [vmem:[%s6514_s2 + $0x38] sm:$0xf0] }
 0x16e   :  { %1354 = vmatpush.bf16.msrb.mxu0 %v3561_v0  ;;  %v3525_v34 = vor.u32 %v4275_v33, %v3524_v32  ;;  %1121 = vmatpush.bf16.msra.mxu3 %v4262_v31  ;;  %v3508_v0 = vld [vmem:[%s6514_s2 + $0x8] sm:$0xf] }
 0x16f   :  { %v5201_v38 = vadd.f32 %v663_v35, %v661_v36  ;;  %1368 = vmatpush.bf16.msrb.mxu1 %v3565_v2  ;;  %v4274_v35 = vld [vmem:[%s6514_s2 + $0x34] sm:$0xf]  ;;  %v3526_v36 = vld [vmem:[%s6514_s2 + $0x3c] sm:$0xf0]  ;;  %v3509_v12 = vor.u32 %v4270_v1, %v3508_v0  ;;  %v3722_v1 = vld [vmem:[%s6514_s2 + $0xb4] sm:$0xf0] }
 0x170   :  { %v3529_v22 = vor.u32 %v4274_v35, %v3526_v36 }
 0x171   :  { %v666_v39 = vpack.c.bf16 %v5201_v38, %v5199_v37 }
 0x172   :  { %1355 = vmatpush.bf16.msrb.mxu0 %v3549_v13  ;;  %1122 = vmatpush.bf16.msra.mxu3 %v4261_v42 }
 0x173   :  { %743 = vmatmul.bf16.vlgmr.msrb.gmra.mxu3 %v666_v39  ;;  %979 = vmatmul.bf16.vlgmr.msra.gmra.mxu0 %v666_v39 }
 0x174   :  { %993 = vmatmul.bf16.vlgmr.msra.gmra.mxu1 %v666_v39  ;;  %1007 = vmatmul.bf16.vlgmr.msra.gmra.mxu2 %v666_v39  ;;  %v3532_v39 = vld [vmem:[%s6514_s2 + $0x38] sm:$0xf] }
 0x175   :  { %1369 = vmatpush.bf16.msrb.mxu1 %v3553_v15  ;;  %v3533_v46 = vor.u32 %v4276_v41, %v3532_v39 }
 0x176   :  { %1356 = vmatpush.bf16.msrb.mxu0 %v3537_v6  ;;  %1123 = vmatpush.bf16.msra.mxu3 %v4260_v4  ;;  %v839_v6 = vperm.slane %v5292_v17, 2  ;;  %v3358_v17 = vld [vmem:[%s6518_s0 + $0x70] sm:$0xff] }
 0x177   :  { %1385 = vmatpush.bf16.msrb.mxu2 %v3533_v46 }
 0x179   :  { %1370 = vmatpush.bf16.msrb.mxu1 %v3541_v25 }
 0x17a   :  { %1357 = vmatpush.bf16.msrb.mxu0 %v3525_v34  ;;  %1497 = vmatpush.bf16.msrb.mxu3 %v4299_v63 }
 0x17b   :  { %1386 = vmatpush.bf16.msrb.mxu2 %v3521_v58 }
 0x17d   :  { %1371 = vmatpush.bf16.msrb.mxu1 %v3529_v22 }
 0x17e   :  { %1358 = vmatpush.bf16.msrb.mxu0 %v3513_v53 }
 0x17f   :  { %1387 = vmatpush.bf16.msrb.mxu2 %v3509_v12  ;;  %v4318_v12 = vld [vmem:[%s6514_s2 + $0x94] sm:$0xf] }
 0x181   :  { %1372 = vmatpush.bf16.msrb.mxu1 %v3517_v57 }
 0x182   :  { %1359 = vmatpush.bf16.msrb.mxu0 %v3501_v8  ;;  %v3708_v8 = vld [vmem:[%s6514_s2 + $0x90] sm:$0xf] }
 0x185   :  { %1373 = vmatpush.bf16.msrb.mxu1 %v3505_v11  ;;  %v4319_v11 = vld [vmem:[%s6514_s2 + $0x98] sm:$0xf0] }
 0x1f0   :  { %v980_v40 = vpop.f32.mrf.mxu0 }
 0x1f1   :  { %v981_v44 = vadd.f32 %v980_v40, %v837_v28  ;;  %v994_v45 = vpop.f32.mrf.mxu1 }
 0x1f2   :  { %v995_v62 = vadd.f32 %v994_v45, %v838_v21 }
 0x1f3   :  { %v1013_v56 = vadd.f32 %v3356_v30, %v981_v44 }
 0x1f4   :  { %v1023_v13 = vadd.f32 %v3357_v3, %v995_v62  ;;  %v3720_v62 = vld [vmem:[%s6514_s2 + $0xa8] sm:$0xf]  ;;  %v4323_v3 = vld [vmem:[%s6514_s2 + $0xb8] sm:$0xf0] }
 0x1f5   :  { %v1015_v2 = vmul.f32 0.5, %v1013_v56 }
 0x1f6   :  { %v744_v5 = vpop.f32.mrf.mxu3  ;;  %v1025_v24 = vmul.f32 0.5, %v1023_v13  ;;  %v4298_v13 = vld [vmem:[%s6516_s4 + $0x30] sm:$0xff] }
 0x1f7   :  { %4460 = vtanh.f32 %v1015_v2  ;;  %v5389_v9 = vadd.f32 %v4429_v51, %v744_v5  ;;  %v1008_v20 = vpop.f32.mrf.mxu2  ;;  %v3728_v2 = vld [vmem:[%s6514_s2 + $0xb0] sm:$0xf]  ;;  %1498 = vmatpush.bf16.msrb.mxu3 %v4298_v13  ;;  %v3650_v13 = vld [vmem:[%s6514_s2 + $0x24] sm:$0xf0] }
 0x1f8   :  { %v982_v14 = vpop.f32.mrf.mxu0  ;;  %v1009_v31 = vadd.f32 %v1008_v20, %v839_v6  ;;  %v3729_v5 = vor.u32 %v4323_v3, %v3728_v2  ;;  %v3696_v20 = vld [vmem:[%s6514_s2 + $0x78] sm:$0xf]  ;;  %v4293_v2 = vld [vmem:[%s6516_s4 + $0x8] sm:$0xff] }
 0x1f9   :  { %v983_v15 = vadd.f32 %v982_v14, %v837_v28  ;;  %v996_v18 = vpop.f32.mrf.mxu1  ;;  %749 = vmax.xlane.f32.xlu1 %v5389_v9  ;;  %v3710_v14 = vld [vmem:[%s6514_s2 + $0x9c] sm:$0xf0]  ;;  %v3648_v3 = vld [vmem:[%s6514_s2 + $0x18] sm:$0xf] }
 0x1fa   :  { %v997_v19 = vadd.f32 %v996_v18, %v838_v21  ;;  %1761 = vmatpush.bf16.msra.mxu2 %v3729_v5  ;;  %v4320_v18 = vld [vmem:[%s6514_s2 + $0xa0] sm:$0xf0] }
 0x1fb   :  { %v1014_v23 = vadd.f32 %v3359_v61, %v983_v15  ;;  %v3709_v61 = vor.u32 %v4319_v11, %v3708_v8  ;;  %v3716_v15 = vld [vmem:[%s6514_s2 + $0x98] sm:$0xf]  ;;  %v4304_v11 = vld [vmem:[%s6514_s2 + $0x20] sm:$0xf0] }
 0x1fc   :  { %v1024_v7 = vadd.f32 %v3360_v16, %v997_v19  ;;  %v3713_v16 = vor.u32 %v4318_v12, %v3710_v14  ;;  %v3717_v19 = vor.u32 %v4320_v18, %v3716_v15  ;;  %v4303_v12 = vld [vmem:[%s6514_s2 + $0x1c] sm:$0xf]  ;;  %v3649_v14 = vor.u32 %v4304_v11, %v3648_v3  ;;  %v3656_v15 = vld [vmem:[%s6514_s2 + $0x20] sm:$0xf] }
 0x1fd   :  { %v4461_v25 = vpop.eup %4460  ;;  %v1016_v26 = vmul.f32 0.5, %v1014_v23  ;;  %v4316_v23 = vld [vmem:[%s6514_s2 + $0x80] sm:$0xf0] }
 0x1fe   :  { %v1019_v27 = vadd.f32 1.0, %v4461_v25  ;;  %v1026_v28 = vmul.f32 0.5, %v1024_v7  ;;  %v746_v29 = vpop.f32.mrf.mxu3  ;;  %1762 = vmatpush.bf16.msra.mxu2 %v3717_v19  ;;  %v3697_v7 = vor.u32 %v4316_v23, %v3696_v20  ;;  %v3698_v25 = vld [vmem:[%s6514_s2 + $0x84] sm:$0xf0]  ;;  %v3653_v19 = vor.u32 %v4303_v12, %v3650_v13  ;;  %v3636_v23 = vld [vmem:[%s6514_s2] sm:$0xf] }
 0x1ff   :  { %4462 = vtanh.f32 %v1016_v26  ;;  %v5399_v30 = vadd.f32 %v4429_v51, %v746_v29  ;;  %v1010_v35 = vpop.f32.mrf.mxu2 }
 0x200   :  { %4464 = vtanh.f32 %v1025_v24  ;;  %v1021_v32 = vmul.f32 0.5, %v1019_v27  ;;  %v1011_v22 = vadd.f32 %v1010_v35, %v839_v6  ;;  %v4315_v24 = vld [vmem:[%s6514_s2 + $0x7c] sm:$0xf]  ;;  %v4297_v6 = vld [vmem:[%s6516_s4 + $0x28] sm:$0xff]  ;;  %v3704_v27 = vld [vmem:[%s6514_s2 + $0x80] sm:$0xf] }
 0x201   :  { %751 = vmax.xlane.f32.xlu1 %v5399_v30  ;;  %4466 = vtanh.f32 %v1026_v28  ;;  %v3701_v26 = vor.u32 %v4315_v24, %v3698_v25  ;;  %v4317_v28 = vld [vmem:[%s6514_s2 + $0x88] sm:$0xf0]  ;;  %1499 = vmatpush.bf16.msrb.mxu3 %v4297_v6  ;;  %v3686_v35 = vld [vmem:[%s6514_s2 + $0x6c] sm:$0xf0]  ;;  %v4300_v6 = vld [vmem:[%s6514_s2 + $0x4] sm:$0xf] }
 0x202   :  { %v1033_v33 = vmul.f32 %v1021_v32, %v1009_v31  ;;  %v3705_v29 = vor.u32 %v4317_v28, %v3704_v27  ;;  %v3684_v31 = vld [vmem:[%s6514_s2 + $0x60] sm:$0xf]  ;;  %v4313_v32 = vld [vmem:[%s6514_s2 + $0x68] sm:$0xf0]  ;;  %v3638_v25 = vld [vmem:[%s6514_s2 + $0xc] sm:$0xf0] }
 0x203   :  { %v4301_v24 = vld [vmem:[%s6514_s2 + $0x8] sm:$0xf0]  ;;  %v4302_v27 = vld [vmem:[%s6514_s2 + $0x10] sm:$0xf0] }
 0x204   :  { %v1035_v39 = vadd.f32 %v3358_v17, %v1033_v33  ;;  %v4312_v33 = vld [vmem:[%s6514_s2 + $0x64] sm:$0xf]  ;;  %1763 = vmatpush.bf16.msra.mxu2 %v3705_v29  ;;  %v3493_v29 = vld [vmem:[%s6518_s0 + $0x98] sm:$0xff] }
 0x205   :  { %v4463_v34 = vpop.eup %4462  ;;  %v4296_v17 = vld [vmem:[%s6516_s4 + $0x20] sm:$0xff] }
 0x206   :  { %v4465_v36 = vpop.eup %4464  ;;  %v1020_v40 = vadd.f32 1.0, %v4463_v34  ;;  %4468 = vtanh.f32 %v1035_v39  ;;  %v3685_v34 = vor.u32 %v4313_v32, %v3684_v31  ;;  %v3689_v39 = vor.u32 %v4312_v33, %v3686_v35  ;;  %1500 = vmatpush.bf16.msrb.mxu3 %v4296_v17  ;;  %v4292_v31 = vld [vmem:[%s6516_s4] sm:$0xff] }
 0x207   :  { %v4467_v21 = vpop.eup %4466  ;;  %v1029_v42 = vadd.f32 1.0, %v4465_v36  ;;  %v3692_v36 = vld [vmem:[%s6514_s2 + $0x68] sm:$0xf]  ;;  %v3637_v33 = vor.u32 %v4301_v24, %v3636_v23 }
 0x208   :  { %v1022_v41 = vmul.f32 0.5, %v1020_v40  ;;  %v1030_v45 = vadd.f32 1.0, %v4467_v21  ;;  %v4314_v40 = vld [vmem:[%s6514_s2 + $0x70] sm:$0xf0]  ;;  %v5503_v21 = vld [vmem:[%s6517_s3] sm:$0x7] }
 0x209   :  { %v1031_v47 = vmul.f32 0.5, %v1029_v42  ;;  %v4310_v42 = vld [vmem:[%s6514_s2 + $0x50] sm:$0xf0]  ;;  %v1219_v63 = vperm.slane %v5503_v21, 1 }
 0x20a   :  { %v1034_v44 = vmul.f32 %v1022_v41, %v1011_v22  ;;  %v1032_v48 = vmul.f32 0.5, %v1030_v45  ;;  %v3693_v22 = vor.u32 %v4314_v40, %v3692_v36  ;;  %v3672_v41 = vld [vmem:[%s6514_s2 + $0x48] sm:$0xf] }
 0x20b   :  { %v1039_v51 = vsub.f32 1.0, %v1031_v47  ;;  %v1043_v56 = vmul.f32 %v1031_v47, %v5199_v37  ;;  %v4322_v37 = vld [vmem:[%s6514_s2 + $0xb0] sm:$0xf0]  ;;  %v3673_v45 = vor.u32 %v4310_v42, %v3672_v41 }
 0x20c   :  { %v1036_v46 = vadd.f32 %v3361_v43, %v1034_v44  ;;  %v4469_v49 = vpop.eup %4468  ;;  %v1040_v53 = vsub.f32 1.0, %v1032_v48  ;;  %v1044_v57 = vmul.f32 %v1032_v48, %v5201_v38  ;;  %v4321_v38 = vld [vmem:[%s6514_s2 + $0xac] sm:$0xf]  ;;  %v3721_v0 = vor.u32 %v4322_v37, %v3720_v62  ;;  %1764 = vmatpush.bf16.msra.mxu2 %v3693_v22  ;;  %v4295_v44 = vld [vmem:[%s6516_s4 + $0x18] sm:$0xff]  ;;  %v3680_v48 = vld [vmem:[%s6514_s2 + $0x50] sm:$0xf] }
 0x20d   :  { %v1041_v54 = vmul.f32 %v4469_v49, %v1039_v51  ;;  %v3725_v4 = vor.u32 %v4321_v38, %v3722_v1  ;;  %v4309_v43 = vld [vmem:[%s6514_s2 + $0x4c] sm:$0xf]  ;;  %v4311_v49 = vld [vmem:[%s6514_s2 + $0x58] sm:$0xf0]  ;;  %v1218_v51 = vperm.slane %v5503_v21, 0  ;;  %1501 = vmatpush.bf16.msrb.mxu3 %v4295_v44  ;;  %v3496_v41 = vld [vmem:[%s6518_s0 + $0xb0] sm:$0xff] }
 0x20e   :  { %4470 = vtanh.f32 %v1036_v46  ;;  %1733 = vmatpush.bf16.msra.mxu0 %v3721_v0  ;;  %v3674_v46 = vld [vmem:[%s6514_s2 + $0x54] sm:$0xf0]  ;;  %v3662_v62 = vld [vmem:[%s6514_s2 + $0x3c] sm:$0xf0]  ;;  %v4308_v1 = vld [vmem:[%s6514_s2 + $0x40] sm:$0xf0] }
 0x20f   :  { %v5410_v59 = vadd.f32 %v1043_v56, %v1041_v54  ;;  %1747 = vmatpush.bf16.msra.mxu1 %v3725_v4  ;;  %v3677_v47 = vor.u32 %v4309_v43, %v3674_v46  ;;  %v3492_v54 = vld [vmem:[%s6518_s0 + $0x90] sm:$0xff]  ;;  %v3668_v37 = vld [vmem:[%s6514_s2 + $0x38] sm:$0xf] }
 0x210   :  { %v3660_v56 = vld [vmem:[%s6514_s2 + $0x30] sm:$0xf]  ;;  %v3669_v8 = vor.u32 %v4308_v1, %v3668_v37 }
 0x212   :  { %1734 = vmatpush.bf16.msra.mxu0 %v3709_v61  ;;  %v4430_v61 = vld [vmem:[%s6519_s5] ss:$0 sm:$0xff] }
 0x213   :  { %1748 = vmatpush.bf16.msra.mxu1 %v3713_v16  ;;  %v4305_v16 = vld [vmem:[%s6514_s2 + $0x28] sm:$0xf0] }
 0x214   :  { %v4471_v55 = vpop.eup %4470  ;;  %v3657_v20 = vor.u32 %v4305_v16, %v3656_v15 }
 0x215   :  { %v1042_v58 = vmul.f32 %v4471_v55, %v1040_v53  ;;  %v3681_v53 = vor.u32 %v4311_v49, %v3680_v48  ;;  %v4294_v55 = vld [vmem:[%s6516_s4 + $0x10] sm:$0xff] }
 0x216   :  { %1735 = vmatpush.bf16.msra.mxu0 %v3697_v7  ;;  %1502 = vmatpush.bf16.msrb.mxu3 %v4294_v55 }
 0x217   :  { %v5412_v60 = vadd.f32 %v1044_v57, %v1042_v58  ;;  %1749 = vmatpush.bf16.msra.mxu1 %v3701_v26  ;;  %v4307_v57 = vld [vmem:[%s6514_s2 + $0x38] sm:$0xf0]  ;;  %1765 = vmatpush.bf16.msra.mxu2 %v3681_v53  ;;  %v3644_v26 = vld [vmem:[%s6514_s2 + $0x8] sm:$0xf] }
 0x218   :  { %v3661_v58 = vor.u32 %v4307_v57, %v3660_v56  ;;  %v3645_v35 = vor.u32 %v4302_v27, %v3644_v26  ;;  %v3856_v26 = vld [vmem:[%s6514_s2 + $0xa8] sm:$0xf]  ;;  %v4331_v27 = vld [vmem:[%s6516_s4 + $0x38] sm:$0xff] }
 0x219   :  { %v1047_v50 = vpack.c.bf16 %v5412_v60, %v5410_v59 }
 0x21a   :  { %1736 = vmatpush.bf16.msra.mxu0 %v3685_v34  ;;  %1503 = vmatpush.bf16.msrb.mxu3 %v4293_v2  ;;  %v3641_v34 = vor.u32 %v4300_v6, %v3638_v25 }
 0x21b   :  { %1124 = vmatmul.bf16.vlgmr.msra.gmra.mxu3 %v1047_v50  ;;  %1360 = vmatmul.bf16.vlgmr.msrb.gmra.mxu0 %v1047_v50 }
 0x21c   :  { %1374 = vmatmul.bf16.vlgmr.msrb.gmra.mxu1 %v1047_v50  ;;  %1388 = vmatmul.bf16.vlgmr.msrb.gmra.mxu2 %v1047_v50  ;;  %v4306_v50 = vld [vmem:[%s6514_s2 + $0x34] sm:$0xf] }
 0x21d   :  { %1750 = vmatpush.bf16.msra.mxu1 %v3689_v39  ;;  %v3665_v0 = vor.u32 %v4306_v50, %v3662_v62  ;;  %1766 = vmatpush.bf16.msra.mxu2 %v3669_v8  ;;  %v3495_v39 = vld [vmem:[%s6518_s0 + $0xa8] sm:$0xff] }
 0x21e   :  { %1737 = vmatpush.bf16.msra.mxu0 %v3673_v45  ;;  %1504 = vmatpush.bf16.msrb.mxu3 %v4292_v31  ;;  %v3864_v31 = vld [vmem:[%s6514_s2 + $0xb0] sm:$0xf] }
 0x221   :  { %1751 = vmatpush.bf16.msra.mxu1 %v3677_v47  ;;  %1767 = vmatpush.bf16.msra.mxu2 %v3657_v20  ;;  %v1220_v47 = vperm.slane %v5503_v21, 2  ;;  %v3494_v21 = vld [vmem:[%s6518_s0 + $0xa0] sm:$0xff] }
 0x222   :  { %1738 = vmatpush.bf16.msra.mxu0 %v3661_v58  ;;  %1878 = vmatpush.bf16.msra.mxu3 %v4331_v27  ;;  %v3804_v27 = vld [vmem:[%s6514_s2 + $0x38] sm:$0xf] }
 0x225   :  { %1752 = vmatpush.bf16.msra.mxu1 %v3665_v0  ;;  %1768 = vmatpush.bf16.msra.mxu2 %v3645_v35  ;;  %v3844_v35 = vld [vmem:[%s6514_s2 + $0x90] sm:$0xf] }
 0x226   :  { %1739 = vmatpush.bf16.msra.mxu0 %v3649_v14 }
 0x229   :  { %1753 = vmatpush.bf16.msra.mxu1 %v3653_v19 }
 0x22a   :  { %1740 = vmatpush.bf16.msra.mxu0 %v3637_v33 }
 0x22d   :  { %1754 = vmatpush.bf16.msra.mxu1 %v3641_v34 }
 0x298   :  { %v1361_v38 = vpop.f32.mrf.mxu0 }
 0x299   :  { %v1362_v4 = vadd.f32 %v1361_v38, %v1218_v51  ;;  %v1375_v5 = vpop.f32.mrf.mxu1 }
 0x29a   :  { %v1376_v7 = vadd.f32 %v1375_v5, %v1219_v63  ;;  %v3497_v5 = vld [vmem:[%s6518_s0 + $0xb8] sm:$0xff] }
 0x29b   :  { %v1394_v18 = vadd.f32 %v3492_v54, %v1362_v4 }
 0x29c   :  { %v1404_v36 = vadd.f32 %v3493_v29, %v1376_v7  ;;  %v3858_v29 = vld [vmem:[%s6514_s2 + $0xb4] sm:$0xf0] }
 0x29d   :  { %v1396_v28 = vmul.f32 0.5, %v1394_v18 }
 0x29e   :  { %v1125_v32 = vpop.f32.mrf.mxu3  ;;  %v1406_v46 = vmul.f32 0.5, %v1404_v36  ;;  %v4351_v36 = vld [vmem:[%s6514_s2 + $0x98] sm:$0xf0] }
 0x29f   :  { %4472 = vtanh.f32 %v1396_v28  ;;  %v5600_v17 = vadd.f32 %v4430_v61, %v1125_v32  ;;  %v1389_v44 = vpop.f32.mrf.mxu2  ;;  %v4355_v32 = vld [vmem:[%s6514_s2 + $0xb8] sm:$0xf0] }
 0x2a0   :  { %v1363_v40 = vpop.f32.mrf.mxu0  ;;  %v1390_v57 = vadd.f32 %v1389_v44, %v1220_v47  ;;  %v3865_v34 = vor.u32 %v4355_v32, %v3864_v31  ;;  %v4352_v44 = vld [vmem:[%s6514_s2 + $0xa0] sm:$0xf0] }
 0x2a1   :  { %v1364_v22 = vadd.f32 %v1363_v40, %v1218_v51  ;;  %v1377_v42 = vpop.f32.mrf.mxu1  ;;  %1130 = vmax.xlane.f32.xlu2 %v5600_v17  ;;  %v4330_v40 = vld [vmem:[%s6516_s4 + $0x30] sm:$0xff]  ;;  %v4340_v32 = vld [vmem:[%s6514_s2 + $0x40] sm:$0xf0] }
 0x2a2   :  { %v1378_v43 = vadd.f32 %v1377_v42, %v1219_v63  ;;  %2142 = vmatpush.bf16.msrb.mxu2 %v3865_v34  ;;  %v3852_v42 = vld [vmem:[%s6514_s2 + $0x98] sm:$0xf]  ;;  %1879 = vmatpush.bf16.msra.mxu3 %v4330_v40  ;;  %v4336_v40 = vld [vmem:[%s6514_s2 + $0x20] sm:$0xf0] }
 0x2a3   :  { %v1395_v45 = vadd.f32 %v3495_v39, %v1364_v22  ;;  %v4350_v39 = vld [vmem:[%s6514_s2 + $0x94] sm:$0xf]  ;;  %v3845_v22 = vor.u32 %v4351_v36, %v3844_v35  ;;  %v3784_v34 = vld [vmem:[%s6514_s2 + $0x18] sm:$0xf] }
 0x2a4   :  { %v1405_v48 = vadd.f32 %v3496_v41, %v1378_v43  ;;  %v3846_v41 = vld [vmem:[%s6514_s2 + $0x9c] sm:$0xf0] }
 0x2a5   :  { %v4473_v49 = vpop.eup %4472  ;;  %v1397_v51 = vmul.f32 0.5, %v1395_v45  ;;  %v3849_v43 = vor.u32 %v4350_v39, %v3846_v41  ;;  %v3853_v45 = vor.u32 %v4352_v44, %v3852_v42  ;;  %v3805_v39 = vor.u32 %v4340_v32, %v3804_v27  ;;  %v3786_v41 = vld [vmem:[%s6514_s2 + $0x24] sm:$0xf0]  ;;  %v4431_v42 = vld [vmem:[%s6519_s5] ss:$0 sm:$0xff] }
 0x2a6   :  { %v1400_v53 = vadd.f32 1.0, %v4473_v49  ;;  %v1407_v54 = vmul.f32 0.5, %v1405_v48  ;;  %v1127_v55 = vpop.f32.mrf.mxu3  ;;  %v4347_v48 = vld [vmem:[%s6514_s2 + $0x7c] sm:$0xf]  ;;  %v4329_v49 = vld [vmem:[%s6516_s4 + $0x28] sm:$0xff] }
 0x2a7   :  { %4474 = vtanh.f32 %v1397_v51  ;;  %v5610_v56 = vadd.f32 %v4430_v61, %v1127_v55  ;;  %v1391_v37 = vpop.f32.mrf.mxu2  ;;  %2143 = vmatpush.bf16.msrb.mxu2 %v3853_v45  ;;  %v3840_v55 = vld [vmem:[%s6514_s2 + $0x80] sm:$0xf]  ;;  %1880 = vmatpush.bf16.msra.mxu3 %v4329_v49  ;;  %v4337_v45 = vld [vmem:[%s6514_s2 + $0x28] sm:$0xf0] }
 0x2a8   :  { %4476 = vtanh.f32 %v1406_v46  ;;  %v1402_v58 = vmul.f32 0.5, %v1400_v53  ;;  %v1392_v2 = vadd.f32 %v1391_v37, %v1220_v47  ;;  %v3832_v46 = vld [vmem:[%s6514_s2 + $0x78] sm:$0xf]  ;;  %v4348_v47 = vld [vmem:[%s6514_s2 + $0x80] sm:$0xf0] }
 0x2a9   :  { %1132 = vmax.xlane.f32.xlu2 %v5610_v56  ;;  %4478 = vtanh.f32 %v1407_v54  ;;  %v3833_v51 = vor.u32 %v4348_v47, %v3832_v46  ;;  %v3834_v53 = vld [vmem:[%s6514_s2 + $0x84] sm:$0xf0]  ;;  %v4328_v37 = vld [vmem:[%s6516_s4 + $0x20] sm:$0xff] }
 0x2aa   :  { %v1414_v50 = vmul.f32 %v1402_v58, %v1390_v57  ;;  %v3837_v54 = vor.u32 %v4347_v48, %v3834_v53  ;;  %v4349_v57 = vld [vmem:[%s6514_s2 + $0x88] sm:$0xf0]  ;;  %v3792_v44 = vld [vmem:[%s6514_s2 + $0x20] sm:$0xf]  ;;  %v4332_v53 = vld [vmem:[%s6514_s2 + $0x4] sm:$0xf] }
 0x2ab   :  { %v3841_v58 = vor.u32 %v4349_v57, %v3840_v55  ;;  %1881 = vmatpush.bf16.msra.mxu3 %v4328_v37  ;;  %v3793_v48 = vor.u32 %v4337_v45, %v3792_v44  ;;  %v3772_v49 = vld [vmem:[%s6514_s2] sm:$0xf]  ;;  %v3774_v55 = vld [vmem:[%s6514_s2 + $0xc] sm:$0xf0]  ;;  %v3780_v57 = vld [vmem:[%s6514_s2 + $0x8] sm:$0xf] }
 0x2ac   :  { %v1416_v63 = vadd.f32 %v3494_v21, %v1414_v50  ;;  %v3820_v50 = vld [vmem:[%s6514_s2 + $0x60] sm:$0xf]  ;;  %v4345_v21 = vld [vmem:[%s6514_s2 + $0x68] sm:$0xf0] }
 0x2ad   :  { %v4475_v62 = vpop.eup %4474  ;;  %2144 = vmatpush.bf16.msrb.mxu2 %v3841_v58  ;;  %v4334_v58 = vld [vmem:[%s6514_s2 + $0x10] sm:$0xf0] }
 0x2ae   :  { %v4477_v38 = vpop.eup %4476  ;;  %v1401_v0 = vadd.f32 1.0, %v4475_v62  ;;  %4480 = vtanh.f32 %v1416_v63  ;;  %v4344_v62 = vld [vmem:[%s6514_s2 + $0x64] sm:$0xf]  ;;  %v3822_v63 = vld [vmem:[%s6514_s2 + $0x6c] sm:$0xf0] }
 0x2af   :  { %v4479_v1 = vpop.eup %4478  ;;  %v1410_v4 = vadd.f32 1.0, %v4477_v38  ;;  %v3821_v38 = vor.u32 %v4345_v21, %v3820_v50  ;;  %v3629_v21 = vld [vmem:[%s6518_s0 + $0xc8] sm:$0xff] }
 0x2b0   :  { %v1403_v3 = vmul.f32 0.5, %v1401_v0  ;;  %v1411_v11 = vadd.f32 1.0, %v4479_v1  ;;  %v3828_v0 = vld [vmem:[%s6514_s2 + $0x68] sm:$0xf]  ;;  %v3825_v1 = vor.u32 %v4344_v62, %v3822_v63  ;;  %v4324_v62 = vld [vmem:[%s6516_s4] sm:$0xff] }
 0x2b1   :  { %v1412_v13 = vmul.f32 0.5, %v1410_v4 }
 0x2b2   :  { %v1415_v8 = vmul.f32 %v1403_v3, %v1392_v2  ;;  %v1413_v61 = vmul.f32 0.5, %v1411_v11  ;;  %v4346_v2 = vld [vmem:[%s6514_s2 + $0x70] sm:$0xf0]  ;;  %v5714_v3 = vld [vmem:[%s6517_s3] sm:$0x7] }
 0x2b3   :  { %v1420_v15 = vsub.f32 1.0, %v1412_v13  ;;  %v1424_v20 = vmul.f32 %v1412_v13, %v5410_v59  ;;  %v4354_v59 = vld [vmem:[%s6514_s2 + $0xb0] sm:$0xf0]  ;;  %v3829_v4 = vor.u32 %v4346_v2, %v3828_v0  ;;  %v4341_v11 = vld [vmem:[%s6514_s2 + $0x4c] sm:$0xf]  ;;  %v3777_v0 = vor.u32 %v4332_v53, %v3774_v55 }
 0x2b4   :  { %v1417_v12 = vadd.f32 %v3497_v5, %v1415_v8  ;;  %v4481_v14 = vpop.eup %4480  ;;  %v1421_v16 = vsub.f32 1.0, %v1413_v61  ;;  %v1425_v23 = vmul.f32 %v1413_v61, %v5412_v60  ;;  %v4353_v60 = vld [vmem:[%s6514_s2 + $0xac] sm:$0xf]  ;;  %v3857_v28 = vor.u32 %v4354_v59, %v3856_v26  ;;  %v3808_v5 = vld [vmem:[%s6514_s2 + $0x48] sm:$0xf] }
 0x2b5   :  { %v1422_v18 = vmul.f32 %v4481_v14, %v1420_v15  ;;  %v3861_v33 = vor.u32 %v4353_v60, %v3858_v29  ;;  %v4342_v8 = vld [vmem:[%s6514_s2 + $0x50] sm:$0xf0]  ;;  %2145 = vmatpush.bf16.msrb.mxu2 %v3829_v4  ;;  %v3810_v61 = vld [vmem:[%s6514_s2 + $0x54] sm:$0xf0]  ;;  %v3816_v15 = vld [vmem:[%s6514_s2 + $0x50] sm:$0xf] }
 0x2b6   :  { %4482 = vtanh.f32 %v1417_v12  ;;  %2114 = vmatpush.bf16.msrb.mxu0 %v3857_v28  ;;  %v4327_v12 = vld [vmem:[%s6516_s4 + $0x18] sm:$0xff]  ;;  %v3809_v13 = vor.u32 %v4342_v8, %v3808_v5  ;;  %v3813_v14 = vor.u32 %v4341_v11, %v3810_v61  ;;  %v4338_v59 = vld [vmem:[%s6514_s2 + $0x34] sm:$0xf]  ;;  %v3798_v60 = vld [vmem:[%s6514_s2 + $0x3c] sm:$0xf0]  ;;  %v1600_v29 = vperm.slane %v5714_v3, 1 }
 0x2b7   :  { %v5621_v6 = vadd.f32 %v1424_v20, %v1422_v18  ;;  %2128 = vmatpush.bf16.msrb.mxu1 %v3861_v33  ;;  %v1599_v18 = vperm.slane %v5714_v3, 0  ;;  %1882 = vmatpush.bf16.msra.mxu3 %v4327_v12  ;;  %v3628_v20 = vld [vmem:[%s6518_s0 + $0xc0] sm:$0xff]  ;;  %v3801_v31 = vor.u32 %v4338_v59, %v3798_v60  ;;  %v4325_v33 = vld [vmem:[%s6516_s4 + $0x8] sm:$0xff]  ;;  %v3631_v4 = vld [vmem:[%s6518_s0 + $0xd8] sm:$0xff] }
 0x2b8   :  { %v3632_v11 = vld [vmem:[%s6518_s0 + $0xe0] sm:$0xff] }
 0x2ba   :  { %2115 = vmatpush.bf16.msrb.mxu0 %v3845_v22  ;;  %v4335_v22 = vld [vmem:[%s6514_s2 + $0x1c] sm:$0xf] }
 0x2bb   :  { %2129 = vmatpush.bf16.msrb.mxu1 %v3849_v43  ;;  %v3785_v43 = vor.u32 %v4336_v40, %v3784_v34  ;;  %v3789_v47 = vor.u32 %v4335_v22, %v3786_v41  ;;  %v3633_v40 = vld [vmem:[%s6518_s0 + $0xe8] sm:$0xff] }
 0x2bc   :  { %v4483_v19 = vpop.eup %4482 }
 0x2bd   :  { %v1423_v24 = vmul.f32 %v4483_v19, %v1421_v16  ;;  %v4343_v16 = vld [vmem:[%s6514_s2 + $0x58] sm:$0xf0] }
 0x2be   :  { %2116 = vmatpush.bf16.msrb.mxu0 %v3833_v51  ;;  %v3817_v19 = vor.u32 %v4343_v16, %v3816_v15  ;;  %v4333_v51 = vld [vmem:[%s6514_s2 + $0x8] sm:$0xf0]  ;;  %v1601_v16 = vperm.slane %v5714_v3, 2  ;;  %v3630_v3 = vld [vmem:[%s6518_s0 + $0xd0] sm:$0xff] }
 0x2bf   :  { %v5623_v7 = vadd.f32 %v1425_v23, %v1423_v24  ;;  %2130 = vmatpush.bf16.msrb.mxu1 %v3837_v54  ;;  %v4326_v23 = vld [vmem:[%s6516_s4 + $0x10] sm:$0xff] }
 0x2c0   :  { %v3796_v24 = vld [vmem:[%s6514_s2 + $0x30] sm:$0xf]  ;;  %2146 = vmatpush.bf16.msrb.mxu2 %v3817_v19  ;;  %1883 = vmatpush.bf16.msra.mxu3 %v4326_v23 }
 0x2c1   :  { %v1428_v25 = vpack.c.bf16 %v5623_v7, %v5621_v6 }
 0x2c2   :  { %2117 = vmatpush.bf16.msrb.mxu0 %v3821_v38  ;;  %v3773_v38 = vor.u32 %v4333_v51, %v3772_v49 }
 0x2c3   :  { %1505 = vmatmul.bf16.vlgmr.msrb.gmra.mxu3 %v1428_v25  ;;  %1741 = vmatmul.bf16.vlgmr.msra.gmra.mxu0 %v1428_v25 }
 0x2c4   :  { %1755 = vmatmul.bf16.vlgmr.msra.gmra.mxu1 %v1428_v25  ;;  %1769 = vmatmul.bf16.vlgmr.msra.gmra.mxu2 %v1428_v25  ;;  %v4339_v25 = vld [vmem:[%s6514_s2 + $0x38] sm:$0xf0] }
 0x2c5   :  { %2131 = vmatpush.bf16.msrb.mxu1 %v3825_v1  ;;  %v3797_v26 = vor.u32 %v4339_v25, %v3796_v24  ;;  %2147 = vmatpush.bf16.msrb.mxu2 %v3805_v39  ;;  %v3781_v1 = vor.u32 %v4334_v58, %v3780_v57 }
 0x2c6   :  { %2118 = vmatpush.bf16.msrb.mxu0 %v3809_v13  ;;  %1884 = vmatpush.bf16.msra.mxu3 %v4325_v33 }
 0x2c9   :  { %2132 = vmatpush.bf16.msrb.mxu1 %v3813_v14  ;;  %2148 = vmatpush.bf16.msrb.mxu2 %v3793_v48 }
 0x2ca   :  { %2119 = vmatpush.bf16.msrb.mxu0 %v3797_v26  ;;  %1885 = vmatpush.bf16.msra.mxu3 %v4324_v62 }
 0x2cd   :  { %2133 = vmatpush.bf16.msrb.mxu1 %v3801_v31  ;;  %2149 = vmatpush.bf16.msrb.mxu2 %v3781_v1 }
 0x2ce   :  { %2120 = vmatpush.bf16.msrb.mxu0 %v3785_v43 }
 0x2d1   :  { %2134 = vmatpush.bf16.msrb.mxu1 %v3789_v47 }
 0x2d2   :  { %2121 = vmatpush.bf16.msrb.mxu0 %v3773_v38  ;;  %v4000_v38 = vld [vmem:[%s6514_s2 + $0xb0] sm:$0xf] }
 0x2d5   :  { %2135 = vmatpush.bf16.msrb.mxu1 %v3777_v0  ;;  %v4387_v0 = vld [vmem:[%s6514_s2 + $0xb8] sm:$0xf0] }
 0x340   :  { %v1742_v28 = vpop.f32.mrf.mxu0 }
 0x341   :  { %v1743_v35 = vadd.f32 %v1742_v28, %v1599_v18  ;;  %v1756_v36 = vpop.f32.mrf.mxu1 }
 0x342   :  { %v1757_v54 = vadd.f32 %v1756_v36, %v1600_v29 }
 0x343   :  { %v1775_v46 = vadd.f32 %v3628_v20, %v1743_v35 }
 0x344   :  { %v1785_v2 = vadd.f32 %v3629_v21, %v1757_v54  ;;  %v4363_v21 = vld [vmem:[%s6516_s4 + $0x38] sm:$0xff] }
 0x345   :  { %v1777_v50 = vmul.f32 0.5, %v1775_v46  ;;  %2259 = vmatpush.bf16.msrb.mxu3 %v4363_v21  ;;  %v4370_v21 = vld [vmem:[%s6514_s2 + $0x34] sm:$0xf] }
 0x346   :  { %v1506_v37 = vpop.f32.mrf.mxu3  ;;  %v1787_v15 = vmul.f32 0.5, %v1785_v2  ;;  %v4001_v2 = vor.u32 %v4387_v0, %v4000_v38 }
 0x347   :  { %4484 = vtanh.f32 %v1777_v50  ;;  %v5811_v63 = vadd.f32 %v4431_v42, %v1506_v37  ;;  %v1770_v61 = vpop.f32.mrf.mxu2  ;;  %v3992_v50 = vld [vmem:[%s6514_s2 + $0xa8] sm:$0xf]  ;;  %v3994_v37 = vld [vmem:[%s6514_s2 + $0xb4] sm:$0xf0] }
 0x348   :  { %v1744_v5 = vpop.f32.mrf.mxu0  ;;  %v1771_v59 = vadd.f32 %v1770_v61, %v1601_v16  ;;  %2523 = vmatpush.bf16.msra.mxu2 %v4001_v2  ;;  %v3988_v61 = vld [vmem:[%s6514_s2 + $0x98] sm:$0xf]  ;;  %v4372_v2 = vld [vmem:[%s6514_s2 + $0x40] sm:$0xf0] }
 0x349   :  { %v1745_v8 = vadd.f32 %v1744_v5, %v1599_v18  ;;  %v1758_v12 = vpop.f32.mrf.mxu1  ;;  %1511 = vmax.xlane.f32.xlu0 %v5811_v63  ;;  %v4383_v5 = vld [vmem:[%s6514_s2 + $0x98] sm:$0xf0] }
 0x34a   :  { %v1759_v13 = vadd.f32 %v1758_v12, %v1600_v29 }
 0x34b   :  { %v1776_v14 = vadd.f32 %v3631_v4, %v1745_v8  ;;  %v3980_v4 = vld [vmem:[%s6514_s2 + $0x90] sm:$0xf]  ;;  %v4382_v8 = vld [vmem:[%s6514_s2 + $0x94] sm:$0xf] }
 0x34c   :  { %v1786_v19 = vadd.f32 %v3632_v11, %v1759_v13  ;;  %v4362_v11 = vld [vmem:[%s6516_s4 + $0x30] sm:$0xff]  ;;  %v3981_v12 = vor.u32 %v4383_v5, %v3980_v4  ;;  %v3982_v13 = vld [vmem:[%s6514_s2 + $0x9c] sm:$0xf0]  ;;  %v4357_v4 = vld [vmem:[%s6516_s4 + $0x8] sm:$0xff] }
 0x34d   :  { %v4485_v20 = vpop.eup %4484  ;;  %v1778_v18 = vmul.f32 0.5, %v1776_v14  ;;  %v3985_v14 = vor.u32 %v4382_v8, %v3982_v13  ;;  %2260 = vmatpush.bf16.msrb.mxu3 %v4362_v11  ;;  %v3920_v5 = vld [vmem:[%s6514_s2 + $0x18] sm:$0xf]  ;;  %v4368_v13 = vld [vmem:[%s6514_s2 + $0x20] sm:$0xf0] }
 0x34e   :  { %v1781_v23 = vadd.f32 1.0, %v4485_v20  ;;  %v1788_v24 = vmul.f32 0.5, %v1786_v19  ;;  %v1508_v25 = vpop.f32.mrf.mxu3  ;;  %v3968_v19 = vld [vmem:[%s6514_s2 + $0x78] sm:$0xf]  ;;  %v4380_v20 = vld [vmem:[%s6514_s2 + $0x80] sm:$0xf0] }
 0x34f   :  { %4486 = vtanh.f32 %v1778_v18  ;;  %v5821_v26 = vadd.f32 %v4431_v42, %v1508_v25  ;;  %v1772_v29 = vpop.f32.mrf.mxu2  ;;  %v4379_v18 = vld [vmem:[%s6514_s2 + $0x7c] sm:$0xf]  ;;  %v3970_v25 = vld [vmem:[%s6514_s2 + $0x84] sm:$0xf0] }
 0x350   :  { %4488 = vtanh.f32 %v1787_v15  ;;  %v1783_v60 = vmul.f32 0.5, %v1781_v23  ;;  %v1773_v35 = vadd.f32 %v1772_v29, %v1601_v16  ;;  %v4384_v15 = vld [vmem:[%s6514_s2 + $0xa0] sm:$0xf0]  ;;  %v4361_v23 = vld [vmem:[%s6516_s4 + $0x28] sm:$0xff] }
 0x351   :  { %1513 = vmax.xlane.f32.xlu1 %v5821_v26  ;;  %4490 = vtanh.f32 %v1788_v24  ;;  %v3989_v16 = vor.u32 %v4384_v15, %v3988_v61  ;;  %v3969_v24 = vor.u32 %v4380_v20, %v3968_v19  ;;  %2261 = vmatpush.bf16.msrb.mxu3 %v4361_v23  ;;  %v4377_v29 = vld [vmem:[%s6514_s2 + $0x68] sm:$0xf0]  ;;  %v4367_v61 = vld [vmem:[%s6514_s2 + $0x1c] sm:$0xf]  ;;  %v4432_v15 = vld [vmem:[%s6519_s5] ss:$0 sm:$0xff] }
 0x352   :  { %v1795_v27 = vmul.f32 %v1783_v60, %v1771_v59  ;;  %v3973_v59 = vor.u32 %v4379_v18, %v3970_v25  ;;  %v3976_v60 = vld [vmem:[%s6514_s2 + $0x80] sm:$0xf]  ;;  %v4369_v20 = vld [vmem:[%s6514_s2 + $0x28] sm:$0xf0] }
 0x353   :  { %2524 = vmatpush.bf16.msra.mxu2 %v3989_v16  ;;  %v3921_v16 = vor.u32 %v4368_v13, %v3920_v5  ;;  %v3928_v19 = vld [vmem:[%s6514_s2 + $0x20] sm:$0xf] }
 0x354   :  { %v1797_v32 = vadd.f32 %v3630_v3, %v1795_v27  ;;  %v4381_v27 = vld [vmem:[%s6514_s2 + $0x88] sm:$0xf0]  ;;  %v3908_v25 = vld [vmem:[%s6514_s2] sm:$0xf] }
 0x355   :  { %v4487_v28 = vpop.eup %4486  ;;  %v3977_v3 = vor.u32 %v4381_v27, %v3976_v60  ;;  %v4364_v60 = vld [vmem:[%s6514_s2 + $0x4] sm:$0xf] }
 0x356   :  { %v4489_v31 = vpop.eup %4488  ;;  %v1782_v33 = vadd.f32 1.0, %v4487_v28  ;;  %4492 = vtanh.f32 %v1797_v32  ;;  %v3956_v28 = vld [vmem:[%s6514_s2 + $0x60] sm:$0xf] }
 0x357   :  { %v4491_v34 = vpop.eup %4490  ;;  %v1791_v39 = vadd.f32 1.0, %v4489_v31  ;;  %v4376_v31 = vld [vmem:[%s6514_s2 + $0x64] sm:$0xf]  ;;  %2525 = vmatpush.bf16.msra.mxu2 %v3977_v3  ;;  %v3910_v3 = vld [vmem:[%s6514_s2 + $0xc] sm:$0xf0] }
 0x358   :  { %v1784_v36 = vmul.f32 0.5, %v1782_v33  ;;  %v1792_v41 = vadd.f32 1.0, %v4491_v34  ;;  %v4360_v32 = vld [vmem:[%s6516_s4 + $0x20] sm:$0xff]  ;;  %v3957_v33 = vor.u32 %v4377_v29, %v3956_v28  ;;  %v3958_v34 = vld [vmem:[%s6514_s2 + $0x6c] sm:$0xf0] }
 0x359   :  { %v1793_v43 = vmul.f32 0.5, %v1791_v39  ;;  %v4378_v39 = vld [vmem:[%s6514_s2 + $0x70] sm:$0xf0]  ;;  %2262 = vmatpush.bf16.msrb.mxu3 %v4360_v32  ;;  %v3916_v28 = vld [vmem:[%s6514_s2 + $0x8] sm:$0xf]  ;;  %v3765_v32 = vld [vmem:[%s6518_s0 + $0xf8] sm:$0xff] }
 0x35a   :  { %v1796_v22 = vmul.f32 %v1784_v36, %v1773_v35  ;;  %v1794_v44 = vmul.f32 0.5, %v1792_v41  ;;  %v3964_v35 = vld [vmem:[%s6514_s2 + $0x68] sm:$0xf]  ;;  %v3961_v36 = vor.u32 %v4376_v31, %v3958_v34  ;;  %v4366_v29 = vld [vmem:[%s6514_s2 + $0x10] sm:$0xf0] }
 0x35b   :  { %v1801_v46 = vsub.f32 1.0, %v1793_v43  ;;  %v1805_v51 = vmul.f32 %v1793_v43, %v5621_v6  ;;  %v4386_v6 = vld [vmem:[%s6514_s2 + $0xb0] sm:$0xf0]  ;;  %v3944_v41 = vld [vmem:[%s6514_s2 + $0x48] sm:$0xf] }
 0x35c   :  { %v1798_v42 = vadd.f32 %v3633_v40, %v1796_v22  ;;  %v4493_v45 = vpop.eup %4492  ;;  %v1802_v47 = vsub.f32 1.0, %v1794_v44  ;;  %v1806_v53 = vmul.f32 %v1794_v44, %v5623_v7  ;;  %v4385_v7 = vld [vmem:[%s6514_s2 + $0xac] sm:$0xf]  ;;  %v3993_v62 = vor.u32 %v4386_v6, %v3992_v50  ;;  %v5925_v40 = vld [vmem:[%s6517_s3] sm:$0x7]  ;;  %v4359_v44 = vld [vmem:[%s6516_s4 + $0x18] sm:$0xff] }
 0x35d   :  { %v1803_v48 = vmul.f32 %v4493_v45, %v1801_v46  ;;  %v3997_v1 = vor.u32 %v4385_v7, %v3994_v37  ;;  %v3965_v22 = vor.u32 %v4378_v39, %v3964_v35  ;;  %v4373_v43 = vld [vmem:[%s6514_s2 + $0x4c] sm:$0xf]  ;;  %v3946_v46 = vld [vmem:[%s6514_s2 + $0x54] sm:$0xf0]  ;;  %2263 = vmatpush.bf16.msrb.mxu3 %v4359_v44  ;;  %v3932_v50 = vld [vmem:[%s6514_s2 + $0x30] sm:$0xf]  ;;  %v3913_v39 = vor.u32 %v4364_v60, %v3910_v3 }
 0x35e   :  { %4494 = vtanh.f32 %v1798_v42  ;;  %2495 = vmatpush.bf16.msra.mxu0 %v3993_v62  ;;  %v4374_v42 = vld [vmem:[%s6514_s2 + $0x50] sm:$0xf0]  ;;  %v4371_v6 = vld [vmem:[%s6514_s2 + $0x38] sm:$0xf0]  ;;  %v3934_v62 = vld [vmem:[%s6514_s2 + $0x3c] sm:$0xf0] }
 0x35f   :  { %v5832_v55 = vadd.f32 %v1805_v51, %v1803_v48  ;;  %2509 = vmatpush.bf16.msra.mxu1 %v3997_v1  ;;  %2526 = vmatpush.bf16.msra.mxu2 %v3965_v22  ;;  %v3945_v45 = vor.u32 %v4374_v42, %v3944_v41  ;;  %v3952_v48 = vld [vmem:[%s6514_s2 + $0x50] sm:$0xf]  ;;  %v1980_v51 = vperm.slane %v5925_v40, 0  ;;  %v3933_v7 = vor.u32 %v4371_v6, %v3932_v50  ;;  %v3940_v37 = vld [vmem:[%s6514_s2 + $0x38] sm:$0xf]  ;;  %v3767_v42 = vld [vmem:[%s6518_s0 + $0x108] sm:$0xff] }
 0x360   :  { %v1981_v0 = vperm.slane %v5925_v40, 1  ;;  %v3937_v1 = vor.u32 %v4370_v21, %v3934_v62  ;;  %v3917_v22 = vor.u32 %v4366_v29, %v3916_v28 }
 0x362   :  { %2496 = vmatpush.bf16.msra.mxu0 %v3981_v12  ;;  %v3941_v12 = vor.u32 %v4372_v2, %v3940_v37 }
 0x363   :  { %2510 = vmatpush.bf16.msra.mxu1 %v3985_v14  ;;  %v3922_v14 = vld [vmem:[%s6514_s2 + $0x24] sm:$0xf0] }
 0x364   :  { %v4495_v49 = vpop.eup %4494  ;;  %v3925_v23 = vor.u32 %v4367_v61, %v3922_v14  ;;  %v3769_v14 = vld [vmem:[%s6518_s0 + $0x118] sm:$0xff] }
 0x365   :  { %v1804_v54 = vmul.f32 %v4495_v49, %v1802_v47  ;;  %v3949_v47 = vor.u32 %v4373_v43, %v3946_v46  ;;  %v4375_v49 = vld [vmem:[%s6514_s2 + $0x58] sm:$0xf0] }
 0x366   :  { %2497 = vmatpush.bf16.msra.mxu0 %v3969_v24  ;;  %v3929_v24 = vor.u32 %v4369_v20, %v3928_v19 }
 0x367   :  { %v5834_v57 = vadd.f32 %v1806_v53, %v1804_v54  ;;  %2511 = vmatpush.bf16.msra.mxu1 %v3973_v59  ;;  %v3953_v53 = vor.u32 %v4375_v49, %v3952_v48  ;;  %v3764_v54 = vld [vmem:[%s6518_s0 + $0xf0] sm:$0xff]  ;;  %v4365_v59 = vld [vmem:[%s6514_s2 + $0x8] sm:$0xf0] }
 0x368   :  { %v3909_v35 = vor.u32 %v4365_v59, %v3908_v25 }
 0x369   :  { %v1809_v58 = vpack.c.bf16 %v5834_v57, %v5832_v55  ;;  %2527 = vmatpush.bf16.msra.mxu2 %v3953_v53 }
 0x36a   :  { %2498 = vmatpush.bf16.msra.mxu0 %v3957_v33  ;;  %v4356_v33 = vld [vmem:[%s6516_s4] sm:$0xff] }
 0x36b   :  { %1886 = vmatmul.bf16.vlgmr.msra.gmra.mxu3 %v1809_v58  ;;  %2122 = vmatmul.bf16.vlgmr.msrb.gmra.mxu0 %v1809_v58 }
 0x36c   :  { %2136 = vmatmul.bf16.vlgmr.msrb.gmra.mxu1 %v1809_v58  ;;  %2150 = vmatmul.bf16.vlgmr.msrb.gmra.mxu2 %v1809_v58  ;;  %v4358_v58 = vld [vmem:[%s6516_s4 + $0x10] sm:$0xff] }
 0x36d   :  { %2512 = vmatpush.bf16.msra.mxu1 %v3961_v36  ;;  %2264 = vmatpush.bf16.msrb.mxu3 %v4358_v58 }
 0x36e   :  { %2499 = vmatpush.bf16.msra.mxu0 %v3945_v45  ;;  %2528 = vmatpush.bf16.msra.mxu2 %v3941_v12  ;;  %v3768_v45 = vld [vmem:[%s6518_s0 + $0x110] sm:$0xff] }
 0x371   :  { %2513 = vmatpush.bf16.msra.mxu1 %v3949_v47  ;;  %2265 = vmatpush.bf16.msrb.mxu3 %v4357_v4 }
 0x372   :  { %2500 = vmatpush.bf16.msra.mxu0 %v3933_v7  ;;  %2529 = vmatpush.bf16.msra.mxu2 %v3929_v24 }
 0x375   :  { %2514 = vmatpush.bf16.msra.mxu1 %v3937_v1  ;;  %2266 = vmatpush.bf16.msrb.mxu3 %v4356_v33  ;;  %v4128_v33 = vld [vmem:[%s6514_s2 + $0xa8] sm:$0xf] }
 0x376   :  { %2501 = vmatpush.bf16.msra.mxu0 %v3921_v16  ;;  %2530 = vmatpush.bf16.msra.mxu2 %v3917_v22  ;;  %v4136_v22 = vld [vmem:[%s6514_s2 + $0xb0] sm:$0xf] }
 0x379   :  { %2515 = vmatpush.bf16.msra.mxu1 %v3925_v23 }
 0x37a   :  { %2502 = vmatpush.bf16.msra.mxu0 %v3909_v35 }
 0x37d   :  { %2516 = vmatpush.bf16.msra.mxu1 %v3913_v39  ;;  %v4130_v39 = vld [vmem:[%s6514_s2 + $0xb4] sm:$0xf0] }
 0x3e8   :  { %v2123_v38 = vpop.f32.mrf.mxu0 }
 0x3e9   :  { %v2124_v8 = vadd.f32 %v2123_v38, %v1980_v51  ;;  %v2137_v11 = vpop.f32.mrf.mxu1 }
 0x3ea   :  { %v2138_v27 = vadd.f32 %v2137_v11, %v1981_v0 }
 0x3eb   :  { %v2156_v18 = vadd.f32 %v3764_v54, %v2124_v8  ;;  %v1982_v54 = vperm.slane %v5925_v40, 2  ;;  %v3766_v40 = vld [vmem:[%s6518_s0 + $0x100] sm:$0xff] }
 0x3ec   :  { %v2166_v41 = vadd.f32 %v3765_v32, %v2138_v27 }
 0x3ed   :  { %v2158_v31 = vmul.f32 0.5, %v2156_v18 }
 0x3ee   :  { %v1887_v34 = vpop.f32.mrf.mxu3  ;;  %v2168_v53 = vmul.f32 0.5, %v2166_v41  ;;  %v4419_v41 = vld [vmem:[%s6514_s2 + $0xb8] sm:$0xf0] }
 0x3ef   :  { %4496 = vtanh.f32 %v2158_v31  ;;  %v6022_v36 = vadd.f32 %v4432_v15, %v1887_v34  ;;  %v2151_v48 = vpop.f32.mrf.mxu2  ;;  %v4395_v34 = vld [vmem:[%s6516_s4 + $0x38] sm:$0xff] }
 0x3f0   :  { %v2125_v43 = vpop.f32.mrf.mxu0  ;;  %v2152_v37 = vadd.f32 %v2151_v48, %v1982_v54  ;;  %2640 = vmatpush.bf16.msra.mxu3 %v4395_v34  ;;  %v4403_v34 = vld [vmem:[%s6514_s2 + $0x38] sm:$0xf0] }
 0x3f1   :  { %v2126_v44 = vadd.f32 %v2125_v43, %v1980_v51  ;;  %v2139_v46 = vpop.f32.mrf.mxu1  ;;  %1892 = vmax.xlane.f32.xlu2 %v6022_v36  ;;  %v4137_v43 = vor.u32 %v4419_v41, %v4136_v22  ;;  %v4070_v22 = vld [vmem:[%s6514_s2 + $0x3c] sm:$0xf0]  ;;  %v4076_v41 = vld [vmem:[%s6514_s2 + $0x38] sm:$0xf] }
 0x3f2   :  { %v2140_v47 = vadd.f32 %v2139_v46, %v1981_v0  ;;  %v4414_v46 = vld [vmem:[%s6514_s2 + $0x94] sm:$0xf] }
 0x3f3   :  { %v2157_v49 = vadd.f32 %v3767_v42, %v2126_v44  ;;  %v4116_v44 = vld [vmem:[%s6514_s2 + $0x90] sm:$0xf]  ;;  %2904 = vmatpush.bf16.msrb.mxu2 %v4137_v43 }
 0x3f4   :  { %v2167_v58 = vadd.f32 %v3768_v45, %v2140_v47  ;;  %v4415_v45 = vld [vmem:[%s6514_s2 + $0x98] sm:$0xf0]  ;;  %v4394_v47 = vld [vmem:[%s6516_s4 + $0x30] sm:$0xff] }
 0x3f5   :  { %v4497_v50 = vpop.eup %4496  ;;  %v2159_v51 = vmul.f32 0.5, %v2157_v49  ;;  %v4117_v48 = vor.u32 %v4415_v45, %v4116_v44  ;;  %v4118_v49 = vld [vmem:[%s6514_s2 + $0x9c] sm:$0xf0]  ;;  %2641 = vmatpush.bf16.msra.mxu3 %v4394_v47  ;;  %v4404_v45 = vld [vmem:[%s6514_s2 + $0x40] sm:$0xf0] }
 0x3f6   :  { %v2162_v6 = vadd.f32 1.0, %v4497_v50  ;;  %v2169_v7 = vmul.f32 0.5, %v2167_v58  ;;  %v1889_v21 = vpop.f32.mrf.mxu3  ;;  %v4416_v58 = vld [vmem:[%s6514_s2 + $0xa0] sm:$0xf0]  ;;  %v4056_v47 = vld [vmem:[%s6514_s2 + $0x18] sm:$0xf] }
 0x3f7   :  { %4498 = vtanh.f32 %v2159_v51  ;;  %v6032_v62 = vadd.f32 %v4432_v15, %v1889_v21  ;;  %v2153_v2 = vpop.f32.mrf.mxu2  ;;  %v4104_v51 = vld [vmem:[%s6514_s2 + $0x78] sm:$0xf]  ;;  %v4393_v21 = vld [vmem:[%s6516_s4 + $0x28] sm:$0xff] }
 0x3f8   :  { %4500 = vtanh.f32 %v2168_v53  ;;  %v2164_v38 = vmul.f32 0.5, %v2162_v6  ;;  %v2154_v12 = vadd.f32 %v2153_v2, %v1982_v54  ;;  %v4124_v53 = vld [vmem:[%s6514_s2 + $0x98] sm:$0xf]  ;;  %v4121_v54 = vor.u32 %v4414_v46, %v4118_v49  ;;  %v4412_v6 = vld [vmem:[%s6514_s2 + $0x80] sm:$0xf0]  ;;  %v4389_v46 = vld [vmem:[%s6516_s4 + $0x8] sm:$0xff] }
 0x3f9   :  { %1894 = vmax.xlane.f32.xlu0 %v6032_v62  ;;  %4502 = vtanh.f32 %v2169_v7  ;;  %v4125_v50 = vor.u32 %v4416_v58, %v4124_v53  ;;  %v4411_v7 = vld [vmem:[%s6514_s2 + $0x7c] sm:$0xf]  ;;  %2642 = vmatpush.bf16.msra.mxu3 %v4393_v21  ;;  %v4077_v53 = vor.u32 %v4404_v45, %v4076_v41  ;;  %v4401_v21 = vld [vmem:[%s6514_s2 + $0x28] sm:$0xf0] }
 0x3fa   :  { %v2176_v0 = vmul.f32 %v2164_v38, %v2152_v37  ;;  %v4105_v37 = vor.u32 %v4412_v6, %v4104_v51  ;;  %v4106_v38 = vld [vmem:[%s6514_s2 + $0x84] sm:$0xf0]  ;;  %v4399_v58 = vld [vmem:[%s6514_s2 + $0x1c] sm:$0xf]  ;;  %v4433_v51 = vld [vmem:[%s6519_s5] ss:$0 sm:$0xff] }
 0x3fb   :  { %2905 = vmatpush.bf16.msrb.mxu2 %v4125_v50  ;;  %v4058_v50 = vld [vmem:[%s6514_s2 + $0x24] sm:$0xf0] }
 0x3fc   :  { %v2178_v5 = vadd.f32 %v3766_v40, %v2176_v0  ;;  %v4109_v0 = vor.u32 %v4411_v7, %v4106_v38  ;;  %v4112_v40 = vld [vmem:[%s6514_s2 + $0x80] sm:$0xf]  ;;  %v4061_v38 = vor.u32 %v4399_v58, %v4058_v50 }
 0x3fd   :  { %v4499_v1 = vpop.eup %4498  ;;  %v4064_v7 = vld [vmem:[%s6514_s2 + $0x20] sm:$0xf] }
 0x3fe   :  { %v4501_v4 = vpop.eup %4500  ;;  %v2163_v8 = vadd.f32 1.0, %v4499_v1  ;;  %4504 = vtanh.f32 %v2178_v5  ;;  %v4413_v1 = vld [vmem:[%s6514_s2 + $0x88] sm:$0xf0] }
 0x3ff   :  { %v4503_v11 = vpop.eup %4502  ;;  %v2172_v61 = vadd.f32 1.0, %v4501_v4  ;;  %v4113_v2 = vor.u32 %v4413_v1, %v4112_v40  ;;  %v4092_v4 = vld [vmem:[%s6514_s2 + $0x60] sm:$0xf]  ;;  %v4409_v5 = vld [vmem:[%s6514_s2 + $0x68] sm:$0xf0] }
 0x400   :  { %v2165_v13 = vmul.f32 0.5, %v2163_v8  ;;  %v2173_v16 = vadd.f32 1.0, %v4503_v11  ;;  %v4408_v8 = vld [vmem:[%s6514_s2 + $0x64] sm:$0xf]  ;;  %v4044_v40 = vld [vmem:[%s6514_s2] sm:$0xf] }
 0x401   :  { %v2174_v20 = vmul.f32 0.5, %v2172_v61  ;;  %2906 = vmatpush.bf16.msrb.mxu2 %v4113_v2  ;;  %v4392_v11 = vld [vmem:[%s6516_s4 + $0x20] sm:$0xff]  ;;  %v4100_v61 = vld [vmem:[%s6514_s2 + $0x68] sm:$0xf]  ;;  %v4397_v1 = vld [vmem:[%s6514_s2 + $0x8] sm:$0xf0] }
 0x402   :  { %v2177_v15 = vmul.f32 %v2165_v13, %v2154_v12  ;;  %v2175_v18 = vmul.f32 0.5, %v2173_v16  ;;  %v4093_v12 = vor.u32 %v4409_v5, %v4092_v4  ;;  %v4094_v13 = vld [vmem:[%s6514_s2 + $0x6c] sm:$0xf0]  ;;  %v6136_v16 = vld [vmem:[%s6517_s3] sm:$0x7]  ;;  %2643 = vmatpush.bf16.msra.mxu3 %v4392_v11 }
 0x403   :  { %v2182_v24 = vsub.f32 1.0, %v2174_v20  ;;  %v2186_v27 = vmul.f32 %v2174_v20, %v5832_v55  ;;  %v4418_v55 = vld [vmem:[%s6514_s2 + $0xb0] sm:$0xf0]  ;;  %v4080_v20 = vld [vmem:[%s6514_s2 + $0x48] sm:$0xf]  ;;  %v2362_v43 = vperm.slane %v6136_v16, 1 }
 0x404   :  { %v2179_v19 = vadd.f32 %v3769_v14, %v2177_v15  ;;  %v4505_v23 = vpop.eup %4504  ;;  %v2183_v25 = vsub.f32 1.0, %v2175_v18  ;;  %v2187_v3 = vmul.f32 %v2175_v18, %v5834_v57  ;;  %v4417_v57 = vld [vmem:[%s6514_s2 + $0xac] sm:$0xf]  ;;  %v4129_v35 = vor.u32 %v4418_v55, %v4128_v33  ;;  %v4410_v15 = vld [vmem:[%s6514_s2 + $0x70] sm:$0xf0]  ;;  %v3900_v33 = vld [vmem:[%s6518_s0 + $0x120] sm:$0xff] }
 0x405   :  { %v2184_v59 = vmul.f32 %v4505_v23, %v2182_v24  ;;  %v4133_v42 = vor.u32 %v4417_v57, %v4130_v39  ;;  %v4097_v14 = vor.u32 %v4408_v8, %v4094_v13  ;;  %v4406_v18 = vld [vmem:[%s6514_s2 + $0x50] sm:$0xf0]  ;;  %v4405_v23 = vld [vmem:[%s6514_s2 + $0x4c] sm:$0xf]  ;;  %v4391_v24 = vld [vmem:[%s6516_s4 + $0x18] sm:$0xff] }
 0x406   :  { %4506 = vtanh.f32 %v2179_v19  ;;  %2876 = vmatpush.bf16.msrb.mxu0 %v4129_v35  ;;  %v4101_v19 = vor.u32 %v4410_v15, %v4100_v61  ;;  %2644 = vmatpush.bf16.msra.mxu3 %v4391_v24  ;;  %v4390_v55 = vld [vmem:[%s6516_s4 + $0x10] sm:$0xff]  ;;  %v4396_v2 = vld [vmem:[%s6514_s2 + $0x4] sm:$0xf]  ;;  %v4052_v8 = vld [vmem:[%s6514_s2 + $0x8] sm:$0xf]  ;;  %v4045_v15 = vor.u32 %v4397_v1, %v4044_v40 }
 0x407   :  { %v6043_v29 = vadd.f32 %v2186_v27, %v2184_v59  ;;  %2890 = vmatpush.bf16.msrb.mxu1 %v4133_v42  ;;  %v4082_v59 = vld [vmem:[%s6514_s2 + $0x54] sm:$0xf0]  ;;  %v4088_v27 = vld [vmem:[%s6514_s2 + $0x50] sm:$0xf]  ;;  %v4402_v39 = vld [vmem:[%s6514_s2 + $0x34] sm:$0xf] }
 0x408   :  { %2907 = vmatpush.bf16.msrb.mxu2 %v4101_v19  ;;  %v4068_v57 = vld [vmem:[%s6514_s2 + $0x30] sm:$0xf]  ;;  %v4073_v44 = vor.u32 %v4402_v39, %v4070_v22  ;;  %v4398_v11 = vld [vmem:[%s6514_s2 + $0x10] sm:$0xf0]  ;;  %v3901_v13 = vld [vmem:[%s6518_s0 + $0x128] sm:$0xff] }
 0x409   :  { %v4069_v35 = vor.u32 %v4403_v34, %v4068_v57  ;;  %v4046_v5 = vld [vmem:[%s6514_s2 + $0xc] sm:$0xf0]  ;;  %v4388_v61 = vld [vmem:[%s6516_s4] sm:$0xff]  ;;  %v3903_v24 = vld [vmem:[%s6518_s0 + $0x138] sm:$0xff]  ;;  %v2363_v57 = vperm.slane %v6136_v16, 2 }
 0x40a   :  { %2877 = vmatpush.bf16.msrb.mxu0 %v4117_v48  ;;  %2645 = vmatpush.bf16.msra.mxu3 %v4390_v55 }
 0x40b   :  { %2891 = vmatpush.bf16.msrb.mxu1 %v4121_v54  ;;  %v4400_v54 = vld [vmem:[%s6514_s2 + $0x20] sm:$0xf0] }
 0x40c   :  { %v4507_v60 = vpop.eup %4506  ;;  %v4057_v6 = vor.u32 %v4400_v54, %v4056_v47 }
 0x40d   :  { %v2185_v28 = vmul.f32 %v4507_v60, %v2183_v25  ;;  %v4081_v25 = vor.u32 %v4406_v18, %v4080_v20  ;;  %v4085_v60 = vor.u32 %v4405_v23, %v4082_v59  ;;  %v4049_v20 = vor.u32 %v4396_v2, %v4046_v5 }
 0x40e   :  { %2878 = vmatpush.bf16.msrb.mxu0 %v4105_v37  ;;  %2646 = vmatpush.bf16.msra.mxu3 %v4389_v46  ;;  %v4053_v18 = vor.u32 %v4398_v11, %v4052_v8 }
 0x40f   :  { %v6045_v31 = vadd.f32 %v2187_v3, %v2185_v28  ;;  %2892 = vmatpush.bf16.msrb.mxu1 %v4109_v0  ;;  %v4407_v3 = vld [vmem:[%s6514_s2 + $0x58] sm:$0xf0]  ;;  %v2361_v28 = vperm.slane %v6136_v16, 0  ;;  %v4065_v0 = vor.u32 %v4401_v21, %v4064_v7  ;;  %v3902_v16 = vld [vmem:[%s6518_s0 + $0x130] sm:$0xff] }
 0x411   :  { %v2190_v32 = vpack.c.bf16 %v6045_v31, %v6043_v29 }
 0x412   :  { %2879 = vmatpush.bf16.msrb.mxu0 %v4093_v12  ;;  %2647 = vmatpush.bf16.msra.mxu3 %v4388_v61 }
 0x413   :  { %2267 = vmatmul.bf16.vlgmr.msrb.gmra.mxu3 %v2190_v32  ;;  %2503 = vmatmul.bf16.vlgmr.msra.gmra.mxu0 %v2190_v32 }
 0x414   :  { %2517 = vmatmul.bf16.vlgmr.msra.gmra.mxu1 %v2190_v32  ;;  %2531 = vmatmul.bf16.vlgmr.msra.gmra.mxu2 %v2190_v32  ;;  %v4089_v32 = vor.u32 %v4407_v3, %v4088_v27 }
 0x415   :  { %2893 = vmatpush.bf16.msrb.mxu1 %v4097_v14 }
 0x416   :  { %2880 = vmatpush.bf16.msrb.mxu0 %v4081_v25  ;;  %2908 = vmatpush.bf16.msrb.mxu2 %v4089_v32 }
 0x419   :  { %2894 = vmatpush.bf16.msrb.mxu1 %v4085_v60  ;;  %v3904_v60 = vld [vmem:[%s6518_s0 + $0x140] sm:$0xff] }
 0x41a   :  { %2881 = vmatpush.bf16.msrb.mxu0 %v4069_v35  ;;  %2909 = vmatpush.bf16.msrb.mxu2 %v4077_v53 }
 0x41d   :  { %2895 = vmatpush.bf16.msrb.mxu1 %v4073_v44 }
 0x41e   :  { %2882 = vmatpush.bf16.msrb.mxu0 %v4057_v6  ;;  %2910 = vmatpush.bf16.msrb.mxu2 %v4065_v0  ;;  %v3905_v6 = vld [vmem:[%s6518_s0 + $0x148] sm:$0xff] }
 0x421   :  { %2896 = vmatpush.bf16.msrb.mxu1 %v4061_v38 }
 0x422   :  { %2883 = vmatpush.bf16.msrb.mxu0 %v4045_v15  ;;  %2911 = vmatpush.bf16.msrb.mxu2 %v4053_v18  ;;  %v4427_v15 = vld [vmem:[%s6516_s4 + $0x38] sm:$0xff]  ;;  %v6275_v18 = vld [vmem:[%s6517_s3] sm:$0x7] }
 0x423   :  { %3021 = vmatpush.bf16.msrb.mxu3 %v4427_v15 }
 0x425   :  { %2897 = vmatpush.bf16.msrb.mxu1 %v4049_v20  ;;  %v4424_v20 = vld [vmem:[%s6516_s4 + $0x20] sm:$0xff] }
 0x490   :  { %v2504_v42 = vpop.f32.mrf.mxu0 }
 0x491   :  { %v2505_v48 = vadd.f32 %v2504_v42, %v2361_v28  ;;  %v2518_v49 = vpop.f32.mrf.mxu1 }
 0x492   :  { %v2519_v4 = vadd.f32 %v2518_v49, %v2362_v43 }
 0x493   :  { %v2537_v37 = vadd.f32 %v3900_v33, %v2505_v48 }
 0x494   :  { %v2547_v23 = vadd.f32 %v3901_v13, %v2519_v4 }
 0x495   :  { %v2539_v12 = vmul.f32 0.5, %v2537_v37 }
 0x496   :  { %v2268_v14 = vpop.f32.mrf.mxu3  ;;  %v2549_v55 = vmul.f32 0.5, %v2547_v23  ;;  %v4423_v23 = vld [vmem:[%s6516_s4 + $0x18] sm:$0xff] }
 0x497   :  { %4508 = vtanh.f32 %v2539_v12  ;;  %v6233_v19 = vadd.f32 %v4433_v51, %v2268_v14  ;;  %v2532_v32 = vpop.f32.mrf.mxu2 }
 0x498   :  { %v2506_v25 = vpop.f32.mrf.mxu0  ;;  %v2533_v44 = vadd.f32 %v2532_v32, %v2363_v57  ;;  %v4037_v32 = vld [vmem:[%s6518_s0 + $0x158] sm:$0xff] }
 0x499   :  { %v2507_v59 = vadd.f32 %v2506_v25, %v2361_v28  ;;  %v2520_v27 = vpop.f32.mrf.mxu1  ;;  %2273 = vmax.xlane.f32.xlu1 %v6233_v19  ;;  %v2743_v25 = vperm.slane %v6275_v18, 1 }
 0x49a   :  { %v2521_v3 = vadd.f32 %v2520_v27, %v2362_v43 }
 0x49b   :  { %v2538_v33 = vadd.f32 %v3903_v24, %v2507_v59  ;;  %v2742_v24 = vperm.slane %v6275_v18, 0  ;;  %v4422_v59 = vld [vmem:[%s6516_s4 + $0x10] sm:$0xff] }
 0x49c   :  { %v2548_v34 = vadd.f32 %v3904_v60, %v2521_v3  ;;  %v4036_v60 = vld [vmem:[%s6518_s0 + $0x150] sm:$0xff] }
 0x49d   :  { %v4509_v35 = vpop.eup %4508  ;;  %v2540_v28 = vmul.f32 0.5, %v2538_v33 }
 0x49e   :  { %v2543_v39 = vadd.f32 1.0, %v4509_v35  ;;  %v2550_v22 = vmul.f32 0.5, %v2548_v34  ;;  %v2270_v41 = vpop.f32.mrf.mxu3  ;;  %v4434_v35 = vld [vmem:[%s6519_s5] ss:$0 sm:$0xff] }
 0x49f   :  { %4510 = vtanh.f32 %v2540_v28  ;;  %v6243_v42 = vadd.f32 %v4433_v51, %v2270_v41  ;;  %v2534_v47 = vpop.f32.mrf.mxu2 }
 0x4a0   :  { %4512 = vtanh.f32 %v2549_v55  ;;  %v2545_v43 = vmul.f32 0.5, %v2543_v39  ;;  %v2535_v58 = vadd.f32 %v2534_v47, %v2363_v57  ;;  %v4421_v55 = vld [vmem:[%s6516_s4 + $0x8] sm:$0xff]  ;;  %v370_v39 = vpop.xlane.xlu0 %369 }
 0x4a1   :  { %2275 = vmax.xlane.f32.xlu2 %v6243_v42  ;;  %4514 = vtanh.f32 %v2550_v22  ;;  %v6297_v22 = vpop.xlane.xlu1 %749 }
 0x4a2   :  { %v2557_v45 = vmul.f32 %v2545_v43, %v2533_v44  ;;  %v4420_v44 = vld [vmem:[%s6516_s4] sm:$0xff] }
 0x4a4   :  { %v2559_v49 = vadd.f32 %v3902_v16, %v2557_v45 }
 0x4a5   :  { %v4511_v46 = vpop.eup %4510 }
 0x4a6   :  { %v4513_v48 = vpop.eup %4512  ;;  %v2544_v53 = vadd.f32 1.0, %v4511_v46  ;;  %4516 = vtanh.f32 %v2559_v49  ;;  %v4039_v46 = vld [vmem:[%s6518_s0 + $0x168] sm:$0xff] }
 0x4a7   :  { %v4515_v54 = vpop.eup %4514  ;;  %v2553_v51 = vadd.f32 1.0, %v4513_v48  ;;  %v373_v48 = vsub.f32 %v5178_v52, %v370_v39 }
 0x4a8   :  { %v2546_v50 = vmul.f32 0.5, %v2544_v53  ;;  %v2554_v21 = vadd.f32 1.0, %v4515_v54  ;;  %v4040_v53 = vld [vmem:[%s6518_s0 + $0x170] sm:$0xff] }
 0x4a9   :  { %v2555_v38 = vmul.f32 0.5, %v2553_v51 }
 0x4aa   :  { %v2558_v7 = vmul.f32 %v2546_v50, %v2535_v58  ;;  %v2556_v0 = vmul.f32 0.5, %v2554_v21 }
 0x4ab   :  { %v2563_v1 = vsub.f32 1.0, %v2555_v38  ;;  %v2567_v8 = vmul.f32 %v2555_v38, %v6043_v29  ;;  %v4426_v29 = vld [vmem:[%s6516_s4 + $0x30] sm:$0xff] }
 0x4ac   :  { %v2560_v37 = vadd.f32 %v3905_v6, %v2558_v7  ;;  %v4517_v40 = vpop.eup %4516  ;;  %v2564_v2 = vsub.f32 1.0, %v2556_v0  ;;  %v2568_v11 = vmul.f32 %v2556_v0, %v6045_v31  ;;  %3022 = vmatpush.bf16.msrb.mxu3 %v4426_v29  ;;  %v4425_v31 = vld [vmem:[%s6516_s4 + $0x28] sm:$0xff]  ;;  %v2744_v6 = vperm.slane %v6275_v18, 2 }
 0x4ad   :  { %v2565_v4 = vmul.f32 %v4517_v40, %v2563_v1  ;;  %v6313_v1 = vpop.xlane.xlu0 %371 }
 0x4ae   :  { %4518 = vtanh.f32 %v2560_v37  ;;  %v375_v37 = vmul.f32 1.442695, %v373_v48 }
 0x4af   :  { %v6254_v13 = vadd.f32 %v2567_v8, %v2565_v4 }
 0x4b0   :  { %3023 = vmatpush.bf16.msrb.mxu3 %v4425_v31 }
 0x4b4   :  { %v4519_v5 = vpop.eup %4518  ;;  %3024 = vmatpush.bf16.msrb.mxu3 %v4424_v20 }
 0x4b5   :  { %v2566_v12 = vmul.f32 %v4519_v5, %v2564_v2  ;;  %v752_v2 = vpop.xlane.xlu1 %751 }
 0x4b7   :  { %v6256_v61 = vadd.f32 %v2568_v11, %v2566_v12  ;;  %v4038_v12 = vld [vmem:[%s6518_s0 + $0x160] sm:$0xff] }
 0x4b8   :  { %3025 = vmatpush.bf16.msrb.mxu3 %v4423_v23 }
 0x4b9   :  { %v2571_v14 = vpack.c.bf16 %v6256_v61, %v6254_v13 }
 0x4bb   :  { %2648 = vmatmul.bf16.vlgmr.msra.gmra.mxu3 %v2571_v14  ;;  %2884 = vmatmul.bf16.vlgmr.msrb.gmra.mxu0 %v2571_v14 }
 0x4bc   :  { %2898 = vmatmul.bf16.vlgmr.msrb.gmra.mxu1 %v2571_v14  ;;  %2912 = vmatmul.bf16.vlgmr.msrb.gmra.mxu2 %v2571_v14  ;;  %v754_v14 = vsub.f32 %v5399_v30, %v752_v2  ;;  %v4041_v30 = vld [vmem:[%s6518_s0 + $0x178] sm:$0xff] }
 0x4bd   :  { %3026 = vmatpush.bf16.msrb.mxu3 %v4422_v59  ;;  %v1512_v59 = vpop.xlane.xlu0 %1511 }
 0x4be   :  { %v757_v23 = vmul.f32 1.442695, %v754_v14 }
 0x4c1   :  { %3027 = vmatpush.bf16.msrb.mxu3 %v4421_v55 }
 0x4c5   :  { %3028 = vmatpush.bf16.msrb.mxu3 %v4420_v44 }
 0x538   :  { %v2885_v27 = vpop.f32.mrf.mxu0 }
 0x539   :  { %v2886_v3 = vadd.f32 %v2885_v27, %v2742_v24  ;;  %v2899_v33 = vpop.f32.mrf.mxu1 }
 0x53a   :  { %v2900_v57 = vadd.f32 %v2899_v33, %v2743_v25  ;;  %v1515_v33 = vsub.f32 %v5811_v63, %v1512_v59 }
 0x53b   :  { %v2918_v34 = vadd.f32 %v4036_v60, %v2886_v3 }
 0x53c   :  { %v2928_v28 = vadd.f32 %v4037_v32, %v2900_v57  ;;  %v1517_v44 = vmul.f32 1.442695, %v1515_v33 }
 0x53d   :  { %v2920_v41 = vmul.f32 0.5, %v2918_v34 }
 0x53e   :  { %v2930_v43 = vmul.f32 0.5, %v2928_v28  ;;  %v2649_v45 = vpop.f32.mrf.mxu3 }
 0x53f   :  { %4520 = vtanh.f32 %v2920_v41  ;;  %v6302_v16 = vadd.f32 %v4434_v35, %v2649_v45  ;;  %v2913_v50 = vpop.f32.mrf.mxu2 }
 0x540   :  { %v2887_v47 = vpop.f32.mrf.mxu0  ;;  %4522 = vtanh.f32 %v2930_v43  ;;  %v2914_v8 = vadd.f32 %v2913_v50, %v2744_v6  ;;  %v1895_v43 = vpop.xlane.xlu0 %1894 }
 0x541   :  { %v2888_v49 = vadd.f32 %v2887_v47, %v2742_v24  ;;  %v2901_v54 = vpop.f32.mrf.mxu1  ;;  %2654 = vmax.xlane.f32.xlu0 %v6302_v16  ;;  %v1897_v63 = vsub.f32 %v6032_v62, %v1895_v43  ;;  %v6347_v62 = vpop.xlane.xlu1 %1513  ;;  %v374_v43 = vsub.f32 %v5188_v10, %v6313_v1 }
 0x542   :  { %v2902_v58 = vadd.f32 %v2901_v54, %v2743_v25 }
 0x543   :  { %v2919_v51 = vadd.f32 %v4039_v46, %v2888_v49  ;;  %v1900_v54 = vmul.f32 1.442695, %v1897_v63 }
 0x544   :  { %v2929_v7 = vadd.f32 %v4040_v53, %v2902_v58 }
 0x545   :  { %v4521_v21 = vpop.eup %4520  ;;  %v2921_v38 = vmul.f32 0.5, %v2919_v51 }
 0x546   :  { %v2924_v52 = vadd.f32 1.0, %v4521_v21  ;;  %v2931_v0 = vmul.f32 0.5, %v2929_v7  ;;  %v2651_v40 = vpop.f32.mrf.mxu3  ;;  %v4523_v5 = vpop.eup %4522 }
 0x547   :  { %4524 = vtanh.f32 %v2921_v38  ;;  %v6315_v4 = vadd.f32 %v4434_v35, %v2651_v40  ;;  %v2934_v29 = vadd.f32 1.0, %v4523_v5  ;;  %v2915_v18 = vpop.f32.mrf.mxu2 }
 0x548   :  { %v2926_v11 = vmul.f32 0.5, %v2924_v52  ;;  %4526 = vpow2.f32 %v375_v37  ;;  %v2916_v3 = vadd.f32 %v2915_v18, %v2744_v6 }
 0x549   :  { %2656 = vmax.xlane.f32.xlu1 %v6315_v4  ;;  %4528 = vtanh.f32 %v2931_v0  ;;  %v2936_v60 = vmul.f32 0.5, %v2934_v29 }
 0x54a   :  { %v2938_v15 = vmul.f32 %v2926_v11, %v2914_v8 }
 0x54b   :  { %v2944_v57 = vsub.f32 1.0, %v2936_v60  ;;  %v2948_v39 = vmul.f32 %v2936_v60, %v6254_v13 }
 0x54c   :  { %v2940_v31 = vadd.f32 %v4038_v12, %v2938_v15 }
 0x54d   :  { %v4525_v20 = vpop.eup %4524 }
 0x54e   :  { %4530 = vtanh.f32 %v2940_v31  ;;  %v2925_v24 = vadd.f32 1.0, %v4525_v20  ;;  %v6322_v25 = vpop.eup %4526 }
 0x54f   :  { %v4529_v27 = vpop.eup %4528  ;;  %4532 = vpow2.f32 %v757_v23 }
 0x550   :  { %v2927_v32 = vmul.f32 0.5, %v2925_v24  ;;  %v2935_v34 = vadd.f32 1.0, %v4529_v27 }
 0x551   :  { %379 = vadd.xlane.f32.xlu1 %v6322_v25 }
 0x552   :  { %v2939_v55 = vmul.f32 %v2927_v32, %v2916_v3  ;;  %v2937_v45 = vmul.f32 0.5, %v2935_v34 }
 0x554   :  { %v4531_v35 = vpop.eup %4530  ;;  %v2941_v28 = vadd.f32 %v4041_v30, %v2939_v55  ;;  %v2945_v48 = vsub.f32 1.0, %v2937_v45  ;;  %v2949_v13 = vmul.f32 %v2937_v45, %v6256_v61  ;;  %v6349_v61 = vpop.xlane.xlu1 %2273 }
 0x555   :  { %v2946_v41 = vmul.f32 %v4531_v35, %v2944_v57  ;;  %v6330_v47 = vpop.eup %4532 }
 0x556   :  { %4534 = vtanh.f32 %v2941_v28 }
 0x557   :  { %v2950_v46 = vadd.f32 %v2948_v39, %v2946_v41  ;;  %4536 = vpow2.f32 %v1517_v44 }
 0x558   :  { %4538 = vpow2.f32 %v1900_v54  ;;  %v377_v54 = vmul.f32 1.442695, %v374_v43 }
 0x559   :  { %761 = vadd.xlane.f32.xlu1 %v6330_v47  ;;  %3082 = vst [vmem:[%s6520_s7] sm:$0xff] %v2950_v46 }
 0x55c   :  { %v4535_v49 = vpop.eup %4534 }
 0x55d   :  { %v2947_v53 = vmul.f32 %v4535_v49, %v2945_v48  ;;  %v6338_v50 = vpop.eup %4536  ;;  %v1131_v48 = vpop.xlane.xlu2 %1130 }
 0x55e   :  { %v6344_v6 = vpop.eup %4538 }
 0x55f   :  { %v2951_v58 = vadd.f32 %v2949_v13, %v2947_v53 }
 0x561   :  { %1521 = vadd.xlane.f32.xlu1 %v6338_v50  ;;  %v2952_v51 = vpack.c.bf16 %v2951_v58, %v2950_v46  ;;  %3083 = vst [vmem:[%s6520_s7 + $0x8] sm:$0xff] %v2951_v58 }
 0x563   :  { %3029 = vmatmul.bf16.vlgmr.msrb.gmra.mxu3 %v2952_v51 }
 0x569   :  { %1904 = vadd.xlane.f32.xlu1 %v6344_v6 }
 0x5b4   :  { %v2655_v7 = vpop.xlane.xlu0 %2654 }
 0x5b5   :  { %v2658_v21 = vsub.f32 %v6302_v16, %v2655_v7 }
 0x5b7   :  { %v2660_v37 = vmul.f32 1.442695, %v2658_v21 }
 0x5b9   :  { %4540 = vpow2.f32 %v2660_v37 }
 0x5bc   :  { %v6352_v38 = vpop.xlane.xlu1 %2656 }
 0x5bf   :  { %v6354_v52 = vpop.eup %4540 }
 0x5c0   :  { %2664 = vadd.xlane.f32.xlu1 %v6354_v52 }
 0x5c4   :  { %v380_v0 = vpop.xlane.xlu1 %379 }
 0x5c5   :  { %4542 = vrcp.f32 %v380_v0  ;;  %v394_v11 = vand.u32 2147483648, %v380_v0  ;;  %v392_v14 = vand.u32 2147483647, %v380_v0  ;;  %vm388_vm1 = vweird.f32 %v380_v0 }
 0x5c7   :  { %v395_v29 = vor.u32 1.1754944e-38, %v394_v11  ;;  %vm393_vm3 = vcmp.eq.f32.partialorder %v392_v14, 8.507059e+37  ;;  %v1133_v14 = vpop.xlane.xlu2 %1132 }
 0x5cb   :  { %v4543_v40 = vpop.eup %4542 }
 0x5cc   :  { %v384_v2 = vmul.f32 %v4543_v40, %v380_v0  ;;  %v762_v5 = vpop.xlane.xlu1 %761  ;;  %vm389_vm0 = vweird.f32 %v4543_v40  ;;  %v753_v0 = vsub.f32 %v5389_v9, %v6297_v22  ;;  %v1516_v22 = vsub.f32 %v5821_v26, %v6347_v62 }
 0x5cd   :  { %4544 = vrcp.f32 %v762_v5  ;;  %vm390_vm2 = vmor %vm388_vm1, %vm389_vm0  ;;  %v789_v60 = vand.u32 2147483648, %v762_v5  ;;  %v787_v3 = vand.u32 2147483647, %v762_v5  ;;  %vm783_vm5 = vweird.f32 %v762_v5 }
 0x5ce   :  { %v385_v8 = vsub.f32 1.0, %v384_v2 }
 0x5cf   :  { %v790_v33 = vor.u32 1.1754944e-38, %v789_v60  ;;  %vm788_vm7 = vcmp.eq.f32.partialorder %v787_v3, 8.507059e+37 }
 0x5d0   :  { %v386_v12 = vmul.f32 %v4543_v40, %v385_v8  ;;  %v755_v8 = vmul.f32 1.442695, %v753_v0 }
 0x5d2   :  { %v387_v16 = vadd.f32 %v4543_v40, %v386_v12 }
 0x5d3   :  { %v4545_v15 = vpop.eup %4544 }
 0x5d4   :  { %v391_v31 = vsel %vm390_vm2, %v4543_v40, %v387_v16  ;;  %v779_v20 = vmul.f32 %v4545_v15, %v762_v5  ;;  %v1522_v18 = vpop.xlane.xlu1 %1521  ;;  %vm784_vm4 = vweird.f32 %v4545_v15 }
 0x5d5   :  { %v396_v23 = vsel %vm393_vm3, %v395_v29, %v391_v31  ;;  %4546 = vrcp.f32 %v1522_v18  ;;  %vm785_vm6 = vmor %vm783_vm5, %vm784_vm4  ;;  %v1536_v39 = vand.u32 2147483648, %v1522_v18  ;;  %v1534_v44 = vand.u32 2147483647, %v1522_v18 }
 0x5d6   :  { %v397_v24 = vmul.f32 %v6322_v25, %v396_v23  ;;  %v780_v59 = vsub.f32 1.0, %v779_v20  ;;  %vm1530_vm9 = vweird.f32 %v1522_v18  ;;  %v1519_v31 = vmul.f32 1.442695, %v1516_v22  ;;  %v1893_v20 = vpop.xlane.xlu2 %1892 }
 0x5d7   :  { %v1537_v63 = vor.u32 1.1754944e-38, %v1536_v39  ;;  %vm1535_vm11 = vcmp.eq.f32.partialorder %v1534_v44, 8.507059e+37 }
 0x5d8   :  { %413 = vst [vmem:[%s6521_s6] sm:$0xff] %v397_v24  ;;  %v781_v27 = vmul.f32 %v4545_v15, %v780_v59  ;;  %v1896_v24 = vsub.f32 %v6022_v36, %v1893_v20  ;;  %v2659_v36 = vsub.f32 %v6315_v4, %v6352_v38 }
 0x5da   :  { %v782_v32 = vadd.f32 %v4545_v15, %v781_v27  ;;  %v1898_v59 = vmul.f32 1.442695, %v1896_v24 }
 0x5db   :  { %v4547_v30 = vpop.eup %4546 }
 0x5dc   :  { %v786_v55 = vsel %vm785_vm6, %v4545_v15, %v782_v32  ;;  %v1526_v57 = vmul.f32 %v4547_v30, %v1522_v18  ;;  %v1905_v34 = vpop.xlane.xlu1 %1904  ;;  %vm1531_vm8 = vweird.f32 %v4547_v30 }
 0x5dd   :  { %v791_v35 = vsel %vm788_vm7, %v790_v33, %v786_v55  ;;  %4548 = vrcp.f32 %v1905_v34  ;;  %vm1532_vm10 = vmor %vm1530_vm9, %vm1531_vm8  ;;  %v1932_v10 = vand.u32 2147483648, %v1905_v34  ;;  %v1930_v37 = vand.u32 2147483647, %v1905_v34 }
 0x5de   :  { %v792_v25 = vmul.f32 %v6330_v47, %v791_v35  ;;  %v1527_v28 = vsub.f32 1.0, %v1526_v57  ;;  %v4435_v47 = vld [vmem:[%s6519_s5] ss:$0 sm:$0xff]  ;;  %4550 = vpow2.f32 %v377_v54  ;;  %vm1926_vm13 = vweird.f32 %v1905_v34  ;;  %v2276_v62 = vpop.xlane.xlu2 %2275 }
 0x5df   :  { %v1933_v2 = vor.u32 1.1754944e-38, %v1932_v10  ;;  %vm1931_vm15 = vcmp.eq.f32.partialorder %v1930_v37, 8.507059e+37  ;;  %4552 = vpow2.f32 %v755_v8  ;;  %v2278_v3 = vsub.f32 %v6243_v42, %v2276_v62 }
 0x5e0   :  { %3355 = vst [vmem:[%s6521_s6 + $0x18] sm:$0xff] %v792_v25  ;;  %v1528_v41 = vmul.f32 %v4547_v30, %v1527_v28 }
 0x5e1   :  { %v2281_v32 = vmul.f32 1.442695, %v2278_v3 }
 0x5e2   :  { %v1529_v45 = vadd.f32 %v4547_v30, %v1528_v41 }
 0x5e3   :  { %v4549_v46 = vpop.eup %4548 }
 0x5e4   :  { %v1533_v49 = vsel %vm1532_vm10, %v4547_v30, %v1529_v45  ;;  %v1922_v13 = vmul.f32 %v4549_v46, %v1905_v34  ;;  %vm1927_vm12 = vweird.f32 %v4549_v46  ;;  %v6383_v9 = vpop.eup %4550 }
 0x5e5   :  { %v1538_v53 = vsel %vm1535_vm11, %v1537_v63, %v1533_v49  ;;  %vm1928_vm14 = vmor %vm1926_vm13, %vm1927_vm12  ;;  %v6393_v18 = vpop.eup %4552 }
 0x5e6   :  { %v1539_v58 = vmul.f32 %v6338_v50, %v1538_v53  ;;  %v1923_v51 = vsub.f32 1.0, %v1922_v13  ;;  %v3030_v7 = vpop.f32.mrf.mxu3  ;;  %v1134_v50 = vsub.f32 %v5600_v17, %v1131_v48  ;;  %v1135_v17 = vsub.f32 %v5610_v56, %v1133_v14 }
 0x5e7   :  { %v6371_v1 = vadd.f32 %v4435_v47, %v3030_v7  ;;  %v2277_v56 = vsub.f32 %v6233_v19, %v6349_v61  ;;  %v2662_v19 = vmul.f32 1.442695, %v2659_v36 }
 0x5e8   :  { %3626 = vst [vmem:[%s6521_s6 + $0x30] sm:$0xff] %v1539_v58  ;;  %v1924_v21 = vmul.f32 %v4549_v46, %v1923_v51  ;;  %v1136_v12 = vmul.f32 1.442695, %v1134_v50 }
 0x5e9   :  { %3035 = vmax.xlane.f32.xlu2 %v6371_v1  ;;  %v2279_v26 = vmul.f32 1.442695, %v2277_v56 }
 0x5ea   :  { %v1925_v40 = vadd.f32 %v4549_v46, %v1924_v21  ;;  %4554 = vpow2.f32 %v1136_v12 }
 0x5ec   :  { %v1929_v5 = vsel %vm1928_vm14, %v4549_v46, %v1925_v40 }
 0x5ed   :  { %v1934_v11 = vsel %vm1931_vm15, %v1933_v2, %v1929_v5 }
 0x5ee   :  { %v1935_v16 = vmul.f32 %v6344_v6, %v1934_v11  ;;  %v3032_v15 = vpop.f32.mrf.mxu3  ;;  %v1138_v6 = vmul.f32 1.442695, %v1135_v17 }
 0x5ef   :  { %v6381_v29 = vadd.f32 %v4435_v47, %v3032_v15 }
 0x5f0   :  { %3763 = vst [vmem:[%s6521_s6 + $0x48] sm:$0xff] %v1935_v16  ;;  %v6395_v23 = vpop.eup %4554  ;;  %4556 = vpow2.f32 %v1138_v6 }
 0x5f1   :  { %3037 = vmax.xlane.f32.xlu0 %v6381_v29  ;;  %381 = vadd.xlane.f32.xlu2 %v6383_v9  ;;  %4558 = vpow2.f32 %v1519_v31 }
 0x5f2   :  { %4560 = vpow2.f32 %v1898_v59 }
 0x5f3   :  { %4562 = vpow2.f32 %v2279_v26 }
 0x5f4   :  { %4564 = vpow2.f32 %v2281_v32 }
 0x5f5   :  { %4566 = vpow2.f32 %v2662_v19 }
 0x5f6   :  { %v6402_v60 = vpop.eup %4556 }
 0x5f7   :  { %v6404_v27 = vpop.eup %4558 }
 0x5f8   :  { %v6411_v61 = vpop.eup %4560 }
 0x5f9   :  { %759 = vadd.xlane.f32.xlu0 %v6393_v18  ;;  %1140 = vadd.xlane.f32.xlu2 %v6395_v23  ;;  %v6413_v30 = vpop.eup %4562 }
 0x5fa   :  { %v6417_v42 = vpop.eup %4564 }
 0x5fb   :  { %v6419_v33 = vpop.eup %4566 }
 0x601   :  { %1142 = vadd.xlane.f32.xlu0 %v6402_v60  ;;  %1523 = vadd.xlane.f32.xlu2 %v6404_v27 }
 0x609   :  { %1902 = vadd.xlane.f32.xlu0 %v6411_v61  ;;  %2283 = vadd.xlane.f32.xlu2 %v6413_v30 }
 0x611   :  { %2285 = vadd.xlane.f32.xlu0 %v6417_v42  ;;  %2666 = vadd.xlane.f32.xlu2 %v6419_v33 }
 0x633   :  { %v2665_v4 = vpop.xlane.xlu1 %2664 }
 0x634   :  { %4568 = vrcp.f32 %v2665_v4  ;;  %v2679_v34 = vand.u32 2147483648, %v2665_v4  ;;  %v2677_v25 = vand.u32 2147483647, %v2665_v4  ;;  %vm2673_vm1 = vweird.f32 %v2665_v4 }
 0x636   :  { %v2680_v39 = vor.u32 1.1754944e-38, %v2679_v34  ;;  %vm2678_vm3 = vcmp.eq.f32.partialorder %v2677_v25, 8.507059e+37 }
 0x63a   :  { %v4569_v38 = vpop.eup %4568 }
 0x63b   :  { %v2669_v55 = vmul.f32 %v4569_v38, %v2665_v4  ;;  %vm2674_vm0 = vweird.f32 %v4569_v38 }
 0x63c   :  { %vm2675_vm2 = vmor %vm2673_vm1, %vm2674_vm0 }
 0x63d   :  { %v2670_v57 = vsub.f32 1.0, %v2669_v55 }
 0x63f   :  { %v2671_v35 = vmul.f32 %v4569_v38, %v2670_v57 }
 0x641   :  { %v2672_v28 = vadd.f32 %v4569_v38, %v2671_v35 }
 0x643   :  { %v2676_v41 = vsel %vm2675_vm2, %v4569_v38, %v2672_v28 }
 0x644   :  { %v2681_v44 = vsel %vm2678_vm3, %v2680_v39, %v2676_v41 }
 0x645   :  { %v2682_v43 = vmul.f32 %v6354_v52, %v2681_v44 }
 0x647   :  { %4034 = vst [vmem:[%s6521_s6 + $0x60] sm:$0xff] %v2682_v43 }
 0x65c   :  { %v3036_v45 = vpop.xlane.xlu2 %3035 }
 0x65d   :  { %v3039_v46 = vsub.f32 %v6371_v1, %v3036_v45 }
 0x65f   :  { %v3041_v63 = vmul.f32 1.442695, %v3039_v46 }
 0x661   :  { %4570 = vpow2.f32 %v3041_v63 }
 0x664   :  { %v382_v47 = vpop.xlane.xlu2 %381  ;;  %v3038_v48 = vpop.xlane.xlu0 %3037 }
 0x665   :  { %4572 = vrcp.f32 %v382_v47  ;;  %v3040_v49 = vsub.f32 %v6381_v29, %v3038_v48  ;;  %v409_v10 = vand.u32 2147483648, %v382_v47  ;;  %v407_v37 = vand.u32 2147483647, %v382_v47 }
 0x666   :  { %vm403_vm5 = vweird.f32 %v382_v47 }
 0x667   :  { %v6429_v13 = vpop.eup %4570  ;;  %v3043_v53 = vmul.f32 1.442695, %v3040_v49  ;;  %v410_v40 = vor.u32 1.1754944e-38, %v409_v10  ;;  %vm408_vm7 = vcmp.eq.f32.partialorder %v407_v37, 8.507059e+37 }
 0x668   :  { %3045 = vadd.xlane.f32.xlu0 %v6429_v13 }
 0x669   :  { %4574 = vpow2.f32 %v3043_v53 }
 0x66b   :  { %v4573_v52 = vpop.eup %4572 }
 0x66c   :  { %v399_v54 = vmul.f32 %v4573_v52, %v382_v47  ;;  %v1141_v58 = vpop.xlane.xlu2 %1140  ;;  %v760_v51 = vpop.xlane.xlu0 %759  ;;  %vm404_vm4 = vweird.f32 %v4573_v52 }
 0x66d   :  { %4576 = vrcp.f32 %v1141_v58  ;;  %vm405_vm6 = vmor %vm403_vm5, %vm404_vm4  ;;  %v1155_v17 = vand.u32 2147483648, %v1141_v58  ;;  %v1153_v31 = vand.u32 2147483647, %v1141_v58  ;;  %v774_v20 = vand.u32 2147483648, %v760_v51 }
 0x66e   :  { %v400_v7 = vsub.f32 1.0, %v399_v54  ;;  %4578 = vrcp.f32 %v760_v51  ;;  %v772_v56 = vand.u32 2147483647, %v760_v51  ;;  %vm1149_vm10 = vweird.f32 %v1141_v58 }
 0x66f   :  { %v6432_v1 = vpop.eup %4574  ;;  %vm768_vm12 = vweird.f32 %v760_v51  ;;  %vm1154_vm13 = vcmp.eq.f32.partialorder %v1153_v31, 8.507059e+37  ;;  %v775_v36 = vor.u32 1.1754944e-38, %v774_v20 }
 0x670   :  { %v401_v21 = vmul.f32 %v4573_v52, %v400_v7  ;;  %3047 = vadd.xlane.f32.xlu1 %v6432_v1  ;;  %vm773_vm15 = vcmp.eq.f32.partialorder %v772_v56, 8.507059e+37 }
 0x672   :  { %v402_v0 = vadd.f32 %v4573_v52, %v401_v21 }
 0x673   :  { %v4577_v50 = vpop.eup %4576 }
 0x674   :  { %v4579_v2 = vpop.eup %4578  ;;  %v406_v5 = vsel %vm405_vm6, %v4573_v52, %v402_v0  ;;  %v1145_v8 = vmul.f32 %v4577_v50, %v1141_v58  ;;  %v1524_v11 = vpop.xlane.xlu2 %1523  ;;  %vm1150_vm8 = vweird.f32 %v4577_v50 }
 0x675   :  { %v6435_v12 = vpop.xlane.xlu0 %1142  ;;  %v411_v14 = vsel %vm408_vm7, %v410_v40, %v406_v5  ;;  %v764_v16 = vmul.f32 %v4579_v2, %v760_v51  ;;  %4580 = vrcp.f32 %v1524_v11  ;;  %vm769_vm9 = vweird.f32 %v4579_v2  ;;  %vm1151_vm11 = vmor %vm1149_vm10, %vm1150_vm8 }
 0x676   :  { %v412_v15 = vmul.f32 %v6383_v9, %v411_v14  ;;  %v1146_v29 = vsub.f32 1.0, %v1145_v8  ;;  %4582 = vrcp.f32 %v6435_v12  ;;  %v1156_v9 = vor.u32 1.1754944e-38, %v1155_v17  ;;  %vm770_vm14 = vmor %vm768_vm12, %vm769_vm9 }
 0x677   :  { %v765_v22 = vsub.f32 1.0, %v764_v16  ;;  %v1549_v41 = vand.u32 2147483647, %v1524_v11  ;;  %v1551_v44 = vand.u32 2147483648, %v1524_v11  ;;  %vm1545_vm1 = vweird.f32 %v1524_v11 }
 0x678   :  { %414 = vst [vmem:[%s6521_s6 + $0x8] sm:$0xff] %v412_v15  ;;  %v1147_v6 = vmul.f32 %v4577_v50, %v1146_v29  ;;  %v1168_v63 = vand.u32 2147483647, %v6435_v12  ;;  %vm1164_vm4 = vweird.f32 %v6435_v12 }
 0x679   :  { %v766_v24 = vmul.f32 %v4579_v2, %v765_v22  ;;  %v1552_v48 = vor.u32 1.1754944e-38, %v1551_v44  ;;  %vm1550_vm5 = vcmp.eq.f32.partialorder %v1549_v41, 8.507059e+37 }
 0x67a   :  { %v1148_v59 = vadd.f32 %v4577_v50, %v1147_v6  ;;  %vm1169_vm7 = vcmp.eq.f32.partialorder %v1168_v63, 8.507059e+37 }
 0x67b   :  { %v4581_v26 = vpop.eup %4580  ;;  %v767_v62 = vadd.f32 %v4579_v2, %v766_v24 }
 0x67c   :  { %v1152_v3 = vsel %vm1151_vm11, %v4577_v50, %v1148_v59  ;;  %v1541_v32 = vmul.f32 %v4581_v26, %v1524_v11  ;;  %v6442_v19 = vpop.xlane.xlu2 %2283  ;;  %v4583_v38 = vpop.eup %4582  ;;  %vm1546_vm0 = vweird.f32 %v4581_v26 }
 0x67d   :  { %v6444_v4 = vpop.xlane.xlu0 %1902  ;;  %v1157_v55 = vsel %vm1154_vm13, %v1156_v9, %v1152_v3  ;;  %v771_v57 = vsel %vm770_vm14, %v4579_v2, %v767_v62  ;;  %4584 = vrcp.f32 %v6442_v19  ;;  %v1160_v28 = vmul.f32 %v4583_v38, %v6435_v12  ;;  %vm1547_vm3 = vmor %vm1545_vm1, %vm1546_vm0 }
 0x67e   :  { %v1158_v34 = vmul.f32 %v6395_v23, %v1157_v55  ;;  %v776_v35 = vsel %vm773_vm15, %v775_v36, %v771_v57  ;;  %v1542_v25 = vsub.f32 1.0, %v1541_v32  ;;  %4586 = vrcp.f32 %v6444_v4 }
 0x67f   :  { %v777_v39 = vmul.f32 %v6393_v18, %v776_v35  ;;  %v1161_v45 = vsub.f32 1.0, %v1160_v28  ;;  %v1170_v23 = vand.u32 2147483648, %v6435_v12  ;;  %vm1165_vm2 = vweird.f32 %v4583_v38 }
 0x680   :  { %3490 = vst [vmem:[%s6521_s6 + $0x20] sm:$0xff] %v1158_v34  ;;  %v1543_v43 = vmul.f32 %v4581_v26, %v1542_v25  ;;  %vm1166_vm6 = vmor %vm1164_vm4, %vm1165_vm2  ;;  %v2296_v40 = vand.u32 2147483647, %v6442_v19  ;;  %v2298_v2 = vand.u32 2147483648, %v6442_v19  ;;  %vm2292_vm9 = vweird.f32 %v6442_v19 }
 0x681   :  { %3354 = vst [vmem:[%s6521_s6 + $0x10] sm:$0xff] %v777_v39  ;;  %v1162_v18 = vmul.f32 %v4583_v38, %v1161_v45  ;;  %v1171_v51 = vor.u32 1.1754944e-38, %v1170_v23  ;;  %v1917_v14 = vand.u32 2147483648, %v6444_v4  ;;  %vm1911_vm13 = vweird.f32 %v6444_v4 }
 0x682   :  { %v1544_v46 = vadd.f32 %v4581_v26, %v1543_v43  ;;  %v2299_v15 = vor.u32 1.1754944e-38, %v2298_v2  ;;  %vm2297_vm12 = vcmp.eq.f32.partialorder %v2296_v40, 8.507059e+37 }
 0x683   :  { %v4585_v47 = vpop.eup %4584  ;;  %v1163_v53 = vadd.f32 %v4583_v38, %v1162_v18  ;;  %v1918_v56 = vor.u32 1.1754944e-38, %v1917_v14 }
 0x684   :  { %v1548_v49 = vsel %vm1547_vm3, %v4581_v26, %v1544_v46  ;;  %v2288_v52 = vmul.f32 %v4585_v47, %v6442_v19  ;;  %v6461_v54 = vpop.xlane.xlu2 %2666  ;;  %v4587_v10 = vpop.eup %4586  ;;  %vm2293_vm8 = vweird.f32 %v4585_v47 }
 0x685   :  { %v1553_v58 = vsel %vm1550_vm5, %v1552_v48, %v1548_v49  ;;  %4588 = vrcp.f32 %v6461_v54  ;;  %v6464_v7 = vpop.xlane.xlu0 %2285  ;;  %v1167_v37 = vsel %vm1166_vm6, %v4583_v38, %v1163_v53  ;;  %v1907_v5 = vmul.f32 %v4587_v10, %v6444_v4  ;;  %vm2294_vm10 = vmor %vm2292_vm9, %vm2293_vm8 }
 0x686   :  { %v1554_v21 = vmul.f32 %v6404_v27, %v1553_v58  ;;  %v2289_v0 = vsub.f32 1.0, %v2288_v52  ;;  %v1172_v50 = vsel %vm1169_vm7, %v1171_v51, %v1167_v37  ;;  %4590 = vrcp.f32 %v6464_v7 }
 0x687   :  { %v1173_v8 = vmul.f32 %v6402_v60, %v1172_v50  ;;  %v1908_v27 = vsub.f32 1.0, %v1907_v5  ;;  %vm1912_vm11 = vweird.f32 %v4587_v10  ;;  %v1915_v60 = vand.u32 2147483647, %v6444_v4 }
 0x688   :  { %3627 = vst [vmem:[%s6521_s6 + $0x38] sm:$0xff] %v1554_v21  ;;  %v2290_v11 = vmul.f32 %v4585_v47, %v2289_v0  ;;  %vm1913_vm14 = vmor %vm1911_vm13, %vm1912_vm11  ;;  %v2694_v9 = vand.u32 2147483648, %v6461_v54  ;;  %v2692_v32 = vand.u32 2147483647, %v6461_v54  ;;  %vm2688_vm1 = vweird.f32 %v6461_v54 }
 0x689   :  { %3491 = vst [vmem:[%s6521_s6 + $0x28] sm:$0xff] %v1173_v8  ;;  %v1909_v29 = vmul.f32 %v4587_v10, %v1908_v27  ;;  %vm1916_vm15 = vcmp.eq.f32.partialorder %v1915_v60, 8.507059e+37  ;;  %v2313_v38 = vand.u32 2147483648, %v6464_v7  ;;  %v2311_v34 = vand.u32 2147483647, %v6464_v7 }
 0x68a   :  { %v2291_v12 = vadd.f32 %v4585_v47, %v2290_v11  ;;  %v2695_v55 = vor.u32 1.1754944e-38, %v2694_v9  ;;  %vm2693_vm4 = vcmp.eq.f32.partialorder %v2692_v32, 8.507059e+37  ;;  %vm2307_vm5 = vweird.f32 %v6464_v7 }
 0x68b   :  { %v4589_v16 = vpop.eup %4588  ;;  %v1910_v31 = vadd.f32 %v4587_v10, %v1909_v29  ;;  %v2314_v39 = vor.u32 1.1754944e-38, %v2313_v38  ;;  %vm2312_vm7 = vcmp.eq.f32.partialorder %v2311_v34, 8.507059e+37 }
 0x68c   :  { %v2295_v17 = vsel %vm2294_vm10, %v4585_v47, %v2291_v12  ;;  %v2684_v22 = vmul.f32 %v4589_v16, %v6461_v54  ;;  %v4591_v20 = vpop.eup %4590  ;;  %vm2689_vm0 = vweird.f32 %v4589_v16 }
 0x68d   :  { %v2300_v6 = vsel %vm2297_vm12, %v2299_v15, %v2295_v17  ;;  %v1914_v26 = vsel %vm1913_vm14, %v4587_v10, %v1910_v31  ;;  %v2303_v62 = vmul.f32 %v4591_v20, %v6464_v7  ;;  %vm2690_vm2 = vmor %vm2688_vm1, %vm2689_vm0  ;;  %vm2308_vm3 = vweird.f32 %v4591_v20 }
 0x68e   :  { %v2301_v24 = vmul.f32 %v6413_v30, %v2300_v6  ;;  %v2685_v59 = vsub.f32 1.0, %v2684_v22  ;;  %v1919_v3 = vsel %vm1916_vm15, %v1918_v56, %v1914_v26  ;;  %vm2309_vm6 = vmor %vm2307_vm5, %vm2308_vm3 }
 0x68f   :  { %v1920_v30 = vmul.f32 %v6411_v61, %v1919_v3  ;;  %v2304_v19 = vsub.f32 1.0, %v2303_v62 }
 0x690   :  { %3898 = vst [vmem:[%s6521_s6 + $0x50] sm:$0xff] %v2301_v24  ;;  %v2686_v36 = vmul.f32 %v4589_v16, %v2685_v59 }
 0x691   :  { %3762 = vst [vmem:[%s6521_s6 + $0x40] sm:$0xff] %v1920_v30  ;;  %v2305_v57 = vmul.f32 %v4591_v20, %v2304_v19 }
 0x692   :  { %v2687_v4 = vadd.f32 %v4589_v16, %v2686_v36 }
 0x693   :  { %v2306_v61 = vadd.f32 %v4591_v20, %v2305_v57 }
 0x694   :  { %v2691_v35 = vsel %vm2690_vm2, %v4589_v16, %v2687_v4 }
 0x695   :  { %v2696_v25 = vsel %vm2693_vm4, %v2695_v55, %v2691_v35  ;;  %v2310_v41 = vsel %vm2309_vm6, %v4591_v20, %v2306_v61 }
 0x696   :  { %v2697_v28 = vmul.f32 %v6419_v33, %v2696_v25  ;;  %v2315_v44 = vsel %vm2312_vm7, %v2314_v39, %v2310_v41 }
 0x697   :  { %v2316_v43 = vmul.f32 %v6417_v42, %v2315_v44 }
 0x698   :  { %4035 = vst [vmem:[%s6521_s6 + $0x68] sm:$0xff] %v2697_v28 }
 0x699   :  { %3899 = vst [vmem:[%s6521_s6 + $0x58] sm:$0xff] %v2316_v43 }
 0x6db   :  { %v3046_v45 = vpop.xlane.xlu0 %3045 }
 0x6dc   :  { %4592 = vrcp.f32 %v3046_v45  ;;  %v3060_v63 = vand.u32 2147483648, %v3046_v45  ;;  %v3058_v48 = vand.u32 2147483647, %v3046_v45  ;;  %vm3054_vm9 = vweird.f32 %v3046_v45 }
 0x6de   :  { %v3061_v53 = vor.u32 1.1754944e-38, %v3060_v63  ;;  %vm3059_vm11 = vcmp.eq.f32.partialorder %v3058_v48, 8.507059e+37 }
 0x6e2   :  { %v4593_v23 = vpop.eup %4592 }
 0x6e3   :  { %v3050_v46 = vmul.f32 %v4593_v23, %v3046_v45  ;;  %v3048_v33 = vpop.xlane.xlu1 %3047  ;;  %vm3055_vm8 = vweird.f32 %v4593_v23 }
 0x6e4   :  { %4594 = vrcp.f32 %v3048_v33  ;;  %vm3056_vm10 = vmor %vm3054_vm9, %vm3055_vm8  ;;  %v3075_v10 = vand.u32 2147483648, %v3048_v33  ;;  %v3073_v37 = vand.u32 2147483647, %v3048_v33  ;;  %vm3069_vm13 = vweird.f32 %v3048_v33 }
 0x6e5   :  { %v3051_v18 = vsub.f32 1.0, %v3050_v46 }
 0x6e6   :  { %v3076_v50 = vor.u32 1.1754944e-38, %v3075_v10  ;;  %vm3074_vm15 = vcmp.eq.f32.partialorder %v3073_v37, 8.507059e+37 }
 0x6e7   :  { %v3052_v47 = vmul.f32 %v4593_v23, %v3051_v18 }
 0x6e9   :  { %v3053_v49 = vadd.f32 %v4593_v23, %v3052_v47 }
 0x6ea   :  { %v4595_v42 = vpop.eup %4594 }
 0x6eb   :  { %v3057_v52 = vsel %vm3056_vm10, %v4593_v23, %v3053_v49  ;;  %v3065_v58 = vmul.f32 %v4595_v42, %v3048_v33  ;;  %vm3070_vm12 = vweird.f32 %v4595_v42 }
 0x6ec   :  { %v3062_v54 = vsel %vm3059_vm11, %v3061_v53, %v3057_v52  ;;  %vm3071_vm14 = vmor %vm3069_vm13, %vm3070_vm12 }
 0x6ed   :  { %v3063_v51 = vmul.f32 %v6429_v13, %v3062_v54  ;;  %v3066_v7 = vsub.f32 1.0, %v3065_v58 }
 0x6ef   :  { %4170 = vst [vmem:[%s6521_s6 + $0x70] sm:$0xff] %v3063_v51  ;;  %v3067_v21 = vmul.f32 %v4595_v42, %v3066_v7 }
 0x6f1   :  { %v3068_v0 = vadd.f32 %v4595_v42, %v3067_v21 }
 0x6f3   :  { %v3072_v40 = vsel %vm3071_vm14, %v4595_v42, %v3068_v0 }
 0x6f4   :  { %v3077_v2 = vsel %vm3074_vm15, %v3076_v50, %v3072_v40 }
 0x6f5   :  { %v3078_v5 = vmul.f32 %v6432_v1, %v3077_v2 }
 0x6f7   :  { %4171 = vst [vmem:[%s6521_s6 + $0x78] sm:$0xff] %v3078_v5 }

</bundles_post_ra>
